<compile_context>
chip_gen: v7x
topology: tpu7x:2x2x1
jax: 0.10.0
libtpu: 0.0.40
codegen_flags: <defaults>
</compile_context>

<pallas_src>
import jax
import jax.numpy as jnp
from jax.experimental import pallas as pl
from jax.experimental.pallas import tpu as pltpu


def _make_kernel(bf16_elementwise):
    def kernel(x_ref, w1_ref, wc1_ref, bc1_ref, wc2_ref, bc2_ref,
               wfc_ref, bfc_ref, out_ref):
        # x:   (TM, 20)     bf16
        # w1:  (20, 1024)   bf16    fc1 (no bias)
        # wc1: (1024, 1024) bf16    conv1 middle tap;  bc1: (1, 1024) f32
        # wc2: (1024, 128)  bf16    conv2 middle tap;  bc2: (1, 128)  f32
        # wfc: (128, 128)   bf16    fc, lane-padded;   bfc: (1, 128)  f32
        # out: (TM, 128)    f32     (only lanes [:, :3] are meaningful)
        x = x_ref[...]

        # fc1 + ReLU (f32 accumulation on the MXU).
        h1 = jnp.dot(x, w1_ref[...], preferred_element_type=jnp.float32)
        h1 = jnp.maximum(h1, 0.0)
        h1b = h1.astype(jnp.bfloat16)

        # conv1 (L=1, pad=1 -> middle tap) + bias + residual + ReLU.
        h2 = jnp.dot(h1b, wc1_ref[...], preferred_element_type=jnp.float32)
        if bf16_elementwise:
            h2b = jnp.maximum(
                h2.astype(jnp.bfloat16)
                + bc1_ref[...].astype(jnp.bfloat16) + h1b, 0.0)
        else:
            h2b = jnp.maximum(h2 + bc1_ref[...] + h1, 0.0).astype(jnp.bfloat16)

        # conv2 (middle tap) + bias + ReLU.
        h3 = jnp.dot(h2b, wc2_ref[...], preferred_element_type=jnp.float32)
        if bf16_elementwise:
            h3b = jnp.maximum(
                h3.astype(jnp.bfloat16) + bc2_ref[...].astype(jnp.bfloat16),
                0.0)
        else:
            h3b = jnp.maximum(h3 + bc2_ref[...], 0.0).astype(jnp.bfloat16)

        # Final fc (lane-padded to 128 outputs); bias added in f32.
        out_ref[...] = (
            jnp.dot(h3b, wfc_ref[...], preferred_element_type=jnp.float32)
            + bfc_ref[...])

    return kernel


def _round_up(n, m):
    return -(-n // m) * m


def _device_kind():
    try:
        return jax.devices()[0].device_kind.lower()
    except Exception:
        return ""


def _const_spec(shape):
    """Constant-index (fetched-once, VMEM-resident) weight/bias spec."""
    idx = lambda i: (0, 0)
    if hasattr(pl, "Buffered"):
        try:
            # Single-buffer: these blocks never change across grid steps, so
            # the default 2-deep buffers are pure VMEM waste (matters on v7x).
            return pl.BlockSpec(shape, idx, pipeline_mode=pl.Buffered(1))
        except TypeError:
            pass
    return pl.BlockSpec(shape, idx)


def protein_cnn_forward(x, params, *, tm=1024, bf16_elementwise=None,
                        two_tc=None):
    """x: any shape whose trailing dims flatten to 20 (PyTorch .view(B, -1))."""
    B = x.shape[0]
    x2d = x.reshape(B, -1).astype(jnp.bfloat16)          # (B, 20), bf16 DMA
    assert x2d.shape[1] == 20

    kind = _device_kind()
    if bf16_elementwise is None:
        # bf16-native VALU on v6e/v7x; keep f32 elementwise on v5e (no bf16
        # VALU, and the wc1 matmul dominates there anyway).
        bf16_elementwise = ("v6" in kind) or ("v7" in kind)
    if two_tc is None:
        two_tc = "v7" in kind                            # 2 TensorCores / chip

    w1, wc1, bc1, wc2, bc2, wfc, bfc = params
    w1b = w1.astype(jnp.bfloat16)
    wc1b = wc1.astype(jnp.bfloat16)
    wc2b = wc2.astype(jnp.bfloat16)
    # Lane-dense output: pad the final fc to 128 output lanes (zero matmul
    # cost; converts masked (TM,3) stores into dense (TM,128) stores).
    wfcp = jnp.zeros((128, 128), jnp.bfloat16).at[:, :3].set(
        wfc.astype(jnp.bfloat16))
    bfcp = jnp.zeros((1, 128), jnp.float32).at[:, :3].set(
        bfc.reshape(1, 3).astype(jnp.float32))

    # ---- tile / grid selection ------------------------------------------
    tm_eff = min(tm, _round_up(B, 8))                    # never over-tile
    if two_tc:
        # Guarantee >= 2 grid steps so both v7x TensorCores get work.
        tm_eff = min(tm_eff, max(8, _round_up(pl.cdiv(B, 2), 8)))
    n_tiles = pl.cdiv(B, tm_eff)
    if two_tc and (n_tiles % 2):
        n_tiles += 1                                     # even split over 2 TCs
    b_pad = n_tiles * tm_eff
    if b_pad != B:
        x2d = jnp.pad(x2d, ((0, b_pad - B), (0, 0)))     # zero rows, sliced off

    out = pl.pallas_call(
        _make_kernel(bf16_elementwise),
        out_shape=jax.ShapeDtypeStruct((b_pad, 128), jnp.float32),
        grid_spec=pltpu.PrefetchScalarGridSpec(
            num_scalar_prefetch=0,
            grid=(n_tiles,),
            in_specs=[
                pl.BlockSpec((tm_eff, 20), lambda i: (i, 0)),   # x tile
                _const_spec((20, 1024)),                        # w1
                _const_spec((1024, 1024)),                      # wc1
                _const_spec((1, 1024)),                         # bc1
                _const_spec((1024, 128)),                       # wc2
                _const_spec((1, 128)),                          # bc2
                _const_spec((128, 128)),                        # wfc (padded)
                _const_spec((1, 128)),                          # bfc (padded)
            ],
            out_specs=pl.BlockSpec((tm_eff, 128), lambda i: (i, 0)),
        ),
        compiler_params=pltpu.CompilerParams(
            dimension_semantics=("parallel",),
            vmem_limit_bytes=48 * 1024 * 1024,
        ),
    )(x2d, w1b, wc1b, bc1, wc2b, bc2, wfcp, bfcp)

    return out[:B, :3]


def init_params(key):
    """Deterministic synthetic parameters with the shapes implied by __init__."""
    ks = jax.random.split(key, 7)
    # nn.Linear(20, 1024, bias=False).weight : (1024, 20) -> stored transposed.
    w1 = jax.random.normal(ks[0], (20, 1024), jnp.float32) * 0.05
    # nn.Conv1d(1024, 1024, 3, padding=1): weight (1024, 1024, 3); only the
    # middle tap is mathematically used at L=1 -> stored transposed.
    wc1 = jax.random.normal(ks[1], (1024, 1024), jnp.float32) * 0.02
    bc1 = jax.random.normal(ks[2], (1, 1024), jnp.float32) * 0.02
    # nn.Conv1d(1024, 128, 3, padding=1): weight (128, 1024, 3) -> middle tap.
    wc2 = jax.random.normal(ks[3], (1024, 128), jnp.float32) * 0.02
    bc2 = jax.random.normal(ks[4], (1, 128), jnp.float32) * 0.02
    # nn.Linear(128, 3).weight : (3, 128) -> stored transposed; bias (3,).
    wfc = jax.random.normal(ks[5], (128, 3), jnp.float32) * 0.05
    bfc = jax.random.normal(ks[6], (1, 3), jnp.float32) * 0.05
    return (w1, wc1, bc1, wc2, bc2, wfc, bfc)


def reference_forward(x, params):
    """Pure-JAX f32 reference mirroring the PyTorch graph."""
    w1, wc1, bc1, wc2, bc2, wfc, bfc = params
    B = x.shape[0]
    h = x.reshape(B, -1).astype(jnp.float32)
    h = jax.nn.relu(h @ w1)                       # fc1 + relu     (B, 1024)
    c1 = h @ wc1 + bc1                            # conv1 @ L=1    (B, 1024)
    h = jax.nn.relu(c1 + h)                       # residual + relu
    h = jax.nn.relu(h @ wc2 + bc2)                # conv2 + relu   (B, 128)
    return h @ wfc + bfc                          # fc             (B, 3)


if __name__ == "__main__":
    key = jax.random.PRNGKey(0)
    k_param, k_x = jax.random.split(key)

    params = init_params(k_param)
    # Module's forward flattens to (B, 20); use a (B, 4, 5) one-hot-like slab
    # to exercise the .view(B, -1).  B=10 also exercises batch padding.
    x = jax.random.normal(k_x, (10, 4, 5), jnp.float32)

    out = protein_cnn_forward(x, params)
    out = jax.block_until_ready(out)

    ref = reference_forward(x, params)
    assert out.shape == (10, 3)
    # bf16 matmul operands (f32 accumulation) => loosened tolerance vs f32 ref.
    assert jnp.allclose(out, ref, atol=2e-2, rtol=2e-2), (
        float(jnp.max(jnp.abs(out - ref))))

    print("KERNEL_OK")
</pallas_src>

<mosaic_0001>
module attributes {stable_mosaic.version = 11 : i64} {
  func.func @kernel(%arg0: i32, %arg1: memref<16x20xbf16, #tpu.memory_space<vmem>>, %arg2: memref<20x1024xbf16, #tpu.memory_space<vmem>>, %arg3: memref<1024x1024xbf16, #tpu.memory_space<vmem>>, %arg4: memref<1x1024xf32, #tpu.memory_space<vmem>>, %arg5: memref<1024x128xbf16, #tpu.memory_space<vmem>>, %arg6: memref<1x128xf32, #tpu.memory_space<vmem>>, %arg7: memref<128x128xbf16, #tpu.memory_space<vmem>>, %arg8: memref<1x128xf32, #tpu.memory_space<vmem>>, %arg9: memref<16x128xf32, #tpu.memory_space<vmem>>) attributes {dimension_semantics = [#tpu.dimension_semantics<parallel>], iteration_bounds = array<i64: 1>, scalar_prefetch = 0 : i64, scratch_operands = 0 : i64, tpu.core_type = #tpu.core_type<tc>, window_params = [{transform_indices = @transform_0, window_bounds = array<i64: 16, 20>}, {pipeline_mode = #tpu.pipeline_mode<synchronous>, transform_indices = @transform_1, window_bounds = array<i64: 20, 1024>}, {pipeline_mode = #tpu.pipeline_mode<synchronous>, transform_indices = @transform_2, window_bounds = array<i64: 1024, 1024>}, {pipeline_mode = #tpu.pipeline_mode<synchronous>, transform_indices = @transform_3, window_bounds = array<i64: 1, 1024>}, {pipeline_mode = #tpu.pipeline_mode<synchronous>, transform_indices = @transform_4, window_bounds = array<i64: 1024, 128>}, {pipeline_mode = #tpu.pipeline_mode<synchronous>, transform_indices = @transform_5, window_bounds = array<i64: 1, 128>}, {pipeline_mode = #tpu.pipeline_mode<synchronous>, transform_indices = @transform_6, window_bounds = array<i64: 128, 128>}, {pipeline_mode = #tpu.pipeline_mode<synchronous>, transform_indices = @transform_7, window_bounds = array<i64: 1, 128>}, {transform_indices = @transform_8, window_bounds = array<i64: 16, 128>}]} {
    %c0 = arith.constant 0 : index
    %c0_0 = arith.constant 0 : index
    %0 = vector.load %arg1[%c0, %c0_0] : memref<16x20xbf16, #tpu.memory_space<vmem>>, vector<16x20xbf16>
    %c0_1 = arith.constant 0 : index
    %c0_2 = arith.constant 0 : index
    %1 = vector.load %arg2[%c0_1, %c0_2] : memref<20x1024xbf16, #tpu.memory_space<vmem>>, vector<20x1024xbf16>
    %cst = arith.constant dense<0.000000e+00> : vector<16x1024xf32>
    %2 = tpu.matmul %0, %1, %cst {dimension_numbers = #tpu.dot_dimension_numbers<[1], [0], [0], [1], [0, 0, 1, 1], [], []>} : vector<16x20xbf16>, vector<20x1024xbf16>, vector<16x1024xf32> -> vector<16x1024xf32>
    %cst_3 = arith.constant 0.000000e+00 : f32
    %3 = vector.broadcast %cst_3 : f32 to vector<16x1024xf32>
    %4 = arith.maximumf %2, %3 : vector<16x1024xf32>
    %5 = arith.truncf %4 : vector<16x1024xf32> to vector<16x1024xbf16>
    %c0_4 = arith.constant 0 : index
    %c0_5 = arith.constant 0 : index
    %6 = vector.load %arg3[%c0_4, %c0_5] : memref<1024x1024xbf16, #tpu.memory_space<vmem>>, vector<1024x1024xbf16>
    %cst_6 = arith.constant dense<0.000000e+00> : vector<16x1024xf32>
    %7 = tpu.matmul %5, %6, %cst_6 {dimension_numbers = #tpu.dot_dimension_numbers<[1], [0], [0], [1], [0, 0, 1, 1], [], []>} : vector<16x1024xbf16>, vector<1024x1024xbf16>, vector<16x1024xf32> -> vector<16x1024xf32>
    %c0_7 = arith.constant 0 : index
    %c0_8 = arith.constant 0 : index
    %8 = vector.load %arg4[%c0_7, %c0_8] : memref<1x1024xf32, #tpu.memory_space<vmem>>, vector<1x1024xf32>
    %9 = vector.broadcast %8 : vector<1x1024xf32> to vector<16x1024xf32>
    %10 = arith.addf %7, %9 : vector<16x1024xf32>
    %11 = arith.addf %10, %4 : vector<16x1024xf32>
    %cst_9 = arith.constant 0.000000e+00 : f32
    %12 = vector.broadcast %cst_9 : f32 to vector<16x1024xf32>
    %13 = arith.maximumf %11, %12 : vector<16x1024xf32>
    %14 = arith.truncf %13 : vector<16x1024xf32> to vector<16x1024xbf16>
    %c0_10 = arith.constant 0 : index
    %c0_11 = arith.constant 0 : index
    %15 = vector.load %arg5[%c0_10, %c0_11] : memref<1024x128xbf16, #tpu.memory_space<vmem>>, vector<1024x128xbf16>
    %cst_12 = arith.constant dense<0.000000e+00> : vector<16x128xf32>
    %16 = tpu.matmul %14, %15, %cst_12 {dimension_numbers = #tpu.dot_dimension_numbers<[1], [0], [0], [1], [0, 0, 1, 1], [], []>} : vector<16x1024xbf16>, vector<1024x128xbf16>, vector<16x128xf32> -> vector<16x128xf32>
    %c0_13 = arith.constant 0 : index
    %c0_14 = arith.constant 0 : index
    %17 = vector.load %arg6[%c0_13, %c0_14] : memref<1x128xf32, #tpu.memory_space<vmem>>, vector<1x128xf32>
    %18 = vector.broadcast %17 : vector<1x128xf32> to vector<16x128xf32>
    %19 = arith.addf %16, %18 : vector<16x128xf32>
    %cst_15 = arith.constant 0.000000e+00 : f32
    %20 = vector.broadcast %cst_15 : f32 to vector<16x128xf32>
    %21 = arith.maximumf %19, %20 : vector<16x128xf32>
    %22 = arith.truncf %21 : vector<16x128xf32> to vector<16x128xbf16>
    %c0_16 = arith.constant 0 : index
    %c0_17 = arith.constant 0 : index
    %23 = vector.load %arg7[%c0_16, %c0_17] : memref<128x128xbf16, #tpu.memory_space<vmem>>, vector<128x128xbf16>
    %cst_18 = arith.constant dense<0.000000e+00> : vector<16x128xf32>
    %24 = tpu.matmul %22, %23, %cst_18 {dimension_numbers = #tpu.dot_dimension_numbers<[1], [0], [0], [1], [0, 0, 1, 1], [], []>} : vector<16x128xbf16>, vector<128x128xbf16>, vector<16x128xf32> -> vector<16x128xf32>
    %c0_19 = arith.constant 0 : index
    %c0_20 = arith.constant 0 : index
    %25 = vector.load %arg8[%c0_19, %c0_20] : memref<1x128xf32, #tpu.memory_space<vmem>>, vector<1x128xf32>
    %26 = vector.broadcast %25 : vector<1x128xf32> to vector<16x128xf32>
    %27 = arith.addf %24, %26 : vector<16x128xf32>
    %c0_21 = arith.constant 0 : index
    %c0_22 = arith.constant 0 : index
    %28 = vector.load %arg9[%c0_21, %c0_22] : memref<16x128xf32, #tpu.memory_space<vmem>>, vector<16x128xf32>
    tpu.vector_store %arg9[%c0_21, %c0_22], %27 {strides = array<i32>} : memref<16x128xf32, #tpu.memory_space<vmem>>, vector<16x128xf32>,
    return
  }
  func.func @transform_0(%arg0: i32) -> (i32, i32) {
    %c0_i32 = arith.constant 0 : i32
    %c0_i32_0 = arith.constant 0 : i32
    return %arg0, %c0_i32 : i32, i32
  }
  func.func @transform_1(%arg0: i32) -> (i32, i32) {
    %c0_i32 = arith.constant 0 : i32
    %c0_i32_0 = arith.constant 0 : i32
    %c0_i32_1 = arith.constant 0 : i32
    return %c0_i32, %c0_i32_0 : i32, i32
  }
  func.func @transform_2(%arg0: i32) -> (i32, i32) {
    %c0_i32 = arith.constant 0 : i32
    %c0_i32_0 = arith.constant 0 : i32
    %c0_i32_1 = arith.constant 0 : i32
    return %c0_i32, %c0_i32_0 : i32, i32
  }
  func.func @transform_3(%arg0: i32) -> (i32, i32) {
    %c0_i32 = arith.constant 0 : i32
    %c0_i32_0 = arith.constant 0 : i32
    %c0_i32_1 = arith.constant 0 : i32
    return %c0_i32, %c0_i32_0 : i32, i32
  }
  func.func @transform_4(%arg0: i32) -> (i32, i32) {
    %c0_i32 = arith.constant 0 : i32
    %c0_i32_0 = arith.constant 0 : i32
    %c0_i32_1 = arith.constant 0 : i32
    return %c0_i32, %c0_i32_0 : i32, i32
  }
  func.func @transform_5(%arg0: i32) -> (i32, i32) {
    %c0_i32 = arith.constant 0 : i32
    %c0_i32_0 = arith.constant 0 : i32
    %c0_i32_1 = arith.constant 0 : i32
    return %c0_i32, %c0_i32_0 : i32, i32
  }
  func.func @transform_6(%arg0: i32) -> (i32, i32) {
    %c0_i32 = arith.constant 0 : i32
    %c0_i32_0 = arith.constant 0 : i32
    %c0_i32_1 = arith.constant 0 : i32
    return %c0_i32, %c0_i32_0 : i32, i32
  }
  func.func @transform_7(%arg0: i32) -> (i32, i32) {
    %c0_i32 = arith.constant 0 : i32
    %c0_i32_0 = arith.constant 0 : i32
    %c0_i32_1 = arith.constant 0 : i32
    return %c0_i32, %c0_i32_0 : i32, i32
  }
  func.func @transform_8(%arg0: i32) -> (i32, i32) {
    %c0_i32 = arith.constant 0 : i32
    %c0_i32_0 = arith.constant 0 : i32
    return %arg0, %c0_i32 : i32, i32
  }
}

</mosaic_0001>

<bundles_post_ra>
// kernel: tpu_custom_call.1
= control target key start
LH: loop header
LB: loop body
LE: loop exit
PB: predicated region body
PF: predicated region fallthrough
CT: control target
= control target key end

     0   :  { %13 = vsyncpa [#allocation3], 0  ;;  %s6634_s0 = inlined_call_operand.hbm [shape: bf16[16,20], index: 0, kind: input, shape index: {}]   ;;  %s6635_s1 = inlined_call_operand.hbm [shape: bf16[20,1024], index: 1, kind: input, shape index: {}]   ;;  %s6636_s2 = inlined_call_operand.hbm [shape: bf16[1024,1024], index: 2, kind: input, shape index: {}]   ;;  %s6637_s3 = inlined_call_operand.hbm [shape: f32[1,1024], index: 3, kind: input, shape index: {}]   ;;  %s6638_s4 = inlined_call_operand.hbm [shape: bf16[1024,128], index: 4, kind: input, shape index: {}]   ;;  %s6639_s5 = inlined_call_operand.hbm [shape: f32[1,128], index: 5, kind: input, shape index: {}]   ;;  %s6640_s6 = inlined_call_operand.hbm [shape: bf16[128,128], index: 6, kind: input, shape index: {}]   ;;  %s6641_s7 = inlined_call_operand.hbm [shape: f32[1,128], index: 7, kind: input, shape index: {}]   ;;  %s6642_s8 = inlined_call_operand.hbm [shape: f32[16,128], index: 8, kind: output, shape index: {}]  }
   0x1   :  { %14 = vsyncpa [#allocation6], 0 }
   0x2   :  { %15 = vsyncpa [#allocation9], 0 }
   0x3   :  { %16 = vsyncpa [#allocation12], 0 }
   0x4   :  { %17 = vsyncpa [#allocation15], 0 }
   0x5   :  { %18 = vsyncpa [#allocation4], 0  ;;  %s6202_s27 = smov [#allocation5]   ;;  %s5992_s9 = scalar_lea.hbm %s6635_s1, 1536 }
   0x6   :  { %s36_s28 = sshll.u32 %s6202_s27, 4  ;;  %p5993_p0 = scmp.ne.s32.totalorder %s6635_s1, %s5992_s9  ;;  %s37_s28 = int_to_ptr.vmem [resolvable:$true] %s36_s28 }
   0x7   :  { %p5996_p1 = scmp.lt.u32.totalorder %s5992_s9, %s6635_s1 }
   0x9   :  { %p5998_p2 = pnand %p5996_p1, %p5993_p0 }
   0xb   :  { %6001 = shalt.err (!%p5998_p2)
}
   0xc   :  { %s6002_s14 = scalar_lea.vmem %s37_s28, 1536  ;;  %p6007_p4 = scmp.lt.s32.totalorder %s37_s28, %s37_s28 }
   0xd   :  { %p6003_p3 = scmp.ne.s32.totalorder %s37_s28, %s6002_s14  ;;  %p6008_p5 = scmp.lt.s32.totalorder %s6002_s14, %s6002_s14 }
   0xf   :  { %p6009_p6 = por %p6008_p5, %p6007_p4 }
  0x11   :  { %p6010_p7 = pnand %p6009_p6, %p6003_p3 }
  0x13   :  { %6013 = shalt.err (!%p6010_p7)
}
  0x14   :  { %s6203_s15 = smov 512   ;;  %s6204_s16 = smov 32  }
  0x15   :  { %42 = dma.hbm_to_vmem [thread:$0]  %s6635_s1, 1536, %s37_s28, [#allocation6], %s6203_s15, %s6203_s15, %s6204_s16  }
  0x16   :  { %s6205_s19 = smov [#allocation8]   ;;  %s6206_s21 = smov [#allocation11]  }
  0x17   :  { %s61_s20 = sshll.u32 %s6205_s19, 4  ;;  %s83_s22 = sshll.u32 %s6206_s21, 4  ;;  %s62_s20 = int_to_ptr.vmem [resolvable:$true] %s61_s20  ;;  %s84_s22 = int_to_ptr.vmem [resolvable:$true] %s83_s22 }
  0x18   :  { %s6014_s25 = scalar_lea.hbm %s6637_s3, 128 }
  0x19   :  { %p6015_p8 = scmp.ne.s32.totalorder %s6637_s3, %s6014_s25  ;;  %p6018_p9 = scmp.lt.u32.totalorder %s6014_s25, %s6637_s3 }
  0x1b   :  { %p6020_p10 = pnand %p6018_p9, %p6015_p8 }
  0x1d   :  { %6023 = shalt.err (!%p6020_p10)
}
  0x1e   :  { %s6024_s1 = scalar_lea.vmem %s62_s20, 128  ;;  %p6029_p12 = scmp.lt.s32.totalorder %s62_s20, %s62_s20 }
  0x1f   :  { %p6025_p11 = scmp.ne.s32.totalorder %s62_s20, %s6024_s1  ;;  %p6030_p13 = scmp.lt.s32.totalorder %s6024_s1, %s6024_s1 }
  0x21   :  { %p6031_p0 = por %p6030_p13, %p6029_p12 }
  0x23   :  { %p6032_p1 = pnand %p6031_p0, %p6025_p11 }
  0x25   :  { %6035 = shalt.err (!%p6032_p1)
}
  0x26   :  { %64 = dma.hbm_to_vmem [thread:$0]  %s6637_s3, 128, %s62_s20, [#allocation9]  }
  0x27   :  { %s6036_s12 = scalar_lea.hbm %s6639_s5, 16 }
  0x28   :  { %p6037_p2 = scmp.ne.s32.totalorder %s6639_s5, %s6036_s12  ;;  %p6040_p3 = scmp.lt.u32.totalorder %s6036_s12, %s6639_s5 }
  0x2a   :  { %p6042_p4 = pnand %p6040_p3, %p6037_p2 }
  0x2c   :  { %6045 = shalt.err (!%p6042_p4)
}
  0x2d   :  { %s6046_s19 = scalar_lea.vmem %s84_s22, 16  ;;  %s6050_s21 = scalar_lea.vmem %s84_s22, 32 }
  0x2e   :  { %p6047_p5 = scmp.ne.s32.totalorder %s84_s22, %s6046_s19  ;;  %p6051_p6 = scmp.lt.s32.totalorder %s84_s22, %s84_s22 }
  0x2f   :  { %p6052_p7 = scmp.lt.s32.totalorder %s6050_s21, %s6046_s19 }
  0x31   :  { %p6053_p8 = por %p6052_p7, %p6051_p6 }
  0x33   :  { %p6054_p9 = pnand %p6053_p8, %p6047_p5 }
  0x35   :  { %6057 = shalt.err (!%p6054_p9)
}
  0x36   :  { %86 = dma.hbm_to_vmem [thread:$0]  %s6639_s5, 16, %s84_s22, [#allocation12]  }
  0x37   :  { %s6207_s23 = smov [#allocation2]   ;;  %s6058_s27 = scalar_lea.hbm %s6634_s0, 128 }
  0x38   :  { %s24_s24 = sshll.u32 %s6207_s23, 4  ;;  %p6059_p10 = scmp.ne.s32.totalorder %s6634_s0, %s6058_s27  ;;  %s25_s24 = int_to_ptr.vmem [resolvable:$true] %s24_s24 }
  0x39   :  { %p6062_p11 = scmp.lt.u32.totalorder %s6058_s27, %s6634_s0 }
  0x3b   :  { %p6064_p12 = pnand %p6062_p11, %p6059_p10 }
  0x3d   :  { %6067 = shalt.err (!%p6064_p12)
}
  0x3e   :  { %s6068_s9 = scalar_lea.vmem %s25_s24, 128  ;;  %p6073_p0 = scmp.lt.s32.totalorder %s25_s24, %s25_s24 }
  0x3f   :  { %p6069_p13 = scmp.ne.s32.totalorder %s25_s24, %s6068_s9  ;;  %p6074_p1 = scmp.lt.s32.totalorder %s6068_s9, %s6068_s9 }
  0x41   :  { %p6075_p2 = por %p6074_p1, %p6073_p0 }
  0x43   :  { %p6076_p3 = pnand %p6075_p2, %p6069_p13 }
  0x45   :  { %6079 = shalt.err (!%p6076_p3)
}
  0x46   :  { %s6208_s5 = smov 64   ;;  %s6209_s22 = smov 4  }
  0x47   :  { %30 = dma.hbm_to_vmem [thread:$0]  %s6634_s0, 128, %s25_s24, [#allocation3], %s6208_s5, %s6208_s5, %s6209_s22  }
  0x48   :  { %s6210_s12 = smov [#allocation7]   ;;  %s6211_s14 = smov [#allocation10]  }
  0x49   :  { %s48_s13 = sshll.u32 %s6210_s12, 4  ;;  %s70_s17 = sshll.u32 %s6211_s14, 4  ;;  %s49_s13 = int_to_ptr.vmem [resolvable:$true] %s48_s13  ;;  %s6319_s17 = int_to_ptr.vmem [resolvable:$true] %s70_s17 }
  0x4a   :  { %s6080_s21 = scalar_lea.hbm %s6636_s2, 65536 }
  0x4b   :  { %p6081_p4 = scmp.ne.s32.totalorder %s6636_s2, %s6080_s21  ;;  %p6084_p5 = scmp.lt.u32.totalorder %s6080_s21, %s6636_s2 }
  0x4d   :  { %p6086_p6 = pnand %p6084_p5, %p6081_p4 }
  0x4f   :  { %6089 = shalt.err (!%p6086_p6)
}
  0x50   :  { %s6090_s0 = scalar_lea.vmem %s49_s13, 65536  ;;  %p6095_p8 = scmp.lt.s32.totalorder %s49_s13, %s49_s13 }
  0x51   :  { %p6091_p7 = scmp.ne.s32.totalorder %s49_s13, %s6090_s0  ;;  %p6096_p9 = scmp.lt.s32.totalorder %s6090_s0, %s6090_s0 }
  0x53   :  { %p6097_p10 = por %p6096_p9, %p6095_p8 }
  0x55   :  { %p6098_p11 = pnand %p6097_p10, %p6091_p7 }
  0x57   :  { %6101 = shalt.err (!%p6098_p11)
}
  0x58   :  { %54 = dma.hbm_to_vmem [thread:$0]  %s6636_s2, 65536, %s49_s13, [#allocation6], %s6203_s15, %s6203_s15, %s6204_s16  }
  0x59   :  { %s6102_s30 = scalar_lea.hbm %s6638_s4, 8192 }
  0x5a   :  { %p6103_p12 = scmp.ne.s32.totalorder %s6638_s4, %s6102_s30  ;;  %p6106_p13 = scmp.lt.u32.totalorder %s6102_s30, %s6638_s4 }
  0x5c   :  { %p6108_p0 = pnand %p6106_p13, %p6103_p12 }
  0x5e   :  { %6111 = shalt.err (!%p6108_p0)
}
  0x5f   :  { %s6112_s11 = scalar_lea.vmem %s6319_s17, 8192  ;;  %p6117_p2 = scmp.lt.s32.totalorder %s6319_s17, %s6319_s17 }
  0x60   :  { %p6113_p1 = scmp.ne.s32.totalorder %s6319_s17, %s6112_s11  ;;  %p6118_p3 = scmp.lt.s32.totalorder %s6112_s11, %s6112_s11 }
  0x62   :  { %p6119_p4 = por %p6118_p3, %p6117_p2 }
  0x64   :  { %p6120_p5 = pnand %p6119_p4, %p6113_p1 }
  0x66   :  { %6123 = shalt.err (!%p6120_p5)
}
  0x67   :  { %76 = dma.hbm_to_vmem [thread:$0]  %s6638_s4, 8192, %s6319_s17, [#allocation9], %s6208_s5, %s6208_s5, %s6209_s22  }
  0x68   :  { %s6212_s16 = smov [#allocation13]   ;;  %s6213_s13 = smov [#allocation14]  }
  0x69   :  { %s92_s12 = sshll.u32 %s6212_s16, 4  ;;  %s105_s14 = sshll.u32 %s6213_s13, 4  ;;  %s93_s12 = int_to_ptr.vmem [resolvable:$true] %s92_s12  ;;  %s106_s14 = int_to_ptr.vmem [resolvable:$true] %s105_s14 }
  0x6a   :  { %s6124_s21 = scalar_lea.hbm %s6640_s6, 1024 }
  0x6b   :  { %p6125_p6 = scmp.ne.s32.totalorder %s6640_s6, %s6124_s21  ;;  %p6128_p7 = scmp.lt.u32.totalorder %s6124_s21, %s6640_s6 }
  0x6d   :  { %p6130_p8 = pnand %p6128_p7, %p6125_p6 }
  0x6f   :  { %6133 = shalt.err (!%p6130_p8)
}
  0x70   :  { %s6134_s4 = scalar_lea.vmem %s93_s12, 1024  ;;  %p6139_p10 = scmp.lt.s32.totalorder %s93_s12, %s93_s12 }
  0x71   :  { %p6135_p9 = scmp.ne.s32.totalorder %s93_s12, %s6134_s4  ;;  %p6140_p11 = scmp.lt.s32.totalorder %s6134_s4, %s6134_s4 }
  0x73   :  { %p6141_p12 = por %p6140_p11, %p6139_p10 }
  0x75   :  { %p6142_p13 = pnand %p6141_p12, %p6135_p9 }
  0x77   :  { %6145 = shalt.err (!%p6142_p13)
}
  0x78   :  { %98 = dma.hbm_to_vmem [thread:$0]  %s6640_s6, 1024, %s93_s12, [#allocation12], %s6208_s5, %s6208_s5, %s6209_s22  }
  0x79   :  { %s6146_s27 = scalar_lea.hbm %s6641_s7, 16 }
  0x7a   :  { %p6147_p0 = scmp.ne.s32.totalorder %s6641_s7, %s6146_s27  ;;  %p6150_p1 = scmp.lt.u32.totalorder %s6146_s27, %s6641_s7 }
  0x7c   :  { %p6152_p2 = pnand %p6150_p1, %p6147_p0 }
  0x7e   :  { %6155 = shalt.err (!%p6152_p2)
}
  0x7f   :  { %s6156_s9 = scalar_lea.vmem %s106_s14, 16  ;;  %s6160_s10 = scalar_lea.vmem %s106_s14, 32 }
  0x80   :  { %p6157_p3 = scmp.ne.s32.totalorder %s106_s14, %s6156_s9  ;;  %p6161_p4 = scmp.lt.s32.totalorder %s106_s14, %s106_s14 }
  0x81   :  { %p6162_p5 = scmp.lt.s32.totalorder %s6160_s10, %s6156_s9 }
  0x83   :  { %p6163_p6 = por %p6162_p5, %p6161_p4 }
  0x85   :  { %p6164_p7 = pnand %p6163_p6, %p6157_p3 }
  0x87   :  { %6167 = shalt.err (!%p6164_p7)
}
  0x88   :  { %108 = dma.hbm_to_vmem [thread:$0]  %s6641_s7, 16, %s106_s14, [#allocation15]  }
  0x89   :  { %6190 = dma.done.wait [#allocation3], 128  }
  0x8a   :  { %6191 = vsyncadd [#allocation3], 4294967168 }
  0x8b   :  { %6192 = dma.done.wait [#allocation6], 67072  }
  0x8c   :  { %6193 = vsyncadd [#allocation6], 4294900224 }
  0x8d   :  { %6194 = dma.done.wait [#allocation9], 8320  }
  0x8e   :  { %6195 = vsyncadd [#allocation9], 4294958976 }
  0x8f   :  { %6196 = dma.done.wait [#allocation12], 1040  }
  0x90   :  { %6197 = vsyncadd [#allocation12], 4294966256 }
  0x91   :  { %6198 = dma.done.wait [#allocation15], 16  }
  0x92   :  { %6199 = vsyncadd [#allocation15], 4294967280  ;;  %v6214_v0 = vmov 0   ;;  %v136_v1 = vld [vmem:[#allocation5] sm:$0xff]  ;;  %vm217_vm0 = vcmask 1041408   ;;  %v137_v8 = vld [vmem:[#allocation5 + $0x8] sm:$0xff] }
  0x93   :  { %274 = vmatprep.mubr.bf16.mxu1 %v6214_v0  ;;  %v140_v2 = vld [vmem:[#allocation5 + $0x20] sm:$0xff]  ;;  %v141_v9 = vld [vmem:[#allocation5 + $0x28] sm:$0xff]  ;;  %v6386_v19 = vld [vmem:[#allocation2] sm:$0xff]   ;;  %vm213_vm1 = vcmask 162816   ;;  %vm6216_vm2 = vmmov 0   ;;  %s6217_s7 = smov [#allocation16]  }
  0x94   :  { %v144_v3 = vld [vmem:[#allocation5 + $0x40] sm:$0x33]  ;;  %v5103_v4 = vcombine.high %v136_v1, %v140_v2  ;;  %v5102_v5 = vcombine.low %v136_v1, %v140_v2  ;;  %v5105_v11 = vcombine.high %v137_v8, %v141_v9  ;;  %v145_v14 = vld [vmem:[#allocation5 + $0x48] sm:$0x33]  ;;  %v5104_v22 = vcombine.low %v137_v8, %v141_v9  ;;  %v138_v27 = vld [vmem:[#allocation5 + $0x10] sm:$0xff]  ;;  %s5085_s22 = sshll.u32 %s6217_s7, 4  ;;  %s5086_s22 = int_to_ptr.vmem [resolvable:$true] %s5085_s22 }
  0x95   :  { %v5111_v6 = vcombine.high %v144_v3, %v144_v3  ;;  %v5110_v7 = vcombine.low %v144_v3, %v144_v3  ;;  %v438_v12 = vld [vmem:[#allocation7] sm:$0xff]  ;;  %v5113_v24 = vcombine.high %v145_v14, %v145_v14  ;;  %v5112_v25 = vcombine.low %v145_v14, %v145_v14  ;;  %v142_v28 = vld [vmem:[#allocation5 + $0x30] sm:$0xff]  ;;  %v147_v40 = vld [vmem:[#allocation5 + $0x58] sm:$0x33]  ;;  %s6168_s11 = scalar_lea.vmem %s5086_s22, 256  ;;  %p6173_p9 = scmp.lt.s32.totalorder %s5086_s22, %s5086_s22 }
  0x96   :  { %242 = vmatprep.subr.bf16.mxu1 %v5103_v4  ;;  %v442_v13 = vld [vmem:[#allocation7 + $0x20] sm:$0xff]  ;;  %v5107_v33 = vcombine.high %v138_v27, %v142_v28  ;;  %v146_v35 = vld [vmem:[#allocation5 + $0x50] sm:$0x33]  ;;  %v5106_v39 = vcombine.low %v138_v27, %v142_v28  ;;  %v139_v44 = vld [vmem:[#allocation5 + $0x18] sm:$0xff]  ;;  %v5116_v47 = vcombine.low %v147_v40, %v147_v40  ;;  %v5117_v60 = vcombine.high %v147_v40, %v147_v40  ;;  %p6169_p8 = scmp.ne.s32.totalorder %s5086_s22, %s6168_s11  ;;  %p6174_p10 = scmp.lt.s32.totalorder %s6168_s11, %s6168_s11 }
  0x97   :  { %243 = vmatpush1.bf16.msra.mxu1 %v5102_v5  ;;  %v219_v10 = vsel %vm217_vm0, %v5110_v7, 0  ;;  %v5127_v15 = vcombine.high %v438_v12, %v442_v13  ;;  %v5126_v16 = vcombine.low %v438_v12, %v442_v13  ;;  %v446_v17 = vld [vmem:[#allocation7 + $0x40] sm:$0xff]  ;;  %v225_v32 = vsel %vm217_vm0, %v5112_v25, 0  ;;  %v143_v45 = vld [vmem:[#allocation5 + $0x38] sm:$0xff]  ;;  %v439_v58 = vld [vmem:[#allocation7 + $0x8] sm:$0xff] }
  0x98   :  { %5118 = vmatprep.subr.msk.bf16.mxu1 %vm217_vm0, %v5111_v6  ;;  %v450_v18 = vld [vmem:[#allocation7 + $0x60] sm:$0xff]  ;;  %v5115_v41 = vcombine.high %v146_v35, %v146_v35  ;;  %v5114_v42 = vcombine.low %v146_v35, %v146_v35  ;;  %v5109_v51 = vcombine.high %v139_v44, %v143_v45  ;;  %v237_v54 = vsel %vm217_vm0, %v5116_v47, 0  ;;  %v443_v59 = vld [vmem:[#allocation7 + $0x28] sm:$0xff]  ;;  %p6175_p11 = por %p6174_p10, %p6173_p9 }
  0x99   :  { %v5135_v20 = vcombine.high %v446_v17, %v450_v18  ;;  %v454_v21 = vld [vmem:[#allocation7 + $0x80] sm:$0xff]  ;;  %3552 = vmatprep.subr.bf16.mxu0 %v5127_v15  ;;  %v5134_v26 = vcombine.low %v446_v17, %v450_v18  ;;  %v5108_v57 = vcombine.low %v139_v44, %v143_v45  ;;  %v447_v2 = vld [vmem:[#allocation7 + $0x48] sm:$0xff]  ;;  %v5129_v4 = vcombine.high %v439_v58, %v443_v59 }
  0x9a   :  { %v458_v23 = vld [vmem:[#allocation7 + $0xa0] sm:$0xff]  ;;  %3553 = vmatpush1.bf16.msra.mxu0 %v5126_v16  ;;  %v231_v50 = vsel %vm217_vm0, %v5114_v42, 0  ;;  %v451_v3 = vld [vmem:[#allocation7 + $0x68] sm:$0xff]  ;;  %v5128_v9 = vcombine.low %v439_v58, %v443_v59  ;;  %p6176_p12 = pnand %p6175_p11, %p6169_p8 }
  0x9b   :  { %245 = vmatpush1.bf16.msra.mxu1 %v219_v10  ;;  %3554 = vmatprep.subr.bf16.mxu0 %v5135_v20  ;;  %v5143_v29 = vcombine.high %v454_v21, %v458_v23  ;;  %v462_v30 = vld [vmem:[#allocation7 + $0xc0] sm:$0xff]  ;;  %v5142_v34 = vcombine.low %v454_v21, %v458_v23  ;;  %v455_v10 = vld [vmem:[#allocation7 + $0x88] sm:$0xff]  ;;  %v5137_v12 = vcombine.high %v447_v2, %v451_v3 }
  0x9c   :  { %285 = vmatprep.subr.bf16.mxu1 %v5105_v11  ;;  %v466_v31 = vld [vmem:[#allocation7 + $0xe0] sm:$0xff]  ;;  %v459_v11 = vld [vmem:[#allocation7 + $0xa8] sm:$0xff]  ;;  %v5136_v16 = vcombine.low %v447_v2, %v451_v3 }
  0x9d   :  { %v5151_v36 = vcombine.high %v462_v30, %v466_v31  ;;  %v470_v37 = vld [vmem:[#allocation7 + $0x100] sm:$0xff]  ;;  %v5150_v43 = vcombine.low %v462_v30, %v466_v31  ;;  %v463_v17 = vld [vmem:[#allocation7 + $0xc8] sm:$0xff]  ;;  %v5145_v20 = vcombine.high %v455_v10, %v459_v11  ;;  %v5144_v25 = vcombine.low %v455_v10, %v459_v11 }
  0x9e   :  { %5119 = vmatmul.mubr.msk.bf16.vlgmr.msra.gmra.mrb[0].mxu1 %vm213_vm1, %v6386_v19  ;;  %3555 = vmatpush1.bf16.msra.mxu0 %v5134_v26  ;;  %v474_v38 = vld [vmem:[#allocation7 + $0x120] sm:$0xff]  ;;  %v467_v18 = vld [vmem:[#allocation7 + $0xe8] sm:$0xff] }
  0x9f   :  { %286 = vmatpush1.bf16.msra.mxu1 %v5104_v22  ;;  %317 = vmatprep.mubr.bf16.mxu1 %v6214_v0  ;;  %v5159_v46 = vcombine.high %v470_v37, %v474_v38  ;;  %v478_v48 = vld [vmem:[#allocation7 + $0x140] sm:$0xff]  ;;  %v5158_v52 = vcombine.low %v470_v37, %v474_v38  ;;  %v471_v26 = vld [vmem:[#allocation7 + $0x108] sm:$0xff]  ;;  %v5153_v28 = vcombine.high %v463_v17, %v467_v18 }
  0xa0   :  { %5120 = vmatprep.subr.msk.bf16.mxu1 %vm217_vm0, %v5113_v24  ;;  %3556 = vmatprep.subr.bf16.mxu0 %v5143_v29  ;;  %v482_v49 = vld [vmem:[#allocation7 + $0x160] sm:$0xff]  ;;  %v475_v27 = vld [vmem:[#allocation7 + $0x128] sm:$0xff] }
  0xa1   :  { %v5167_v53 = vcombine.high %v478_v48, %v482_v49  ;;  %v486_v55 = vld [vmem:[#allocation7 + $0x180] sm:$0xff]  ;;  %v5166_v61 = vcombine.low %v478_v48, %v482_v49  ;;  %v5161_v35 = vcombine.high %v471_v26, %v475_v27  ;;  %v5160_v40 = vcombine.low %v471_v26, %v475_v27  ;;  %v491_v42 = vld [vmem:[#allocation7 + $0x1a8] sm:$0xff] }
  0xa2   :  { %3557 = vmatpush1.bf16.msra.mxu0 %v5142_v34  ;;  %v490_v56 = vld [vmem:[#allocation7 + $0x1a0] sm:$0xff]  ;;  %v483_v34 = vld [vmem:[#allocation7 + $0x168] sm:$0xff] }
  0xa3   :  { %288 = vmatpush1.bf16.msra.mxu1 %v225_v32  ;;  %3558 = vmatprep.subr.bf16.mxu0 %v5151_v36  ;;  %v494_v62 = vld [vmem:[#allocation7 + $0x1c0] sm:$0xff]  ;;  %v5175_v1 = vcombine.high %v486_v55, %v490_v56  ;;  %v5174_v5 = vcombine.low %v486_v55, %v490_v56  ;;  %v5152_v32 = vcombine.low %v463_v17, %v467_v18  ;;  %v495_v49 = vld [vmem:[#allocation7 + $0x1c8] sm:$0xff] }
  0xa4   :  { %328 = vmatprep.subr.bf16.mxu1 %v5107_v33  ;;  %v498_v63 = vld [vmem:[#allocation7 + $0x1e0] sm:$0xff]  ;;  %v479_v33 = vld [vmem:[#allocation7 + $0x148] sm:$0xff] }
  0xa5   :  { %v502_v6 = vld [vmem:[#allocation7 + $0x200] sm:$0xff]  ;;  %v5183_v8 = vcombine.high %v494_v62, %v498_v63  ;;  %v5182_v13 = vcombine.low %v494_v62, %v498_v63  ;;  %v5168_v48 = vcombine.low %v479_v33, %v483_v34  ;;  %v503_v55 = vld [vmem:[#allocation7 + $0x208] sm:$0xff] }
  0xa6   :  { %5121 = vmatmul.mubr.msk.bf16.vlgmr.msra.gmra.mrb[4].mxu1 %vm213_vm1, %v6386_v19  ;;  %3559 = vmatpush1.bf16.msra.mxu0 %v5150_v43  ;;  %v506_v7 = vld [vmem:[#allocation7 + $0x220] sm:$0xff]  ;;  %v5169_v43 = vcombine.high %v479_v33, %v483_v34  ;;  %v507_v56 = vld [vmem:[#allocation7 + $0x228] sm:$0xff] }
  0xa7   :  { %329 = vmatpush1.bf16.msra.mxu1 %v5106_v39  ;;  %360 = vmatprep.mubr.bf16.mxu1 %v6214_v0  ;;  %v514_v14 = vld [vmem:[#allocation7 + $0x260] sm:$0xff]  ;;  %v5191_v15 = vcombine.high %v502_v6, %v506_v7  ;;  %v5190_v21 = vcombine.low %v502_v6, %v506_v7  ;;  %v5193_v62 = vcombine.high %v503_v55, %v507_v56  ;;  %v523_v2 = vld [vmem:[#allocation7 + $0x2a8] sm:$0xff] }
  0xa8   :  { %5122 = vmatprep.subr.msk.bf16.mxu1 %vm217_vm0, %v5115_v41  ;;  %3560 = vmatprep.subr.bf16.mxu0 %v5159_v46  ;;  %v518_v22 = vld [vmem:[#allocation7 + $0x280] sm:$0xff]  ;;  %v487_v41 = vld [vmem:[#allocation7 + $0x188] sm:$0xff]  ;;  %v5192_v63 = vcombine.low %v503_v55, %v507_v56 }
  0xa9   :  { %v522_v23 = vld [vmem:[#allocation7 + $0x2a0] sm:$0xff]  ;;  %v531_v6 = vld [vmem:[#allocation7 + $0x2e8] sm:$0xff] }
  0xaa   :  { %3561 = vmatpush1.bf16.msra.mxu0 %v5158_v52  ;;  %v526_v29 = vld [vmem:[#allocation7 + $0x2c0] sm:$0xff]  ;;  %v5207_v31 = vcombine.high %v518_v22, %v522_v23  ;;  %v5206_v36 = vcombine.low %v518_v22, %v522_v23  ;;  %v535_v10 = vld [vmem:[#allocation7 + $0x308] sm:$0xff] }
  0xab   :  { %331 = vmatpush1.bf16.msra.mxu1 %v231_v50  ;;  %3562 = vmatprep.subr.bf16.mxu0 %v5167_v53  ;;  %v530_v30 = vld [vmem:[#allocation7 + $0x2e0] sm:$0xff]  ;;  %v499_v50 = vld [vmem:[#allocation7 + $0x1e8] sm:$0xff] }
  0xac   :  { %371 = vmatprep.subr.bf16.mxu1 %v5109_v51  ;;  %v534_v37 = vld [vmem:[#allocation7 + $0x300] sm:$0xff]  ;;  %v5215_v39 = vcombine.high %v526_v29, %v530_v30  ;;  %v5214_v44 = vcombine.low %v526_v29, %v530_v30  ;;  %v5177_v51 = vcombine.high %v487_v41, %v491_v42  ;;  %v5184_v59 = vcombine.low %v495_v49, %v499_v50  ;;  %v539_v11 = vld [vmem:[#allocation7 + $0x328] sm:$0xff] }
  0xad   :  { %v538_v38 = vld [vmem:[#allocation7 + $0x320] sm:$0xff]  ;;  %v555_v23 = vld [vmem:[#allocation7 + $0x3a8] sm:$0xff] }
  0xae   :  { %5123 = vmatmul.mubr.msk.bf16.vlgmr.msra.gmra.mrb[8].mxu1 %vm213_vm1, %v6386_v19  ;;  %3563 = vmatpush1.bf16.msra.mxu0 %v5166_v61  ;;  %v542_v45 = vld [vmem:[#allocation7 + $0x340] sm:$0xff]  ;;  %v5223_v47 = vcombine.high %v534_v37, %v538_v38  ;;  %v5222_v52 = vcombine.low %v534_v37, %v538_v38  ;;  %v515_v61 = vld [vmem:[#allocation7 + $0x268] sm:$0xff] }
  0xaf   :  { %372 = vmatpush1.bf16.msra.mxu1 %v5108_v57  ;;  %403 = vmatprep.mubr.bf16.mxu1 %v6214_v0  ;;  %v510_v0 = vld [vmem:[#allocation7 + $0x240] sm:$0xff]  ;;  %v5185_v57 = vcombine.high %v495_v49, %v499_v50  ;;  %v563_v30 = vld [vmem:[#allocation7 + $0x3e8] sm:$0xff] }
  0xb0   :  { %5124 = vmatprep.subr.msk.bf16.mxu1 %vm217_vm0, %v5117_v60  ;;  %3564 = vmatprep.subr.bf16.mxu0 %v5175_v1  ;;  %v5199_v24 = vcombine.high %v510_v0, %v514_v14  ;;  %v546_v46 = vld [vmem:[#allocation7 + $0x360] sm:$0xff]  ;;  %v511_v60 = vld [vmem:[#allocation7 + $0x248] sm:$0xff] }
  0xb1   :  { %v5231_v53 = vcombine.high %v542_v45, %v546_v46  ;;  %v5230_v58 = vcombine.low %v542_v45, %v546_v46  ;;  %v519_v1 = vld [vmem:[#allocation7 + $0x288] sm:$0xff]  ;;  %v5201_v3 = vcombine.high %v511_v60, %v515_v61  ;;  %v550_v18 = vld [vmem:[#allocation7 + $0x380] sm:$0xff] }
  0xb2   :  { %3565 = vmatpush1.bf16.msra.mxu0 %v5174_v5  ;;  %v527_v5 = vld [vmem:[#allocation7 + $0x2c8] sm:$0xff]  ;;  %v5209_v7 = vcombine.high %v519_v1, %v523_v2  ;;  %v558_v27 = vld [vmem:[#allocation7 + $0x3c0] sm:$0xff] }
  0xb3   :  { %374 = vmatpush1.bf16.msra.mxu1 %v237_v54  ;;  %3566 = vmatprep.subr.bf16.mxu0 %v5183_v8  ;;  %v5176_v54 = vcombine.low %v487_v41, %v491_v42  ;;  %v5208_v8 = vcombine.low %v519_v1, %v523_v2  ;;  %v566_v34 = vld [vmem:[#allocation7 + $0x400] sm:$0xff]  ;;  %v571_v38 = vld [vmem:[#allocation7 + $0x428] sm:$0xff] }
  0xb4   :  { %3724 = vmatprep.subr.bf16.mxu1 %v5129_v4  ;;  %v5200_v4 = vcombine.low %v511_v60, %v515_v61  ;;  %v578_v50 = vld [vmem:[#allocation7 + $0x460] sm:$0xff]  ;;  %v583_v60 = vld [vmem:[#allocation7 + $0x488] sm:$0xff] }
  0xb5   :  { %v587_v61 = vld [vmem:[#allocation7 + $0x4a8] sm:$0xff] }
  0xb6   :  { %5125 = vmatmul.mubr.msk.bf16.vlgmr.msra.gmra.mrb[12].mxu1 %vm213_vm1, %v6386_v19  ;;  %3567 = vmatpush1.bf16.msra.mxu0 %v5182_v13  ;;  %v5198_v19 = vcombine.low %v510_v0, %v514_v14  ;;  %v5225_v13 = vcombine.high %v535_v10, %v539_v11  ;;  %v543_v0 = vld [vmem:[#allocation7 + $0x348] sm:$0xff] }
  0xb7   :  { %3725 = vmatpush1.bf16.msra.mxu1 %v5128_v9  ;;  %3568 = vmatprep.subr.bf16.mxu0 %v5191_v15  ;;  %v5217_v9 = vcombine.high %v527_v5, %v531_v6  ;;  %v547_v14 = vld [vmem:[#allocation7 + $0x368] sm:$0xff]  ;;  %v5224_v15 = vcombine.low %v535_v10, %v539_v11 }
  0xb8   :  { %3726 = vmatprep.subr.bf16.mxu1 %v5137_v12  ;;  %v5216_v12 = vcombine.low %v527_v5, %v531_v6  ;;  %v5232_v17 = vcombine.low %v543_v0, %v547_v14  ;;  %v5273_v6 = vcombine.high %v583_v60, %v587_v61  ;;  %v591_v10 = vld [vmem:[#allocation7 + $0x4c8] sm:$0xff] }
  0xb9   :  { %v595_v11 = vld [vmem:[#allocation7 + $0x4e8] sm:$0xff] }
  0xba   :  { %3569 = vmatpush1.bf16.msra.mxu0 %v5190_v21  ;;  %v551_v21 = vld [vmem:[#allocation7 + $0x388] sm:$0xff] }
  0xbb   :  { %3727 = vmatpush1.bf16.msra.mxu1 %v5136_v16  ;;  %3570 = vmatprep.subr.bf16.mxu0 %v5199_v24  ;;  %v5233_v16 = vcombine.high %v543_v0, %v547_v14  ;;  %v5240_v24 = vcombine.low %v551_v21, %v555_v23  ;;  %v5272_v0 = vcombine.low %v583_v60, %v587_v61  ;;  %v627_v60 = vld [vmem:[#allocation7 + $0x5e8] sm:$0xff] }
  0xbc   :  { %3728 = vmatprep.subr.bf16.mxu1 %v5145_v20  ;;  %v554_v20 = vld [vmem:[#allocation7 + $0x3a0] sm:$0xff] }
  0xbd   :  { %v5239_v22 = vcombine.high %v550_v18, %v554_v20  ;;  %v5238_v26 = vcombine.low %v550_v18, %v554_v20  ;;  %v602_v18 = vld [vmem:[#allocation7 + $0x520] sm:$0xff]  ;;  %v599_v20 = vld [vmem:[#allocation7 + $0x508] sm:$0xff] }
  0xbe   :  { %3571 = vmatpush1.bf16.msra.mxu0 %v5198_v19  ;;  %v559_v19 = vld [vmem:[#allocation7 + $0x3c8] sm:$0xff] }
  0xbf   :  { %3729 = vmatpush1.bf16.msra.mxu1 %v5144_v25  ;;  %3572 = vmatprep.subr.bf16.mxu0 %v5207_v31  ;;  %v5241_v25 = vcombine.high %v551_v21, %v555_v23  ;;  %v5248_v31 = vcombine.low %v559_v19, %v563_v30  ;;  %v603_v21 = vld [vmem:[#allocation7 + $0x528] sm:$0xff] }
  0xc0   :  { %3730 = vmatprep.subr.bf16.mxu1 %v5153_v28  ;;  %v562_v28 = vld [vmem:[#allocation7 + $0x3e0] sm:$0xff] }
  0xc1   :  { %v5247_v29 = vcombine.high %v558_v27, %v562_v28  ;;  %v5246_v33 = vcombine.low %v558_v27, %v562_v28  ;;  %v5289_v28 = vcombine.high %v599_v20, %v603_v21 }
  0xc2   :  { %3573 = vmatpush1.bf16.msra.mxu0 %v5206_v36  ;;  %v567_v36 = vld [vmem:[#allocation7 + $0x408] sm:$0xff] }
  0xc3   :  { %3731 = vmatpush1.bf16.msra.mxu1 %v5152_v32  ;;  %3574 = vmatprep.subr.bf16.mxu0 %v5215_v39  ;;  %v5249_v32 = vcombine.high %v559_v19, %v563_v30  ;;  %v5257_v41 = vcombine.high %v567_v36, %v571_v38  ;;  %v606_v19 = vld [vmem:[#allocation7 + $0x540] sm:$0xff] }
  0xc4   :  { %3732 = vmatprep.subr.bf16.mxu1 %v5161_v35  ;;  %v570_v35 = vld [vmem:[#allocation7 + $0x420] sm:$0xff] }
  0xc5   :  { %v5255_v37 = vcombine.high %v566_v34, %v570_v35  ;;  %v5254_v39 = vcombine.low %v566_v34, %v570_v35  ;;  %v610_v30 = vld [vmem:[#allocation7 + $0x560] sm:$0xff]  ;;  %v5288_v34 = vcombine.low %v599_v20, %v603_v21  ;;  %v639_v21 = vld [vmem:[#allocation7 + $0x648] sm:$0xff] }
  0xc6   :  { %3575 = vmatpush1.bf16.msra.mxu0 %v5214_v44  ;;  %v5295_v35 = vcombine.high %v606_v19, %v610_v30  ;;  %v642_v20 = vld [vmem:[#allocation7 + $0x660] sm:$0xff] }
  0xc7   :  { %3733 = vmatpush1.bf16.msra.mxu1 %v5160_v40  ;;  %3576 = vmatprep.subr.bf16.mxu0 %v5223_v47  ;;  %v5256_v40 = vcombine.low %v567_v36, %v571_v38  ;;  %v574_v47 = vld [vmem:[#allocation7 + $0x440] sm:$0xff] }
  0xc8   :  { %3734 = vmatprep.subr.bf16.mxu1 %v5169_v43  ;;  %v5263_v56 = vcombine.high %v574_v47, %v578_v50  ;;  %v5262_v1 = vcombine.low %v574_v47, %v578_v50  ;;  %v618_v38 = vld [vmem:[#allocation7 + $0x5a0] sm:$0xff] }
  0xca   :  { %3577 = vmatpush1.bf16.msra.mxu0 %v5222_v52  ;;  %v579_v52 = vld [vmem:[#allocation7 + $0x468] sm:$0xff] }
  0xcb   :  { %3735 = vmatpush1.bf16.msra.mxu1 %v5168_v48  ;;  %3578 = vmatprep.subr.bf16.mxu0 %v5231_v53 }
  0xcc   :  { %3736 = vmatprep.subr.bf16.mxu1 %v5177_v51  ;;  %v575_v51 = vld [vmem:[#allocation7 + $0x448] sm:$0xff] }
  0xcd   :  { %v5264_v2 = vcombine.low %v575_v51, %v579_v52 }
  0xce   :  { %3579 = vmatpush1.bf16.msra.mxu0 %v5230_v58  ;;  %v582_v58 = vld [vmem:[#allocation7 + $0x480] sm:$0xff] }
  0xcf   :  { %3737 = vmatpush1.bf16.msra.mxu1 %v5176_v54  ;;  %3580 = vmatprep.subr.bf16.mxu0 %v5239_v22 }
  0xd0   :  { %3738 = vmatprep.subr.bf16.mxu1 %v5185_v57  ;;  %v5265_v57 = vcombine.high %v575_v51, %v579_v52 }
  0xd2   :  { %3581 = vmatpush1.bf16.msra.mxu0 %v5238_v26 }
  0xd3   :  { %3739 = vmatpush1.bf16.msra.mxu1 %v5184_v59  ;;  %3582 = vmatprep.subr.bf16.mxu0 %v5247_v29  ;;  %v586_v59 = vld [vmem:[#allocation7 + $0x4a0] sm:$0xff] }
  0xd4   :  { %3740 = vmatprep.subr.bf16.mxu1 %v5193_v62  ;;  %v5271_v5 = vcombine.high %v582_v58, %v586_v59 }
  0xd6   :  { %3583 = vmatpush1.bf16.msra.mxu0 %v5246_v33 }
  0xd7   :  { %3741 = vmatpush1.bf16.msra.mxu1 %v5192_v63  ;;  %3595 = vmatprep.subr.bf16.mxu0 %v5255_v37  ;;  %v614_v37 = vld [vmem:[#allocation7 + $0x580] sm:$0xff] }
  0xd8   :  { %3742 = vmatprep.subr.bf16.mxu1 %v5201_v3  ;;  %v5303_v51 = vcombine.high %v614_v37, %v618_v38 }
  0xdb   :  { %3743 = vmatpush1.bf16.msra.mxu1 %v5200_v4 }
  0xdc   :  { %3744 = vmatprep.subr.bf16.mxu1 %v5209_v7  ;;  %v590_v7 = vld [vmem:[#allocation7 + $0x4c0] sm:$0xff] }
  0xdf   :  { %3745 = vmatpush1.bf16.msra.mxu1 %v5208_v8 }
  0xe0   :  { %3746 = vmatprep.subr.bf16.mxu1 %v5217_v9  ;;  %v594_v9 = vld [vmem:[#allocation7 + $0x4e0] sm:$0xff] }
  0xe3   :  { %3747 = vmatpush1.bf16.msra.mxu1 %v5216_v12 }
  0xe4   :  { %3748 = vmatprep.subr.bf16.mxu1 %v5225_v13  ;;  %v5270_v13 = vcombine.low %v582_v58, %v586_v59  ;;  %v626_v58 = vld [vmem:[#allocation7 + $0x5e0] sm:$0xff]  ;;  %v623_v59 = vld [vmem:[#allocation7 + $0x5c8] sm:$0xff] }
  0xe7   :  { %3749 = vmatpush1.bf16.msra.mxu1 %v5224_v15  ;;  %v5279_v15 = vcombine.high %v590_v7, %v594_v9 }
  0xe8   :  { %3750 = vmatprep.subr.bf16.mxu1 %v5233_v16  ;;  %v5281_v16 = vcombine.high %v591_v10, %v595_v11 }
  0xeb   :  { %3751 = vmatpush1.bf16.msra.mxu1 %v5232_v17  ;;  %v598_v17 = vld [vmem:[#allocation7 + $0x500] sm:$0xff] }
  0xec   :  { %3752 = vmatprep.subr.bf16.mxu1 %v5241_v25  ;;  %v5280_v25 = vcombine.low %v591_v10, %v595_v11  ;;  %v5287_v27 = vcombine.high %v598_v17, %v602_v18  ;;  %v5286_v33 = vcombine.low %v598_v17, %v602_v18  ;;  %v634_v10 = vld [vmem:[#allocation7 + $0x620] sm:$0xff]  ;;  %v631_v11 = vld [vmem:[#allocation7 + $0x608] sm:$0xff] }
  0xed   :  { %v638_v18 = vld [vmem:[#allocation7 + $0x640] sm:$0xff] }
  0xef   :  { %3753 = vmatpush1.bf16.msra.mxu1 %v5240_v24  ;;  %v5278_v24 = vcombine.low %v590_v7, %v594_v9  ;;  %v5313_v7 = vcombine.high %v623_v59, %v627_v60  ;;  %v630_v9 = vld [vmem:[#allocation7 + $0x600] sm:$0xff] }
  0xf0   :  { %3754 = vmatprep.subr.bf16.mxu1 %v5249_v32  ;;  %v611_v32 = vld [vmem:[#allocation7 + $0x568] sm:$0xff] }
  0xf3   :  { %3755 = vmatpush1.bf16.msra.mxu1 %v5248_v31  ;;  %v607_v31 = vld [vmem:[#allocation7 + $0x548] sm:$0xff] }
  0xf4   :  { %3767 = vmatprep.subr.bf16.mxu1 %v5257_v41  ;;  %v5297_v36 = vcombine.high %v607_v31, %v611_v32  ;;  %v5294_v41 = vcombine.low %v606_v19, %v610_v30  ;;  %v5296_v47 = vcombine.low %v607_v31, %v611_v32  ;;  %v646_v30 = vld [vmem:[#allocation7 + $0x680] sm:$0xff]  ;;  %v647_v32 = vld [vmem:[#allocation7 + $0x688] sm:$0xff] }
  0xf5   :  { %v650_v31 = vld [vmem:[#allocation7 + $0x6a0] sm:$0xff] }
 0x171   :  { %v6405_v42 = vpop.f32.mrb[0].mxu1 }
 0x172   :  { %v6407_v43 = vpop.f32.mrb[1].mxu1  ;;  %v414_v53 = vmax.f32 %v6405_v42, 0.0 }
 0x173   :  { %v6409_v44 = vpop.f32.mrb[2].mxu1  ;;  %v415_v48 = vmax.f32 %v6407_v43, 0.0 }
 0x174   :  { %v422_v45 = vmax.f32 %v6409_v44, 0.0  ;;  %v6412_v46 = vpop.f32.mrb[3].mxu1 }
 0x175   :  { %v423_v49 = vmax.f32 %v6412_v46, 0.0  ;;  %v900_v46 = vld [vmem:[#allocation7 + $0xe70] sm:$0xff] }
 0x176   :  { %v6427_v55 = vpack.c.bf16 %v422_v45, %v414_v53 }
 0x177   :  { %v6421_v54 = vpack.c.bf16 %v423_v49, %v415_v48 }
 0x179   :  { %3584 = vmatprep.mubr.bf16.mxu0 %v6421_v54  ;;  %3756 = vmatprep.mubr.bf16.mxu1 %v6421_v54  ;;  %v6431_v62 = vpop.f32.mrb[4].mxu1 }
 0x17a   :  { %3585 = vmatmul.mubr.bf16.vlgmr.msra.gmra.mrb[0].mxu0 %v6427_v55  ;;  %3757 = vmatmul.mubr.bf16.vlgmr.msra.gmra.mrb[16].mxu1 %v6427_v55  ;;  %v6435_v63 = vpop.f32.mrb[5].mxu1 }
 0x17b   :  { %3596 = vmatpush1.bf16.msra.mxu0 %v5254_v39  ;;  %3768 = vmatpush1.bf16.msra.mxu1 %v5256_v40  ;;  %v417_v3 = vmax.f32 %v6435_v63, 0.0  ;;  %v6438_v4 = vpop.f32.mrb[6].mxu1  ;;  %v615_v39 = vld [vmem:[#allocation7 + $0x588] sm:$0xff] }
 0x17c   :  { %3597 = vmatprep.subr.bf16.mxu0 %v5263_v56  ;;  %3769 = vmatprep.subr.bf16.mxu1 %v5265_v57  ;;  %v6440_v8 = vpop.f32.mrb[7].mxu1  ;;  %v619_v40 = vld [vmem:[#allocation7 + $0x5a8] sm:$0xff]  ;;  %v622_v56 = vld [vmem:[#allocation7 + $0x5c0] sm:$0xff] }
 0x17d   :  { %v425_v12 = vmax.f32 %v6440_v8, 0.0  ;;  %v5305_v52 = vcombine.high %v615_v39, %v619_v40 }
 0x17f   :  { %3598 = vmatpush1.bf16.msra.mxu0 %v5262_v1  ;;  %3770 = vmatpush1.bf16.msra.mxu1 %v5264_v2  ;;  %v6447_v14 = vpack.c.bf16 %v425_v12, %v417_v3  ;;  %v5302_v1 = vcombine.low %v614_v37, %v618_v38  ;;  %v5304_v2 = vcombine.low %v615_v39, %v619_v40  ;;  %v654_v38 = vld [vmem:[#allocation7 + $0x6c0] sm:$0xff]  ;;  %v655_v40 = vld [vmem:[#allocation7 + $0x6c8] sm:$0xff] }
 0x180   :  { %3599 = vmatprep.subr.bf16.mxu0 %v5271_v5  ;;  %3771 = vmatprep.subr.bf16.mxu1 %v5273_v6  ;;  %v5311_v6 = vcombine.high %v622_v56, %v626_v58  ;;  %v658_v39 = vld [vmem:[#allocation7 + $0x6e0] sm:$0xff] }
 0x181   :  { %3627 = vmatprep.mubr.bf16.mxu0 %v6447_v14  ;;  %3799 = vmatprep.mubr.bf16.mxu1 %v6447_v14  ;;  %v6451_v22 = vpop.f32.mrb[8].mxu1 }
 0x182   :  { %v6453_v23 = vpop.f32.mrb[9].mxu1 }
 0x183   :  { %3600 = vmatpush1.bf16.msra.mxu0 %v5270_v13  ;;  %3772 = vmatpush1.bf16.msra.mxu1 %v5272_v0  ;;  %v6455_v26 = vpop.f32.mrb[10].mxu1  ;;  %v635_v13 = vld [vmem:[#allocation7 + $0x628] sm:$0xff]  ;;  %v5310_v0 = vcombine.low %v622_v56, %v626_v58  ;;  %v662_v58 = vld [vmem:[#allocation7 + $0x700] sm:$0xff] }
 0x184   :  { %3601 = vmatprep.subr.bf16.mxu0 %v5279_v15  ;;  %3773 = vmatprep.subr.bf16.mxu1 %v5281_v16  ;;  %v6457_v29 = vpop.f32.mrb[11].mxu1  ;;  %v5312_v15 = vcombine.low %v623_v59, %v627_v60  ;;  %v5319_v16 = vcombine.high %v630_v9, %v634_v10  ;;  %v5321_v17 = vcombine.high %v631_v11, %v635_v13  ;;  %v666_v59 = vld [vmem:[#allocation7 + $0x720] sm:$0xff]  ;;  %v663_v60 = vld [vmem:[#allocation7 + $0x708] sm:$0xff] }
 0x187   :  { %3602 = vmatpush1.bf16.msra.mxu0 %v5278_v24  ;;  %3774 = vmatpush1.bf16.msra.mxu1 %v5280_v25  ;;  %v643_v24 = vld [vmem:[#allocation7 + $0x668] sm:$0xff]  ;;  %v5318_v25 = vcombine.low %v630_v9, %v634_v10  ;;  %v670_v10 = vld [vmem:[#allocation7 + $0x740] sm:$0xff] }
 0x188   :  { %3603 = vmatprep.subr.bf16.mxu0 %v5287_v27  ;;  %3775 = vmatprep.subr.bf16.mxu1 %v5289_v28  ;;  %v5320_v27 = vcombine.low %v631_v11, %v635_v13  ;;  %v5327_v28 = vcombine.high %v638_v18, %v642_v20  ;;  %v5329_v19 = vcombine.high %v639_v21, %v643_v24  ;;  %v674_v11 = vld [vmem:[#allocation7 + $0x760] sm:$0xff]  ;;  %v671_v13 = vld [vmem:[#allocation7 + $0x748] sm:$0xff] }
 0x189   :  { %v6459_v50 = vpop.f32.mrb[12].mxu1 }
 0x18a   :  { %v6461_v57 = vpop.f32.mrb[13].mxu1 }
 0x18b   :  { %3604 = vmatpush1.bf16.msra.mxu0 %v5286_v33  ;;  %3776 = vmatpush1.bf16.msra.mxu1 %v5288_v34  ;;  %v6463_v61 = vpop.f32.mrb[14].mxu1  ;;  %v651_v33 = vld [vmem:[#allocation7 + $0x6a8] sm:$0xff]  ;;  %v5326_v34 = vcombine.low %v638_v18, %v642_v20  ;;  %v678_v20 = vld [vmem:[#allocation7 + $0x780] sm:$0xff] }
 0x18c   :  { %3605 = vmatprep.subr.bf16.mxu0 %v5295_v35  ;;  %3777 = vmatprep.subr.bf16.mxu1 %v5297_v36  ;;  %v6465_v5 = vpop.f32.mrb[15].mxu1  ;;  %v5328_v35 = vcombine.low %v639_v21, %v643_v24  ;;  %v5335_v36 = vcombine.high %v646_v30, %v650_v31  ;;  %v5337_v37 = vcombine.high %v647_v32, %v651_v33  ;;  %v682_v21 = vld [vmem:[#allocation7 + $0x7a0] sm:$0xff]  ;;  %v679_v24 = vld [vmem:[#allocation7 + $0x788] sm:$0xff] }
 0x18f   :  { %3606 = vmatpush1.bf16.msra.mxu0 %v5294_v41  ;;  %3778 = vmatpush1.bf16.msra.mxu1 %v5296_v47  ;;  %v659_v41 = vld [vmem:[#allocation7 + $0x6e8] sm:$0xff]  ;;  %v5334_v47 = vcombine.low %v646_v30, %v650_v31  ;;  %v686_v31 = vld [vmem:[#allocation7 + $0x7c0] sm:$0xff] }
 0x190   :  { %3607 = vmatprep.subr.bf16.mxu0 %v5303_v51  ;;  %3779 = vmatprep.subr.bf16.mxu1 %v5305_v52  ;;  %v5336_v51 = vcombine.low %v647_v32, %v651_v33  ;;  %v5343_v52 = vcombine.high %v654_v38, %v658_v39  ;;  %v5345_v56 = vcombine.high %v655_v40, %v659_v41  ;;  %v690_v32 = vld [vmem:[#allocation7 + $0x7e0] sm:$0xff]  ;;  %v687_v33 = vld [vmem:[#allocation7 + $0x7c8] sm:$0xff] }
 0x193   :  { %3608 = vmatpush1.bf16.msra.mxu0 %v5302_v1  ;;  %3780 = vmatpush1.bf16.msra.mxu1 %v5304_v2  ;;  %v667_v1 = vld [vmem:[#allocation7 + $0x728] sm:$0xff]  ;;  %v5342_v2 = vcombine.low %v654_v38, %v658_v39  ;;  %v694_v39 = vld [vmem:[#allocation7 + $0x800] sm:$0xff] }
 0x194   :  { %3609 = vmatprep.subr.bf16.mxu0 %v5311_v6  ;;  %3781 = vmatprep.subr.bf16.mxu1 %v5313_v7  ;;  %v5344_v6 = vcombine.low %v655_v40, %v659_v41  ;;  %v5351_v7 = vcombine.high %v662_v58, %v666_v59  ;;  %v5353_v9 = vcombine.high %v663_v60, %v667_v1  ;;  %v698_v40 = vld [vmem:[#allocation7 + $0x820] sm:$0xff]  ;;  %v695_v41 = vld [vmem:[#allocation7 + $0x808] sm:$0xff] }
 0x197   :  { %3610 = vmatpush1.bf16.msra.mxu0 %v5310_v0  ;;  %3782 = vmatpush1.bf16.msra.mxu1 %v5312_v15  ;;  %v675_v0 = vld [vmem:[#allocation7 + $0x768] sm:$0xff]  ;;  %v5350_v15 = vcombine.low %v662_v58, %v666_v59  ;;  %v424_v58 = vmax.f32 %v6438_v4, 0.0  ;;  %v5383_v59 = vcombine.high %v694_v39, %v698_v40 }
 0x198   :  { %3611 = vmatprep.subr.bf16.mxu0 %v5319_v16  ;;  %3783 = vmatprep.subr.bf16.mxu1 %v5321_v17  ;;  %v5352_v16 = vcombine.low %v663_v60, %v667_v1  ;;  %v5359_v17 = vcombine.high %v670_v10, %v674_v11  ;;  %v5361_v18 = vcombine.high %v671_v13, %v675_v0  ;;  %v702_v1 = vld [vmem:[#allocation7 + $0x840] sm:$0xff] }
 0x19b   :  { %3612 = vmatpush1.bf16.msra.mxu0 %v5318_v25  ;;  %3784 = vmatpush1.bf16.msra.mxu1 %v5320_v27  ;;  %v683_v25 = vld [vmem:[#allocation7 + $0x7a8] sm:$0xff]  ;;  %v5358_v27 = vcombine.low %v670_v10, %v674_v11  ;;  %v6644_v10 = vmax.f32 %v6457_v29, 0.0  ;;  %v5382_v11 = vcombine.low %v694_v39, %v698_v40  ;;  %v730_v39 = vld [vmem:[#allocation7 + $0x920] sm:$0xff] }
 0x19c   :  { %3613 = vmatprep.subr.bf16.mxu0 %v5327_v28  ;;  %3785 = vmatprep.subr.bf16.mxu1 %v5329_v19  ;;  %v5360_v28 = vcombine.low %v671_v13, %v675_v0  ;;  %v5367_v19 = vcombine.high %v678_v20, %v682_v21  ;;  %v5369_v30 = vcombine.high %v679_v24, %v683_v25  ;;  %v727_v40 = vld [vmem:[#allocation7 + $0x908] sm:$0xff] }
 0x19f   :  { %3614 = vmatpush1.bf16.msra.mxu0 %v5326_v34  ;;  %3786 = vmatpush1.bf16.msra.mxu1 %v5328_v35  ;;  %v691_v34 = vld [vmem:[#allocation7 + $0x7e8] sm:$0xff]  ;;  %v5366_v35 = vcombine.low %v678_v20, %v682_v21 }
 0x1a0   :  { %3615 = vmatprep.subr.bf16.mxu0 %v5335_v36  ;;  %3787 = vmatprep.subr.bf16.mxu1 %v5337_v37  ;;  %v5368_v36 = vcombine.low %v679_v24, %v683_v25  ;;  %v5375_v37 = vcombine.high %v686_v31, %v690_v32  ;;  %v5377_v38 = vcombine.high %v687_v33, %v691_v34  ;;  %v711_v20 = vld [vmem:[#allocation7 + $0x888] sm:$0xff] }
 0x1a1   :  { %v715_v21 = vld [vmem:[#allocation7 + $0x8a8] sm:$0xff] }
 0x1a3   :  { %3616 = vmatpush1.bf16.msra.mxu0 %v5334_v47  ;;  %3788 = vmatpush1.bf16.msra.mxu1 %v5336_v51  ;;  %v699_v47 = vld [vmem:[#allocation7 + $0x828] sm:$0xff]  ;;  %v5374_v51 = vcombine.low %v686_v31, %v690_v32  ;;  %v722_v31 = vld [vmem:[#allocation7 + $0x8e0] sm:$0xff] }
 0x1a4   :  { %3617 = vmatprep.subr.bf16.mxu0 %v5343_v52  ;;  %3789 = vmatprep.subr.bf16.mxu1 %v5345_v56  ;;  %v5376_v52 = vcombine.low %v687_v33, %v691_v34  ;;  %v416_v56 = vmax.f32 %v6431_v62, 0.0  ;;  %v5385_v60 = vcombine.high %v695_v41, %v699_v47  ;;  %v5384_v13 = vcombine.low %v695_v41, %v699_v47  ;;  %v719_v32 = vld [vmem:[#allocation7 + $0x8c8] sm:$0xff] }
 0x1a5   :  { %v723_v33 = vld [vmem:[#allocation7 + $0x8e8] sm:$0xff] }
 0x1a6   :  { %v6475_v0 = vpack.c.bf16 %v424_v58, %v416_v56  ;;  %v731_v41 = vld [vmem:[#allocation7 + $0x928] sm:$0xff] }
 0x1a7   :  { %3618 = vmatpush1.bf16.msra.mxu0 %v5342_v2  ;;  %3790 = vmatpush1.bf16.msra.mxu1 %v5344_v6  ;;  %v706_v2 = vld [vmem:[#allocation7 + $0x860] sm:$0xff]  ;;  %v703_v6 = vld [vmem:[#allocation7 + $0x848] sm:$0xff] }
 0x1a8   :  { %3619 = vmatprep.subr.bf16.mxu0 %v5351_v7  ;;  %3791 = vmatprep.subr.bf16.mxu1 %v5353_v9  ;;  %v707_v7 = vld [vmem:[#allocation7 + $0x868] sm:$0xff]  ;;  %v419_v9 = vmax.f32 %v6453_v23, 0.0  ;;  %v5390_v25 = vcombine.low %v702_v1, %v706_v2  ;;  %v6652_v23 = vmax.f32 %v6465_v5, 0.0 }
 0x1aa   :  { %v6481_v24 = vpack.c.bf16 %v6644_v10, %v419_v9 }
 0x1ab   :  { %3620 = vmatpush1.bf16.msra.mxu0 %v5350_v15  ;;  %3792 = vmatpush1.bf16.msra.mxu1 %v5352_v16  ;;  %v5391_v15 = vcombine.high %v702_v1, %v706_v2  ;;  %v5393_v16 = vcombine.high %v703_v6, %v707_v7  ;;  %v738_v1 = vld [vmem:[#allocation7 + $0x960] sm:$0xff]  ;;  %v735_v2 = vld [vmem:[#allocation7 + $0x948] sm:$0xff] }
 0x1ac   :  { %3621 = vmatprep.subr.bf16.mxu0 %v5359_v17  ;;  %3793 = vmatprep.subr.bf16.mxu1 %v5361_v18  ;;  %v710_v17 = vld [vmem:[#allocation7 + $0x880] sm:$0xff] }
 0x1ad   :  { %v714_v18 = vld [vmem:[#allocation7 + $0x8a0] sm:$0xff] }
 0x1ae   :  { %v5398_v34 = vcombine.low %v710_v17, %v714_v18 }
 0x1af   :  { %3622 = vmatpush1.bf16.msra.mxu0 %v5358_v27  ;;  %3794 = vmatpush1.bf16.msra.mxu1 %v5360_v28  ;;  %v5392_v27 = vcombine.low %v703_v6, %v707_v7  ;;  %v5399_v28 = vcombine.high %v710_v17, %v714_v18  ;;  %v739_v6 = vld [vmem:[#allocation7 + $0x968] sm:$0xff]  ;;  %v746_v17 = vld [vmem:[#allocation7 + $0x9a0] sm:$0xff] }
 0x1b0   :  { %3623 = vmatprep.subr.bf16.mxu0 %v5367_v19  ;;  %3795 = vmatprep.subr.bf16.mxu1 %v5369_v30  ;;  %v5401_v19 = vcombine.high %v711_v20, %v715_v21  ;;  %v718_v30 = vld [vmem:[#allocation7 + $0x8c0] sm:$0xff]  ;;  %v743_v18 = vld [vmem:[#allocation7 + $0x988] sm:$0xff] }
 0x1b1   :  { %v5406_v47 = vcombine.low %v718_v30, %v722_v31 }
 0x1b3   :  { %3624 = vmatpush1.bf16.msra.mxu0 %v5366_v35  ;;  %3796 = vmatpush1.bf16.msra.mxu1 %v5368_v36  ;;  %v5400_v35 = vcombine.low %v711_v20, %v715_v21  ;;  %v5407_v36 = vcombine.high %v718_v30, %v722_v31  ;;  %v747_v20 = vld [vmem:[#allocation7 + $0x9a8] sm:$0xff]  ;;  %v754_v30 = vld [vmem:[#allocation7 + $0x9e0] sm:$0xff] }
 0x1b4   :  { %3625 = vmatprep.subr.bf16.mxu0 %v5375_v37  ;;  %3797 = vmatprep.subr.bf16.mxu1 %v5377_v38  ;;  %v5409_v37 = vcombine.high %v719_v32, %v723_v33  ;;  %v726_v38 = vld [vmem:[#allocation7 + $0x900] sm:$0xff]  ;;  %v751_v31 = vld [vmem:[#allocation7 + $0x9c8] sm:$0xff] }
 0x1b5   :  { %v5414_v7 = vcombine.low %v726_v38, %v730_v39 }
 0x1b7   :  { %3626 = vmatpush1.bf16.msra.mxu0 %v5374_v51  ;;  %3798 = vmatpush1.bf16.msra.mxu1 %v5376_v52  ;;  %v5408_v51 = vcombine.low %v719_v32, %v723_v33  ;;  %v5415_v52 = vcombine.high %v726_v38, %v730_v39  ;;  %v755_v32 = vld [vmem:[#allocation7 + $0x9e8] sm:$0xff]  ;;  %v762_v38 = vld [vmem:[#allocation7 + $0xa20] sm:$0xff] }
 0x1b8   :  { %3638 = vmatprep.subr.bf16.mxu0 %v5383_v59  ;;  %3810 = vmatprep.subr.bf16.mxu1 %v5385_v60  ;;  %v5417_v59 = vcombine.high %v727_v40, %v731_v41  ;;  %v734_v60 = vld [vmem:[#allocation7 + $0x940] sm:$0xff]  ;;  %v759_v39 = vld [vmem:[#allocation7 + $0xa08] sm:$0xff] }
 0x1b9   :  { %v5422_v21 = vcombine.low %v734_v60, %v738_v1 }
 0x1ba   :  { %3628 = vmatmul.mubr.bf16.vlgmr.msra.gmra.mrb[0].mxu0 %v6475_v0  ;;  %3800 = vmatmul.mubr.bf16.vlgmr.msra.gmra.mrb[16].mxu1 %v6475_v0 }
 0x1bb   :  { %3639 = vmatpush1.bf16.msra.mxu0 %v5382_v11  ;;  %3811 = vmatpush1.bf16.msra.mxu1 %v5384_v13  ;;  %v5416_v11 = vcombine.low %v727_v40, %v731_v41  ;;  %v5423_v13 = vcombine.high %v734_v60, %v738_v1  ;;  %v763_v40 = vld [vmem:[#allocation7 + $0xa28] sm:$0xff]  ;;  %v770_v60 = vld [vmem:[#allocation7 + $0xa60] sm:$0xff] }
 0x1bc   :  { %3640 = vmatprep.subr.bf16.mxu0 %v5391_v15  ;;  %3812 = vmatprep.subr.bf16.mxu1 %v5393_v16  ;;  %v5425_v15 = vcombine.high %v735_v2, %v739_v6  ;;  %v742_v16 = vld [vmem:[#allocation7 + $0x980] sm:$0xff]  ;;  %v767_v1 = vld [vmem:[#allocation7 + $0xa48] sm:$0xff] }
 0x1bd   :  { %3670 = vmatprep.mubr.bf16.mxu0 %v6481_v24  ;;  %3842 = vmatprep.mubr.bf16.mxu1 %v6481_v24  ;;  %v5430_v33 = vcombine.low %v742_v16, %v746_v17 }
 0x1bf   :  { %3641 = vmatpush1.bf16.msra.mxu0 %v5390_v25  ;;  %3813 = vmatpush1.bf16.msra.mxu1 %v5392_v27  ;;  %v5424_v25 = vcombine.low %v735_v2, %v739_v6  ;;  %v5431_v27 = vcombine.high %v742_v16, %v746_v17  ;;  %v771_v2 = vld [vmem:[#allocation7 + $0xa68] sm:$0xff]  ;;  %v778_v16 = vld [vmem:[#allocation7 + $0xaa0] sm:$0xff] }
 0x1c0   :  { %3642 = vmatprep.subr.bf16.mxu0 %v5399_v28  ;;  %3814 = vmatprep.subr.bf16.mxu1 %v5401_v19  ;;  %v5433_v28 = vcombine.high %v743_v18, %v747_v20  ;;  %v750_v19 = vld [vmem:[#allocation7 + $0x9c0] sm:$0xff]  ;;  %v775_v17 = vld [vmem:[#allocation7 + $0xa88] sm:$0xff] }
 0x1c1   :  { %v5438_v41 = vcombine.low %v750_v19, %v754_v30 }
 0x1c3   :  { %3643 = vmatpush1.bf16.msra.mxu0 %v5398_v34  ;;  %3815 = vmatpush1.bf16.msra.mxu1 %v5400_v35  ;;  %v5432_v34 = vcombine.low %v743_v18, %v747_v20  ;;  %v5439_v35 = vcombine.high %v750_v19, %v754_v30  ;;  %v779_v18 = vld [vmem:[#allocation7 + $0xaa8] sm:$0xff]  ;;  %v786_v19 = vld [vmem:[#allocation7 + $0xae0] sm:$0xff] }
 0x1c4   :  { %3644 = vmatprep.subr.bf16.mxu0 %v5407_v36  ;;  %3816 = vmatprep.subr.bf16.mxu1 %v5409_v37  ;;  %v5441_v36 = vcombine.high %v751_v31, %v755_v32  ;;  %v758_v37 = vld [vmem:[#allocation7 + $0xa00] sm:$0xff]  ;;  %v783_v30 = vld [vmem:[#allocation7 + $0xac8] sm:$0xff] }
 0x1c5   :  { %v5446_v6 = vcombine.low %v758_v37, %v762_v38 }
 0x1c7   :  { %3645 = vmatpush1.bf16.msra.mxu0 %v5406_v47  ;;  %3817 = vmatpush1.bf16.msra.mxu1 %v5408_v51  ;;  %v5440_v47 = vcombine.low %v751_v31, %v755_v32  ;;  %v5447_v51 = vcombine.high %v758_v37, %v762_v38  ;;  %v787_v31 = vld [vmem:[#allocation7 + $0xae8] sm:$0xff]  ;;  %v794_v37 = vld [vmem:[#allocation7 + $0xb20] sm:$0xff] }
 0x1c8   :  { %3646 = vmatprep.subr.bf16.mxu0 %v5415_v52  ;;  %3818 = vmatprep.subr.bf16.mxu1 %v5417_v59  ;;  %v5449_v52 = vcombine.high %v759_v39, %v763_v40  ;;  %v766_v59 = vld [vmem:[#allocation7 + $0xa40] sm:$0xff]  ;;  %v791_v38 = vld [vmem:[#allocation7 + $0xb08] sm:$0xff] }
 0x1c9   :  { %v5454_v20 = vcombine.low %v766_v59, %v770_v60 }
 0x1cb   :  { %3647 = vmatpush1.bf16.msra.mxu0 %v5414_v7  ;;  %3819 = vmatpush1.bf16.msra.mxu1 %v5416_v11  ;;  %v5448_v7 = vcombine.low %v759_v39, %v763_v40  ;;  %v5455_v11 = vcombine.high %v766_v59, %v770_v60  ;;  %v795_v39 = vld [vmem:[#allocation7 + $0xb28] sm:$0xff]  ;;  %v802_v59 = vld [vmem:[#allocation7 + $0xb60] sm:$0xff] }
 0x1cc   :  { %3648 = vmatprep.subr.bf16.mxu0 %v5423_v13  ;;  %3820 = vmatprep.subr.bf16.mxu1 %v5425_v15  ;;  %v5457_v13 = vcombine.high %v767_v1, %v771_v2  ;;  %v774_v15 = vld [vmem:[#allocation7 + $0xa80] sm:$0xff]  ;;  %v799_v60 = vld [vmem:[#allocation7 + $0xb48] sm:$0xff] }
 0x1cd   :  { %v5462_v32 = vcombine.low %v774_v15, %v778_v16 }
 0x1cf   :  { %3649 = vmatpush1.bf16.msra.mxu0 %v5422_v21  ;;  %3821 = vmatpush1.bf16.msra.mxu1 %v5424_v25  ;;  %v5456_v21 = vcombine.low %v767_v1, %v771_v2  ;;  %v5463_v25 = vcombine.high %v774_v15, %v778_v16  ;;  %v803_v1 = vld [vmem:[#allocation7 + $0xb68] sm:$0xff]  ;;  %v810_v15 = vld [vmem:[#allocation7 + $0xba0] sm:$0xff] }
 0x1d0   :  { %3650 = vmatprep.subr.bf16.mxu0 %v5431_v27  ;;  %3822 = vmatprep.subr.bf16.mxu1 %v5433_v28  ;;  %v5465_v27 = vcombine.high %v775_v17, %v779_v18  ;;  %v782_v28 = vld [vmem:[#allocation7 + $0xac0] sm:$0xff]  ;;  %v807_v16 = vld [vmem:[#allocation7 + $0xb88] sm:$0xff] }
 0x1d1   :  { %v5470_v40 = vcombine.low %v782_v28, %v786_v19 }
 0x1d3   :  { %3651 = vmatpush1.bf16.msra.mxu0 %v5430_v33  ;;  %3823 = vmatpush1.bf16.msra.mxu1 %v5432_v34  ;;  %v5464_v33 = vcombine.low %v775_v17, %v779_v18  ;;  %v5471_v34 = vcombine.high %v782_v28, %v786_v19  ;;  %v811_v17 = vld [vmem:[#allocation7 + $0xba8] sm:$0xff]  ;;  %v818_v28 = vld [vmem:[#allocation7 + $0xbe0] sm:$0xff] }
 0x1d4   :  { %3652 = vmatprep.subr.bf16.mxu0 %v5439_v35  ;;  %3824 = vmatprep.subr.bf16.mxu1 %v5441_v36  ;;  %v5473_v35 = vcombine.high %v783_v30, %v787_v31  ;;  %v790_v36 = vld [vmem:[#allocation7 + $0xb00] sm:$0xff]  ;;  %v815_v19 = vld [vmem:[#allocation7 + $0xbc8] sm:$0xff] }
 0x1d5   :  { %v5478_v2 = vcombine.low %v790_v36, %v794_v37 }
 0x1d7   :  { %3653 = vmatpush1.bf16.msra.mxu0 %v5438_v41  ;;  %3825 = vmatpush1.bf16.msra.mxu1 %v5440_v47  ;;  %v5472_v41 = vcombine.low %v783_v30, %v787_v31  ;;  %v5479_v47 = vcombine.high %v790_v36, %v794_v37  ;;  %v819_v30 = vld [vmem:[#allocation7 + $0xbe8] sm:$0xff]  ;;  %v826_v36 = vld [vmem:[#allocation7 + $0xc20] sm:$0xff] }
 0x1d8   :  { %3654 = vmatprep.subr.bf16.mxu0 %v5447_v51  ;;  %3826 = vmatprep.subr.bf16.mxu1 %v5449_v52  ;;  %v5481_v51 = vcombine.high %v791_v38, %v795_v39  ;;  %v798_v52 = vld [vmem:[#allocation7 + $0xb40] sm:$0xff]  ;;  %v823_v37 = vld [vmem:[#allocation7 + $0xc08] sm:$0xff] }
 0x1d9   :  { %v5486_v18 = vcombine.low %v798_v52, %v802_v59 }
 0x1db   :  { %3655 = vmatpush1.bf16.msra.mxu0 %v5446_v6  ;;  %3827 = vmatpush1.bf16.msra.mxu1 %v5448_v7  ;;  %v5480_v6 = vcombine.low %v791_v38, %v795_v39  ;;  %v5487_v7 = vcombine.high %v798_v52, %v802_v59  ;;  %v827_v38 = vld [vmem:[#allocation7 + $0xc28] sm:$0xff]  ;;  %v830_v59 = vld [vmem:[#allocation7 + $0xc40] sm:$0xff] }
 0x1dc   :  { %3656 = vmatprep.subr.bf16.mxu0 %v5455_v11  ;;  %3828 = vmatprep.subr.bf16.mxu1 %v5457_v13  ;;  %v5489_v11 = vcombine.high %v799_v60, %v803_v1  ;;  %v806_v13 = vld [vmem:[#allocation7 + $0xb80] sm:$0xff]  ;;  %v5513_v52 = vcombine.high %v823_v37, %v827_v38 }
 0x1dd   :  { %v5494_v31 = vcombine.low %v806_v13, %v810_v15 }
 0x1df   :  { %3657 = vmatpush1.bf16.msra.mxu0 %v5454_v20  ;;  %3829 = vmatpush1.bf16.msra.mxu1 %v5456_v21  ;;  %v5488_v20 = vcombine.low %v799_v60, %v803_v1  ;;  %v5495_v21 = vcombine.high %v806_v13, %v810_v15  ;;  %v834_v60 = vld [vmem:[#allocation7 + $0xc60] sm:$0xff]  ;;  %v831_v1 = vld [vmem:[#allocation7 + $0xc48] sm:$0xff]  ;;  %v5512_v13 = vcombine.low %v823_v37, %v827_v38 }
 0x1e0   :  { %3658 = vmatprep.subr.bf16.mxu0 %v5463_v25  ;;  %3830 = vmatprep.subr.bf16.mxu1 %v5465_v27  ;;  %v5497_v25 = vcombine.high %v807_v16, %v811_v17  ;;  %v814_v27 = vld [vmem:[#allocation7 + $0xbc0] sm:$0xff] }
 0x1e1   :  { %v5502_v39 = vcombine.low %v814_v27, %v818_v28 }
 0x1e3   :  { %3659 = vmatpush1.bf16.msra.mxu0 %v5462_v32  ;;  %3831 = vmatpush1.bf16.msra.mxu1 %v5464_v33  ;;  %v5496_v32 = vcombine.low %v807_v16, %v811_v17  ;;  %v5503_v33 = vcombine.high %v814_v27, %v818_v28  ;;  %v5519_v16 = vcombine.high %v830_v59, %v834_v60 }
 0x1e4   :  { %3660 = vmatprep.subr.bf16.mxu0 %v5471_v34  ;;  %3832 = vmatprep.subr.bf16.mxu1 %v5473_v35  ;;  %v5505_v34 = vcombine.high %v815_v19, %v819_v30  ;;  %v822_v35 = vld [vmem:[#allocation7 + $0xc00] sm:$0xff]  ;;  %v5518_v28 = vcombine.low %v830_v59, %v834_v60  ;;  %v859_v59 = vld [vmem:[#allocation7 + $0xd28] sm:$0xff] }
 0x1e7   :  { %3661 = vmatpush1.bf16.msra.mxu0 %v5470_v40  ;;  %3833 = vmatpush1.bf16.msra.mxu1 %v5472_v41  ;;  %v5504_v40 = vcombine.low %v815_v19, %v819_v30  ;;  %v418_v41 = vmax.f32 %v6451_v22, 0.0 }
 0x1e8   :  { %3662 = vmatprep.subr.bf16.mxu0 %v5479_v47  ;;  %3834 = vmatprep.subr.bf16.mxu1 %v5481_v51  ;;  %v6646_v47 = vmax.f32 %v6455_v26, 0.0  ;;  %v5511_v51 = vcombine.high %v822_v35, %v826_v36 }
 0x1ea   :  { %v6495_v15 = vpack.c.bf16 %v6646_v47, %v418_v41 }
 0x1eb   :  { %3663 = vmatpush1.bf16.msra.mxu0 %v5478_v2  ;;  %3835 = vmatpush1.bf16.msra.mxu1 %v5480_v6  ;;  %v835_v2 = vld [vmem:[#allocation7 + $0xc68] sm:$0xff]  ;;  %v6647_v6 = vmax.f32 %v6461_v57, 0.0 }
 0x1ec   :  { %3664 = vmatprep.subr.bf16.mxu0 %v5487_v7  ;;  %3836 = vmatprep.subr.bf16.mxu1 %v5489_v11  ;;  %v6643_v7 = vmax.f32 %v6465_v5, 0.0  ;;  %v5510_v11 = vcombine.low %v822_v35, %v826_v36  ;;  %v5521_v17 = vcombine.high %v831_v1, %v835_v2  ;;  %v5520_v19 = vcombine.low %v831_v1, %v835_v2  ;;  %v851_v35 = vld [vmem:[#allocation7 + $0xce8] sm:$0xff]  ;;  %v5986_v5 = vld [vmem:[#allocation13 + $0x10] sm:$0xff]  }
 0x1ee   :  { %v6501_v27 = vpack.c.bf16 %v6643_v7, %v6647_v6 }
 0x1ef   :  { %3665 = vmatpush1.bf16.msra.mxu0 %v5486_v18  ;;  %3837 = vmatpush1.bf16.msra.mxu1 %v5488_v20  ;;  %v838_v18 = vld [vmem:[#allocation7 + $0xc80] sm:$0xff] }
 0x1f0   :  { %3666 = vmatprep.subr.bf16.mxu0 %v5495_v21  ;;  %3838 = vmatprep.subr.bf16.mxu1 %v5497_v25  ;;  %v842_v20 = vld [vmem:[#allocation7 + $0xca0] sm:$0xff]  ;;  %v839_v21 = vld [vmem:[#allocation7 + $0xc88] sm:$0xff] }
 0x1f1   :  { %v843_v25 = vld [vmem:[#allocation7 + $0xca8] sm:$0xff]  ;;  %v5527_v30 = vcombine.high %v838_v18, %v842_v20  ;;  %v5526_v36 = vcombine.low %v838_v18, %v842_v20 }
 0x1f2   :  { %v5528_v37 = vcombine.low %v839_v21, %v843_v25  ;;  %v867_v18 = vld [vmem:[#allocation7 + $0xd68] sm:$0xff] }
 0x1f3   :  { %3667 = vmatpush1.bf16.msra.mxu0 %v5494_v31  ;;  %3839 = vmatpush1.bf16.msra.mxu1 %v5496_v32  ;;  %v5529_v31 = vcombine.high %v839_v21, %v843_v25  ;;  %v846_v32 = vld [vmem:[#allocation7 + $0xcc0] sm:$0xff] }
 0x1f4   :  { %3668 = vmatprep.subr.bf16.mxu0 %v5503_v33  ;;  %3840 = vmatprep.subr.bf16.mxu1 %v5505_v34  ;;  %v850_v33 = vld [vmem:[#allocation7 + $0xce0] sm:$0xff]  ;;  %v847_v34 = vld [vmem:[#allocation7 + $0xcc8] sm:$0xff] }
 0x1f5   :  { %v5535_v38 = vcombine.high %v846_v32, %v850_v33  ;;  %v5534_v60 = vcombine.low %v846_v32, %v850_v33  ;;  %v5536_v1 = vcombine.low %v847_v34, %v851_v35  ;;  %v875_v32 = vld [vmem:[#allocation7 + $0xda8] sm:$0xff] }
 0x1f7   :  { %3669 = vmatpush1.bf16.msra.mxu0 %v5502_v39  ;;  %3841 = vmatpush1.bf16.msra.mxu1 %v5504_v40  ;;  %v5537_v39 = vcombine.high %v847_v34, %v851_v35  ;;  %v854_v40 = vld [vmem:[#allocation7 + $0xd00] sm:$0xff] }
 0x1f8   :  { %3681 = vmatprep.subr.bf16.mxu0 %v5511_v51  ;;  %3853 = vmatprep.subr.bf16.mxu1 %v5513_v52  ;;  %v858_v51 = vld [vmem:[#allocation7 + $0xd20] sm:$0xff]  ;;  %v855_v52 = vld [vmem:[#allocation7 + $0xd08] sm:$0xff] }
 0x1f9   :  { %v5543_v2 = vcombine.high %v854_v40, %v858_v51  ;;  %v5542_v20 = vcombine.low %v854_v40, %v858_v51  ;;  %v5544_v21 = vcombine.low %v855_v52, %v859_v59  ;;  %v883_v40 = vld [vmem:[#allocation7 + $0xde8] sm:$0xff] }
 0x1fa   :  { %3671 = vmatmul.mubr.bf16.vlgmr.msra.gmra.mrb[0].mxu0 %v6495_v15  ;;  %3843 = vmatmul.mubr.bf16.vlgmr.msra.gmra.mrb[16].mxu1 %v6495_v15 }
 0x1fb   :  { %3682 = vmatpush1.bf16.msra.mxu0 %v5510_v11  ;;  %3854 = vmatpush1.bf16.msra.mxu1 %v5512_v13  ;;  %v5545_v11 = vcombine.high %v855_v52, %v859_v59  ;;  %v862_v13 = vld [vmem:[#allocation7 + $0xd40] sm:$0xff] }
 0x1fc   :  { %3683 = vmatprep.subr.bf16.mxu0 %v5519_v16  ;;  %3855 = vmatprep.subr.bf16.mxu1 %v5521_v17  ;;  %v866_v16 = vld [vmem:[#allocation7 + $0xd60] sm:$0xff]  ;;  %v863_v17 = vld [vmem:[#allocation7 + $0xd48] sm:$0xff] }
 0x1fd   :  { %3713 = vmatprep.mubr.bf16.mxu0 %v6501_v27  ;;  %3885 = vmatprep.mubr.bf16.mxu1 %v6501_v27  ;;  %v5551_v25 = vcombine.high %v862_v13, %v866_v16  ;;  %v5550_v33 = vcombine.low %v862_v13, %v866_v16  ;;  %v5552_v34 = vcombine.low %v863_v17, %v867_v18  ;;  %v891_v13 = vld [vmem:[#allocation7 + $0xe28] sm:$0xff] }
 0x1ff   :  { %3684 = vmatpush1.bf16.msra.mxu0 %v5518_v28  ;;  %3856 = vmatpush1.bf16.msra.mxu1 %v5520_v19  ;;  %v5553_v28 = vcombine.high %v863_v17, %v867_v18  ;;  %v870_v19 = vld [vmem:[#allocation7 + $0xd80] sm:$0xff] }
 0x200   :  { %3685 = vmatprep.subr.bf16.mxu0 %v5527_v30  ;;  %3857 = vmatprep.subr.bf16.mxu1 %v5529_v31  ;;  %v874_v30 = vld [vmem:[#allocation7 + $0xda0] sm:$0xff]  ;;  %v871_v31 = vld [vmem:[#allocation7 + $0xd88] sm:$0xff] }
 0x201   :  { %v5559_v35 = vcombine.high %v870_v19, %v874_v30  ;;  %v5558_v51 = vcombine.low %v870_v19, %v874_v30  ;;  %v5560_v52 = vcombine.low %v871_v31, %v875_v32  ;;  %v899_v19 = vld [vmem:[#allocation7 + $0xe68] sm:$0xff] }
 0x203   :  { %3686 = vmatpush1.bf16.msra.mxu0 %v5526_v36  ;;  %3858 = vmatpush1.bf16.msra.mxu1 %v5528_v37  ;;  %v5561_v36 = vcombine.high %v871_v31, %v875_v32  ;;  %v878_v37 = vld [vmem:[#allocation7 + $0xdc0] sm:$0xff] }
 0x204   :  { %3687 = vmatprep.subr.bf16.mxu0 %v5535_v38  ;;  %3859 = vmatprep.subr.bf16.mxu1 %v5537_v39  ;;  %v882_v38 = vld [vmem:[#allocation7 + $0xde0] sm:$0xff]  ;;  %v879_v39 = vld [vmem:[#allocation7 + $0xdc8] sm:$0xff] }
 0x205   :  { %v5567_v59 = vcombine.high %v878_v37, %v882_v38  ;;  %v5566_v16 = vcombine.low %v878_v37, %v882_v38  ;;  %v5568_v17 = vcombine.low %v879_v39, %v883_v40  ;;  %v907_v37 = vld [vmem:[#allocation7 + $0xea8] sm:$0xff] }
 0x207   :  { %3688 = vmatpush1.bf16.msra.mxu0 %v5534_v60  ;;  %3860 = vmatpush1.bf16.msra.mxu1 %v5536_v1  ;;  %v5569_v60 = vcombine.high %v879_v39, %v883_v40  ;;  %v886_v1 = vld [vmem:[#allocation7 + $0xe00] sm:$0xff] }
 0x208   :  { %3689 = vmatprep.subr.bf16.mxu0 %v5543_v2  ;;  %3861 = vmatprep.subr.bf16.mxu1 %v5545_v11  ;;  %v890_v2 = vld [vmem:[#allocation7 + $0xe20] sm:$0xff]  ;;  %v887_v11 = vld [vmem:[#allocation7 + $0xe08] sm:$0xff] }
 0x209   :  { %v5575_v18 = vcombine.high %v886_v1, %v890_v2  ;;  %v5574_v30 = vcombine.low %v886_v1, %v890_v2  ;;  %v5576_v31 = vcombine.low %v887_v11, %v891_v13  ;;  %v915_v1 = vld [vmem:[#allocation7 + $0xee8] sm:$0xff] }
 0x20b   :  { %3690 = vmatpush1.bf16.msra.mxu0 %v5542_v20  ;;  %3862 = vmatpush1.bf16.msra.mxu1 %v5544_v21  ;;  %v5577_v20 = vcombine.high %v887_v11, %v891_v13  ;;  %v894_v21 = vld [vmem:[#allocation7 + $0xe40] sm:$0xff] }
 0x20c   :  { %3691 = vmatprep.subr.bf16.mxu0 %v5551_v25  ;;  %3863 = vmatprep.subr.bf16.mxu1 %v5553_v28  ;;  %v898_v25 = vld [vmem:[#allocation7 + $0xe60] sm:$0xff]  ;;  %v895_v28 = vld [vmem:[#allocation7 + $0xe48] sm:$0xff] }
 0x20d   :  { %v5583_v32 = vcombine.high %v894_v21, %v898_v25  ;;  %v5582_v38 = vcombine.low %v894_v21, %v898_v25  ;;  %v5584_v39 = vcombine.low %v895_v28, %v899_v19  ;;  %v923_v21 = vld [vmem:[#allocation7 + $0xf28] sm:$0xff] }
 0x20f   :  { %3692 = vmatpush1.bf16.msra.mxu0 %v5550_v33  ;;  %3864 = vmatpush1.bf16.msra.mxu1 %v5552_v34  ;;  %v5585_v33 = vcombine.high %v895_v28, %v899_v19  ;;  %v902_v34 = vld [vmem:[#allocation7 + $0xe80] sm:$0xff] }
 0x210   :  { %3693 = vmatprep.subr.bf16.mxu0 %v5559_v35  ;;  %3865 = vmatprep.subr.bf16.mxu1 %v5561_v36  ;;  %v906_v35 = vld [vmem:[#allocation7 + $0xea0] sm:$0xff]  ;;  %v903_v36 = vld [vmem:[#allocation7 + $0xe88] sm:$0xff] }
 0x211   :  { %v5591_v40 = vcombine.high %v902_v34, %v906_v35  ;;  %v5590_v2 = vcombine.low %v902_v34, %v906_v35  ;;  %v5592_v11 = vcombine.low %v903_v36, %v907_v37  ;;  %v931_v34 = vld [vmem:[#allocation7 + $0xf68] sm:$0xff] }
 0x213   :  { %3694 = vmatpush1.bf16.msra.mxu0 %v5558_v51  ;;  %3866 = vmatpush1.bf16.msra.mxu1 %v5560_v52  ;;  %v5593_v51 = vcombine.high %v903_v36, %v907_v37  ;;  %v910_v52 = vld [vmem:[#allocation7 + $0xec0] sm:$0xff] }
 0x214   :  { %3695 = vmatprep.subr.bf16.mxu0 %v5567_v59  ;;  %3867 = vmatprep.subr.bf16.mxu1 %v5569_v60  ;;  %v914_v59 = vld [vmem:[#allocation7 + $0xee0] sm:$0xff]  ;;  %v911_v60 = vld [vmem:[#allocation7 + $0xec8] sm:$0xff] }
 0x215   :  { %v5599_v13 = vcombine.high %v910_v52, %v914_v59  ;;  %v5598_v25 = vcombine.low %v910_v52, %v914_v59  ;;  %v5600_v28 = vcombine.low %v911_v60, %v915_v1  ;;  %v939_v52 = vld [vmem:[#allocation7 + $0xfa8] sm:$0xff] }
 0x217   :  { %3696 = vmatpush1.bf16.msra.mxu0 %v5566_v16  ;;  %3868 = vmatpush1.bf16.msra.mxu1 %v5568_v17  ;;  %v5601_v16 = vcombine.high %v911_v60, %v915_v1  ;;  %v918_v17 = vld [vmem:[#allocation7 + $0xf00] sm:$0xff] }
 0x218   :  { %3697 = vmatprep.subr.bf16.mxu0 %v5575_v18  ;;  %3869 = vmatprep.subr.bf16.mxu1 %v5577_v20  ;;  %v922_v18 = vld [vmem:[#allocation7 + $0xf20] sm:$0xff]  ;;  %v919_v20 = vld [vmem:[#allocation7 + $0xf08] sm:$0xff] }
 0x219   :  { %v5607_v19 = vcombine.high %v918_v17, %v922_v18  ;;  %v5606_v35 = vcombine.low %v918_v17, %v922_v18  ;;  %v5608_v36 = vcombine.low %v919_v20, %v923_v21  ;;  %v947_v17 = vld [vmem:[#allocation7 + $0xfe8] sm:$0xff] }
 0x21b   :  { %3698 = vmatpush1.bf16.msra.mxu0 %v5574_v30  ;;  %3870 = vmatpush1.bf16.msra.mxu1 %v5576_v31  ;;  %v5609_v30 = vcombine.high %v919_v20, %v923_v21  ;;  %v926_v31 = vld [vmem:[#allocation7 + $0xf40] sm:$0xff] }
 0x21c   :  { %3699 = vmatprep.subr.bf16.mxu0 %v5583_v32  ;;  %3871 = vmatprep.subr.bf16.mxu1 %v5585_v33  ;;  %v930_v32 = vld [vmem:[#allocation7 + $0xf60] sm:$0xff]  ;;  %v927_v33 = vld [vmem:[#allocation7 + $0xf48] sm:$0xff] }
 0x21d   :  { %v5615_v37 = vcombine.high %v926_v31, %v930_v32  ;;  %v5614_v59 = vcombine.low %v926_v31, %v930_v32  ;;  %v5616_v60 = vcombine.low %v927_v33, %v931_v34  ;;  %v445_v31 = vld [vmem:[#allocation7 + $0x38] sm:$0xff] }
 0x21f   :  { %3700 = vmatpush1.bf16.msra.mxu0 %v5582_v38  ;;  %3872 = vmatpush1.bf16.msra.mxu1 %v5584_v39  ;;  %v5617_v38 = vcombine.high %v927_v33, %v931_v34  ;;  %v934_v39 = vld [vmem:[#allocation7 + $0xf80] sm:$0xff]  ;;  %v420_v34 = vmax.f32 %v6459_v50, 0.0 }
 0x220   :  { %3701 = vmatprep.subr.bf16.mxu0 %v5591_v40  ;;  %3873 = vmatprep.subr.bf16.mxu1 %v5593_v51  ;;  %v938_v40 = vld [vmem:[#allocation7 + $0xfa0] sm:$0xff]  ;;  %v935_v51 = vld [vmem:[#allocation7 + $0xf88] sm:$0xff] }
 0x221   :  { %v5623_v1 = vcombine.high %v934_v39, %v938_v40  ;;  %v5622_v18 = vcombine.low %v934_v39, %v938_v40  ;;  %v5624_v20 = vcombine.low %v935_v51, %v939_v52  ;;  %v452_v39 = vld [vmem:[#allocation7 + $0x70] sm:$0xff]  ;;  %v449_v40 = vld [vmem:[#allocation7 + $0x58] sm:$0xff] }
 0x223   :  { %3702 = vmatpush1.bf16.msra.mxu0 %v5590_v2  ;;  %3874 = vmatpush1.bf16.msra.mxu1 %v5592_v11  ;;  %v5625_v2 = vcombine.high %v935_v51, %v939_v52  ;;  %v942_v11 = vld [vmem:[#allocation7 + $0xfc0] sm:$0xff]  ;;  %v453_v51 = vld [vmem:[#allocation7 + $0x78] sm:$0xff] }
 0x224   :  { %3703 = vmatprep.subr.bf16.mxu0 %v5599_v13  ;;  %3875 = vmatprep.subr.bf16.mxu1 %v5601_v16  ;;  %v946_v13 = vld [vmem:[#allocation7 + $0xfe0] sm:$0xff]  ;;  %v943_v16 = vld [vmem:[#allocation7 + $0xfc8] sm:$0xff] }
 0x225   :  { %v5631_v21 = vcombine.high %v942_v11, %v946_v13  ;;  %v5630_v32 = vcombine.low %v942_v11, %v946_v13  ;;  %v5632_v33 = vcombine.low %v943_v16, %v947_v17  ;;  %v456_v11 = vld [vmem:[#allocation7 + $0x90] sm:$0xff] }
 0x226   :  { %v460_v13 = vld [vmem:[#allocation7 + $0xb0] sm:$0xff] }
 0x227   :  { %3704 = vmatpush1.bf16.msra.mxu0 %v5598_v25  ;;  %3876 = vmatpush1.bf16.msra.mxu1 %v5600_v28  ;;  %v5633_v25 = vcombine.high %v943_v16, %v947_v17  ;;  %v440_v28 = vld [vmem:[#allocation7 + $0x10] sm:$0xff]  ;;  %v457_v16 = vld [vmem:[#allocation7 + $0x98] sm:$0xff] }
 0x228   :  { %3705 = vmatprep.subr.bf16.mxu0 %v5607_v19  ;;  %3877 = vmatprep.subr.bf16.mxu1 %v5609_v30  ;;  %v444_v19 = vld [vmem:[#allocation7 + $0x30] sm:$0xff]  ;;  %v441_v30 = vld [vmem:[#allocation7 + $0x18] sm:$0xff] }
 0x229   :  { %v5130_v52 = vcombine.low %v440_v28, %v444_v19  ;;  %v461_v17 = vld [vmem:[#allocation7 + $0xb8] sm:$0xff] }
 0x22b   :  { %3706 = vmatpush1.bf16.msra.mxu0 %v5606_v35  ;;  %3878 = vmatpush1.bf16.msra.mxu1 %v5608_v36  ;;  %v6645_v35 = vmax.f32 %v6463_v61, 0.0  ;;  %v5131_v36 = vcombine.high %v440_v28, %v444_v19  ;;  %v464_v28 = vld [vmem:[#allocation7 + $0xd0] sm:$0xff] }
 0x22c   :  { %3707 = vmatprep.subr.bf16.mxu0 %v5615_v37  ;;  %3879 = vmatprep.subr.bf16.mxu1 %v5617_v38  ;;  %v5133_v37 = vcombine.high %v441_v30, %v445_v31  ;;  %v448_v38 = vld [vmem:[#allocation7 + $0x50] sm:$0xff] }
 0x22d   :  { %v468_v19 = vld [vmem:[#allocation7 + $0xf0] sm:$0xff] }
 0x22f   :  { %3708 = vmatpush1.bf16.msra.mxu0 %v5614_v59  ;;  %3880 = vmatpush1.bf16.msra.mxu1 %v5616_v60  ;;  %v6513_v59 = vpack.c.bf16 %v6645_v35, %v420_v34  ;;  %v5132_v60 = vcombine.low %v441_v30, %v445_v31  ;;  %v465_v30 = vld [vmem:[#allocation7 + $0xd8] sm:$0xff] }
 0x230   :  { %3709 = vmatprep.subr.bf16.mxu0 %v5623_v1  ;;  %3881 = vmatprep.subr.bf16.mxu1 %v5625_v2  ;;  %v5139_v1 = vcombine.high %v448_v38, %v452_v39  ;;  %v5141_v2 = vcombine.high %v449_v40, %v453_v51  ;;  %v469_v31 = vld [vmem:[#allocation7 + $0xf8] sm:$0xff] }
 0x233   :  { %3710 = vmatpush1.bf16.msra.mxu0 %v5622_v18  ;;  %3882 = vmatpush1.bf16.msra.mxu1 %v5624_v20  ;;  %v5138_v18 = vcombine.low %v448_v38, %v452_v39  ;;  %v5140_v20 = vcombine.low %v449_v40, %v453_v51  ;;  %v472_v38 = vld [vmem:[#allocation7 + $0x110] sm:$0xff]  ;;  %v477_v40 = vld [vmem:[#allocation7 + $0x138] sm:$0xff]  ;;  %v5154_v51 = vcombine.low %v464_v28, %v468_v19 }
 0x234   :  { %3711 = vmatprep.subr.bf16.mxu0 %v5631_v21  ;;  %3883 = vmatprep.subr.bf16.mxu1 %v5633_v25  ;;  %v5147_v21 = vcombine.high %v456_v11, %v460_v13  ;;  %v5149_v25 = vcombine.high %v457_v16, %v461_v17  ;;  %v476_v39 = vld [vmem:[#allocation7 + $0x130] sm:$0xff] }
 0x237   :  { %3712 = vmatpush1.bf16.msra.mxu0 %v5630_v32  ;;  %3884 = vmatpush1.bf16.msra.mxu1 %v5632_v33  ;;  %v5146_v32 = vcombine.low %v456_v11, %v460_v13  ;;  %v5148_v33 = vcombine.low %v457_v16, %v461_v17  ;;  %v484_v11 = vld [vmem:[#allocation7 + $0x170] sm:$0xff]  ;;  %v481_v13 = vld [vmem:[#allocation7 + $0x158] sm:$0xff]  ;;  %v5162_v16 = vcombine.low %v472_v38, %v476_v39 }
 0x238   :  { %3896 = vmatprep.subr.bf16.mxu0 %v5131_v36  ;;  %4068 = vmatprep.subr.bf16.mxu1 %v5133_v37  ;;  %v5155_v36 = vcombine.high %v464_v28, %v468_v19  ;;  %v5157_v37 = vcombine.high %v465_v30, %v469_v31  ;;  %v492_v28 = vld [vmem:[#allocation7 + $0x1b0] sm:$0xff]  ;;  %v489_v19 = vld [vmem:[#allocation7 + $0x198] sm:$0xff] }
 0x23a   :  { %3714 = vmatmul.mubr.bf16.vlgmr.msra.gmra.mrb[0].mxu0 %v6513_v59  ;;  %3886 = vmatmul.mubr.bf16.vlgmr.msra.gmra.mrb[16].mxu1 %v6513_v59 }
 0x23b   :  { %3897 = vmatpush1.bf16.msra.mxu0 %v5130_v52  ;;  %3928 = vmatprep.mubr.bf16.mxu0 %v6421_v54  ;;  %v5156_v52 = vcombine.low %v465_v30, %v469_v31 }
 0x23c   :  { %4069 = vmatpush1.bf16.msra.mxu1 %v5132_v60  ;;  %4100 = vmatprep.mubr.bf16.mxu1 %v6421_v54  ;;  %v473_v54 = vld [vmem:[#allocation7 + $0x118] sm:$0xff]  ;;  %v5163_v60 = vcombine.high %v472_v38, %v476_v39  ;;  %v500_v38 = vld [vmem:[#allocation7 + $0x1f0] sm:$0xff] }
 0x23d   :  { %3898 = vmatprep.subr.bf16.mxu0 %v5139_v1  ;;  %4070 = vmatprep.subr.bf16.mxu1 %v5141_v2  ;;  %v5165_v1 = vcombine.high %v473_v54, %v477_v40  ;;  %v480_v2 = vld [vmem:[#allocation7 + $0x150] sm:$0xff]  ;;  %v5164_v17 = vcombine.low %v473_v54, %v477_v40  ;;  %v497_v39 = vld [vmem:[#allocation7 + $0x1d8] sm:$0xff] }
 0x23e   :  { %v5170_v30 = vcombine.low %v480_v2, %v484_v11 }
 0x23f   :  { %3899 = vmatpush1.bf16.msra.mxu0 %v5138_v18  ;;  %v485_v18 = vld [vmem:[#allocation7 + $0x178] sm:$0xff] }
 0x240   :  { %4071 = vmatpush1.bf16.msra.mxu1 %v5140_v20  ;;  %3900 = vmatprep.subr.bf16.mxu0 %v5147_v21  ;;  %v5171_v20 = vcombine.high %v480_v2, %v484_v11  ;;  %v5173_v21 = vcombine.high %v481_v13, %v485_v18  ;;  %v5172_v31 = vcombine.low %v481_v13, %v485_v18  ;;  %v508_v2 = vld [vmem:[#allocation7 + $0x230] sm:$0xff]  ;;  %v505_v11 = vld [vmem:[#allocation7 + $0x218] sm:$0xff] }
 0x241   :  { %4072 = vmatprep.subr.bf16.mxu1 %v5149_v25  ;;  %v488_v25 = vld [vmem:[#allocation7 + $0x190] sm:$0xff] }
 0x242   :  { %v5178_v54 = vcombine.low %v488_v25, %v492_v28 }
 0x243   :  { %3901 = vmatpush1.bf16.msra.mxu0 %v5146_v32  ;;  %v493_v32 = vld [vmem:[#allocation7 + $0x1b8] sm:$0xff] }
 0x244   :  { %4073 = vmatpush1.bf16.msra.mxu1 %v5148_v33  ;;  %3902 = vmatprep.subr.bf16.mxu0 %v5155_v36  ;;  %v5179_v33 = vcombine.high %v488_v25, %v492_v28  ;;  %v5181_v36 = vcombine.high %v489_v19, %v493_v32  ;;  %v5180_v40 = vcombine.low %v489_v19, %v493_v32  ;;  %v516_v25 = vld [vmem:[#allocation7 + $0x270] sm:$0xff]  ;;  %v513_v28 = vld [vmem:[#allocation7 + $0x258] sm:$0xff] }
 0x245   :  { %4074 = vmatprep.subr.bf16.mxu1 %v5157_v37  ;;  %v496_v37 = vld [vmem:[#allocation7 + $0x1d0] sm:$0xff] }
 0x246   :  { %v5186_v13 = vcombine.low %v496_v37, %v500_v38 }
 0x247   :  { %3903 = vmatpush1.bf16.msra.mxu0 %v5154_v51  ;;  %v501_v51 = vld [vmem:[#allocation7 + $0x1f8] sm:$0xff] }
 0x248   :  { %4075 = vmatpush1.bf16.msra.mxu1 %v5156_v52  ;;  %3904 = vmatprep.subr.bf16.mxu0 %v5163_v60  ;;  %v5187_v52 = vcombine.high %v496_v37, %v500_v38  ;;  %v5189_v60 = vcombine.high %v497_v39, %v501_v51  ;;  %v5188_v18 = vcombine.low %v497_v39, %v501_v51  ;;  %v524_v37 = vld [vmem:[#allocation7 + $0x2b0] sm:$0xff]  ;;  %v521_v38 = vld [vmem:[#allocation7 + $0x298] sm:$0xff] }
 0x249   :  { %4076 = vmatprep.subr.bf16.mxu1 %v5165_v1  ;;  %v504_v1 = vld [vmem:[#allocation7 + $0x210] sm:$0xff] }
 0x24a   :  { %v5194_v19 = vcombine.low %v504_v1, %v508_v2 }
 0x24b   :  { %3905 = vmatpush1.bf16.msra.mxu0 %v5162_v16  ;;  %v509_v16 = vld [vmem:[#allocation7 + $0x238] sm:$0xff] }
 0x24c   :  { %4077 = vmatpush1.bf16.msra.mxu1 %v5164_v17  ;;  %3906 = vmatprep.subr.bf16.mxu0 %v5171_v20  ;;  %v5195_v17 = vcombine.high %v504_v1, %v508_v2  ;;  %v5197_v20 = vcombine.high %v505_v11, %v509_v16  ;;  %v5196_v32 = vcombine.low %v505_v11, %v509_v16  ;;  %v532_v1 = vld [vmem:[#allocation7 + $0x2f0] sm:$0xff]  ;;  %v529_v2 = vld [vmem:[#allocation7 + $0x2d8] sm:$0xff] }
 0x24d   :  { %4078 = vmatprep.subr.bf16.mxu1 %v5173_v21  ;;  %v512_v21 = vld [vmem:[#allocation7 + $0x250] sm:$0xff] }
 0x24e   :  { %v5202_v39 = vcombine.low %v512_v21, %v516_v25 }
 0x24f   :  { %3907 = vmatpush1.bf16.msra.mxu0 %v5170_v30  ;;  %v517_v30 = vld [vmem:[#allocation7 + $0x278] sm:$0xff] }
 0x250   :  { %4079 = vmatpush1.bf16.msra.mxu1 %v5172_v31  ;;  %3908 = vmatprep.subr.bf16.mxu0 %v5179_v33  ;;  %v5203_v31 = vcombine.high %v512_v21, %v516_v25  ;;  %v5205_v33 = vcombine.high %v513_v28, %v517_v30  ;;  %v5204_v51 = vcombine.low %v513_v28, %v517_v30  ;;  %v540_v21 = vld [vmem:[#allocation7 + $0x330] sm:$0xff]  ;;  %v537_v25 = vld [vmem:[#allocation7 + $0x318] sm:$0xff] }
 0x251   :  { %4080 = vmatprep.subr.bf16.mxu1 %v5181_v36  ;;  %v520_v36 = vld [vmem:[#allocation7 + $0x290] sm:$0xff] }
 0x252   :  { %v5210_v11 = vcombine.low %v520_v36, %v524_v37 }
 0x253   :  { %3909 = vmatpush1.bf16.msra.mxu0 %v5178_v54  ;;  %v525_v54 = vld [vmem:[#allocation7 + $0x2b8] sm:$0xff] }
 0x254   :  { %4081 = vmatpush1.bf16.msra.mxu1 %v5180_v40  ;;  %3910 = vmatprep.subr.bf16.mxu0 %v5187_v52  ;;  %v5211_v40 = vcombine.high %v520_v36, %v524_v37  ;;  %v5213_v52 = vcombine.high %v521_v38, %v525_v54  ;;  %v5212_v16 = vcombine.low %v521_v38, %v525_v54  ;;  %v548_v36 = vld [vmem:[#allocation7 + $0x370] sm:$0xff]  ;;  %v545_v37 = vld [vmem:[#allocation7 + $0x358] sm:$0xff] }
 0x255   :  { %4082 = vmatprep.subr.bf16.mxu1 %v5189_v60  ;;  %v528_v60 = vld [vmem:[#allocation7 + $0x2d0] sm:$0xff] }
 0x256   :  { %v5218_v28 = vcombine.low %v528_v60, %v532_v1 }
 0x257   :  { %3911 = vmatpush1.bf16.msra.mxu0 %v5186_v13  ;;  %v533_v13 = vld [vmem:[#allocation7 + $0x2f8] sm:$0xff] }
 0x258   :  { %4083 = vmatpush1.bf16.msra.mxu1 %v5188_v18  ;;  %3912 = vmatprep.subr.bf16.mxu0 %v5195_v17  ;;  %v5219_v18 = vcombine.high %v528_v60, %v532_v1  ;;  %v5221_v17 = vcombine.high %v529_v2, %v533_v13  ;;  %v5220_v30 = vcombine.low %v529_v2, %v533_v13  ;;  %v556_v60 = vld [vmem:[#allocation7 + $0x3b0] sm:$0xff]  ;;  %v553_v1 = vld [vmem:[#allocation7 + $0x398] sm:$0xff] }
 0x259   :  { %4084 = vmatprep.subr.bf16.mxu1 %v5197_v20  ;;  %v536_v20 = vld [vmem:[#allocation7 + $0x310] sm:$0xff] }
 0x25a   :  { %v5226_v38 = vcombine.low %v536_v20, %v540_v21 }
 0x25b   :  { %3913 = vmatpush1.bf16.msra.mxu0 %v5194_v19  ;;  %v541_v19 = vld [vmem:[#allocation7 + $0x338] sm:$0xff] }
 0x25c   :  { %4085 = vmatpush1.bf16.msra.mxu1 %v5196_v32  ;;  %3914 = vmatprep.subr.bf16.mxu0 %v5203_v31  ;;  %v5227_v32 = vcombine.high %v536_v20, %v540_v21  ;;  %v5229_v31 = vcombine.high %v537_v25, %v541_v19  ;;  %v5228_v54 = vcombine.low %v537_v25, %v541_v19  ;;  %v564_v20 = vld [vmem:[#allocation7 + $0x3f0] sm:$0xff]  ;;  %v561_v21 = vld [vmem:[#allocation7 + $0x3d8] sm:$0xff] }
 0x25d   :  { %4086 = vmatprep.subr.bf16.mxu1 %v5205_v33  ;;  %v544_v33 = vld [vmem:[#allocation7 + $0x350] sm:$0xff] }
 0x25e   :  { %v5234_v2 = vcombine.low %v544_v33, %v548_v36 }
 0x25f   :  { %3915 = vmatpush1.bf16.msra.mxu0 %v5202_v39  ;;  %v549_v39 = vld [vmem:[#allocation7 + $0x378] sm:$0xff] }
 0x260   :  { %4087 = vmatpush1.bf16.msra.mxu1 %v5204_v51  ;;  %3916 = vmatprep.subr.bf16.mxu0 %v5211_v40  ;;  %v5235_v51 = vcombine.high %v544_v33, %v548_v36  ;;  %v5237_v40 = vcombine.high %v545_v37, %v549_v39  ;;  %v5236_v13 = vcombine.low %v545_v37, %v549_v39  ;;  %v572_v33 = vld [vmem:[#allocation7 + $0x430] sm:$0xff]  ;;  %v569_v36 = vld [vmem:[#allocation7 + $0x418] sm:$0xff] }
 0x261   :  { %4088 = vmatprep.subr.bf16.mxu1 %v5213_v52  ;;  %v552_v52 = vld [vmem:[#allocation7 + $0x390] sm:$0xff] }
 0x262   :  { %v5242_v25 = vcombine.low %v552_v52, %v556_v60 }
 0x263   :  { %3917 = vmatpush1.bf16.msra.mxu0 %v5210_v11  ;;  %v557_v11 = vld [vmem:[#allocation7 + $0x3b8] sm:$0xff] }
 0x264   :  { %4089 = vmatpush1.bf16.msra.mxu1 %v5212_v16  ;;  %3918 = vmatprep.subr.bf16.mxu0 %v5219_v18  ;;  %v5243_v16 = vcombine.high %v552_v52, %v556_v60  ;;  %v5245_v18 = vcombine.high %v553_v1, %v557_v11  ;;  %v5244_v19 = vcombine.low %v553_v1, %v557_v11  ;;  %v580_v52 = vld [vmem:[#allocation7 + $0x470] sm:$0xff]  ;;  %v577_v1 = vld [vmem:[#allocation7 + $0x458] sm:$0xff] }
 0x265   :  { %4090 = vmatprep.subr.bf16.mxu1 %v5221_v17  ;;  %v560_v17 = vld [vmem:[#allocation7 + $0x3d0] sm:$0xff]  ;;  %v581_v11 = vld [vmem:[#allocation7 + $0x478] sm:$0xff] }
 0x266   :  { %v5250_v37 = vcombine.low %v560_v17, %v564_v20 }
 0x267   :  { %3919 = vmatpush1.bf16.msra.mxu0 %v5218_v28  ;;  %v565_v28 = vld [vmem:[#allocation7 + $0x3f8] sm:$0xff] }
 0x268   :  { %4091 = vmatpush1.bf16.msra.mxu1 %v5220_v30  ;;  %3920 = vmatprep.subr.bf16.mxu0 %v5227_v32  ;;  %v5251_v30 = vcombine.high %v560_v17, %v564_v20  ;;  %v5253_v32 = vcombine.high %v561_v21, %v565_v28  ;;  %v5252_v39 = vcombine.low %v561_v21, %v565_v28  ;;  %v585_v20 = vld [vmem:[#allocation7 + $0x498] sm:$0xff] }
 0x269   :  { %4092 = vmatprep.subr.bf16.mxu1 %v5229_v31  ;;  %v568_v31 = vld [vmem:[#allocation7 + $0x410] sm:$0xff]  ;;  %v5269_v17 = vcombine.high %v577_v1, %v581_v11  ;;  %v589_v21 = vld [vmem:[#allocation7 + $0x4b8] sm:$0xff] }
 0x26a   :  { %v5258_v60 = vcombine.low %v568_v31, %v572_v33 }
 0x26b   :  { %3921 = vmatpush1.bf16.msra.mxu0 %v5226_v38  ;;  %v573_v38 = vld [vmem:[#allocation7 + $0x438] sm:$0xff] }
 0x26c   :  { %4093 = vmatpush1.bf16.msra.mxu1 %v5228_v54  ;;  %3922 = vmatprep.subr.bf16.mxu0 %v5235_v51  ;;  %v5259_v54 = vcombine.high %v568_v31, %v572_v33  ;;  %v5261_v51 = vcombine.high %v569_v36, %v573_v38  ;;  %v596_v31 = vld [vmem:[#allocation7 + $0x4f0] sm:$0xff]  ;;  %v593_v33 = vld [vmem:[#allocation7 + $0x4d8] sm:$0xff] }
 0x26d   :  { %4094 = vmatprep.subr.bf16.mxu1 %v5237_v40  ;;  %v576_v40 = vld [vmem:[#allocation7 + $0x450] sm:$0xff] }
 0x26e   :  { %v5266_v28 = vcombine.low %v576_v40, %v580_v52 }
 0x26f   :  { %3923 = vmatpush1.bf16.msra.mxu0 %v5234_v2  ;;  %v5260_v2 = vcombine.low %v569_v36, %v573_v38  ;;  %v597_v36 = vld [vmem:[#allocation7 + $0x4f8] sm:$0xff] }
 0x270   :  { %4095 = vmatpush1.bf16.msra.mxu1 %v5236_v13  ;;  %3924 = vmatprep.subr.bf16.mxu0 %v5243_v16  ;;  %v5267_v13 = vcombine.high %v576_v40, %v580_v52  ;;  %v584_v16 = vld [vmem:[#allocation7 + $0x490] sm:$0xff]  ;;  %v601_v40 = vld [vmem:[#allocation7 + $0x518] sm:$0xff] }
 0x271   :  { %4096 = vmatprep.subr.bf16.mxu1 %v5245_v18  ;;  %v588_v18 = vld [vmem:[#allocation7 + $0x4b0] sm:$0xff]  ;;  %v605_v52 = vld [vmem:[#allocation7 + $0x538] sm:$0xff] }
 0x272   :  { %v5274_v38 = vcombine.low %v584_v16, %v588_v18 }
 0x273   :  { %3925 = vmatpush1.bf16.msra.mxu0 %v5242_v25  ;;  %v5268_v25 = vcombine.low %v577_v1, %v581_v11  ;;  %v5293_v11 = vcombine.high %v601_v40, %v605_v52 }
 0x274   :  { %4097 = vmatpush1.bf16.msra.mxu1 %v5244_v19  ;;  %3926 = vmatprep.subr.bf16.mxu0 %v5251_v30  ;;  %v5275_v19 = vcombine.high %v584_v16, %v588_v18  ;;  %v5277_v30 = vcombine.high %v585_v20, %v589_v21  ;;  %v609_v16 = vld [vmem:[#allocation7 + $0x558] sm:$0xff] }
 0x275   :  { %4098 = vmatprep.subr.bf16.mxu1 %v5253_v32  ;;  %v592_v32 = vld [vmem:[#allocation7 + $0x4d0] sm:$0xff]  ;;  %v613_v18 = vld [vmem:[#allocation7 + $0x578] sm:$0xff] }
 0x277   :  { %3927 = vmatpush1.bf16.msra.mxu0 %v5250_v37  ;;  %v5283_v37 = vcombine.high %v592_v32, %v596_v31 }
 0x278   :  { %4099 = vmatpush1.bf16.msra.mxu1 %v5252_v39  ;;  %3939 = vmatprep.subr.bf16.mxu0 %v5259_v54  ;;  %v5285_v39 = vcombine.high %v593_v33, %v597_v36  ;;  %v600_v54 = vld [vmem:[#allocation7 + $0x510] sm:$0xff] }
 0x279   :  { %4111 = vmatprep.subr.bf16.mxu1 %v5261_v51  ;;  %v604_v51 = vld [vmem:[#allocation7 + $0x530] sm:$0xff] }
 0x27a   :  { %3929 = vmatmul.mubr.bf16.vlgmr.msra.gmra.mrb[4].mxu0 %v6427_v55  ;;  %v5291_v1 = vcombine.high %v600_v54, %v604_v51 }
 0x27b   :  { %4101 = vmatmul.mubr.bf16.vlgmr.msra.gmra.mrb[20].mxu1 %v6427_v55  ;;  %3940 = vmatpush1.bf16.msra.mxu0 %v5258_v60  ;;  %v5276_v55 = vcombine.low %v585_v20, %v589_v21  ;;  %v5284_v60 = vcombine.low %v593_v33, %v597_v36  ;;  %v5292_v20 = vcombine.low %v601_v40, %v605_v52 }
 0x27c   :  { %3971 = vmatprep.mubr.bf16.mxu0 %v6447_v14  ;;  %4112 = vmatpush1.bf16.msra.mxu1 %v5260_v2  ;;  %v608_v2 = vld [vmem:[#allocation7 + $0x550] sm:$0xff]  ;;  %v5300_v33 = vcombine.low %v609_v16, %v613_v18 }
 0x27d   :  { %4143 = vmatprep.mubr.bf16.mxu1 %v6447_v14  ;;  %3941 = vmatprep.subr.bf16.mxu0 %v5267_v13  ;;  %v5282_v14 = vcombine.low %v592_v32, %v596_v31  ;;  %v612_v13 = vld [vmem:[#allocation7 + $0x570] sm:$0xff]  ;;  %v621_v32 = vld [vmem:[#allocation7 + $0x5b8] sm:$0xff] }
 0x27e   :  { %4113 = vmatprep.subr.bf16.mxu1 %v5269_v17  ;;  %v5290_v17 = vcombine.low %v600_v54, %v604_v51  ;;  %v5299_v21 = vcombine.high %v608_v2, %v612_v13  ;;  %v5298_v31 = vcombine.low %v608_v2, %v612_v13  ;;  %v629_v54 = vld [vmem:[#allocation7 + $0x5f8] sm:$0xff] }
 0x27f   :  { %3942 = vmatpush1.bf16.msra.mxu0 %v5266_v28  ;;  %v5301_v28 = vcombine.high %v609_v16, %v613_v18  ;;  %v637_v2 = vld [vmem:[#allocation7 + $0x638] sm:$0xff] }
 0x280   :  { %4114 = vmatpush1.bf16.msra.mxu1 %v5268_v25  ;;  %3943 = vmatprep.subr.bf16.mxu0 %v5275_v19  ;;  %v616_v25 = vld [vmem:[#allocation7 + $0x590] sm:$0xff] }
 0x281   :  { %4115 = vmatprep.subr.bf16.mxu1 %v5277_v30  ;;  %v620_v19 = vld [vmem:[#allocation7 + $0x5b0] sm:$0xff]  ;;  %v617_v30 = vld [vmem:[#allocation7 + $0x598] sm:$0xff] }
 0x282   :  { %v5307_v36 = vcombine.high %v616_v25, %v620_v19  ;;  %v5306_v51 = vcombine.low %v616_v25, %v620_v19  ;;  %v5308_v40 = vcombine.low %v617_v30, %v621_v32  ;;  %v645_v25 = vld [vmem:[#allocation7 + $0x678] sm:$0xff] }
 0x283   :  { %3944 = vmatpush1.bf16.msra.mxu0 %v5274_v38  ;;  %v5309_v38 = vcombine.high %v617_v30, %v621_v32 }
 0x284   :  { %4116 = vmatpush1.bf16.msra.mxu1 %v5276_v55  ;;  %3945 = vmatprep.subr.bf16.mxu0 %v5283_v37  ;;  %v624_v55 = vld [vmem:[#allocation7 + $0x5d0] sm:$0xff] }
 0x285   :  { %4117 = vmatprep.subr.bf16.mxu1 %v5285_v39  ;;  %v628_v37 = vld [vmem:[#allocation7 + $0x5f0] sm:$0xff]  ;;  %v625_v39 = vld [vmem:[#allocation7 + $0x5d8] sm:$0xff] }
 0x286   :  { %v5315_v52 = vcombine.high %v624_v55, %v628_v37  ;;  %v5314_v13 = vcombine.low %v624_v55, %v628_v37  ;;  %v5316_v16 = vcombine.low %v625_v39, %v629_v54  ;;  %v653_v55 = vld [vmem:[#allocation7 + $0x6b8] sm:$0xff] }
 0x287   :  { %3946 = vmatpush1.bf16.msra.mxu0 %v5282_v14  ;;  %v5317_v14 = vcombine.high %v625_v39, %v629_v54 }
 0x288   :  { %4118 = vmatpush1.bf16.msra.mxu1 %v5284_v60  ;;  %3947 = vmatprep.subr.bf16.mxu0 %v5291_v1  ;;  %v632_v60 = vld [vmem:[#allocation7 + $0x610] sm:$0xff] }
 0x289   :  { %4119 = vmatprep.subr.bf16.mxu1 %v5293_v11  ;;  %v636_v1 = vld [vmem:[#allocation7 + $0x630] sm:$0xff]  ;;  %v633_v11 = vld [vmem:[#allocation7 + $0x618] sm:$0xff] }
 0x28a   :  { %v5323_v18 = vcombine.high %v632_v60, %v636_v1  ;;  %v5322_v19 = vcombine.low %v632_v60, %v636_v1  ;;  %v5324_v30 = vcombine.low %v633_v11, %v637_v2  ;;  %v661_v60 = vld [vmem:[#allocation7 + $0x6f8] sm:$0xff] }
 0x28b   :  { %3948 = vmatpush1.bf16.msra.mxu0 %v5290_v17  ;;  %v5325_v17 = vcombine.high %v633_v11, %v637_v2 }
 0x28c   :  { %4120 = vmatpush1.bf16.msra.mxu1 %v5292_v20  ;;  %3949 = vmatprep.subr.bf16.mxu0 %v5299_v21  ;;  %v640_v20 = vld [vmem:[#allocation7 + $0x650] sm:$0xff] }
 0x28d   :  { %4121 = vmatprep.subr.bf16.mxu1 %v5301_v28  ;;  %v644_v21 = vld [vmem:[#allocation7 + $0x670] sm:$0xff]  ;;  %v641_v28 = vld [vmem:[#allocation7 + $0x658] sm:$0xff] }
 0x28e   :  { %v5331_v32 = vcombine.high %v640_v20, %v644_v21  ;;  %v5330_v37 = vcombine.low %v640_v20, %v644_v21  ;;  %v5332_v39 = vcombine.low %v641_v28, %v645_v25  ;;  %v669_v20 = vld [vmem:[#allocation7 + $0x738] sm:$0xff] }
 0x28f   :  { %3950 = vmatpush1.bf16.msra.mxu0 %v5298_v31  ;;  %v5333_v31 = vcombine.high %v641_v28, %v645_v25 }
 0x290   :  { %4122 = vmatpush1.bf16.msra.mxu1 %v5300_v33  ;;  %3951 = vmatprep.subr.bf16.mxu0 %v5307_v36  ;;  %v648_v33 = vld [vmem:[#allocation7 + $0x690] sm:$0xff] }
 0x291   :  { %4123 = vmatprep.subr.bf16.mxu1 %v5309_v38  ;;  %v652_v36 = vld [vmem:[#allocation7 + $0x6b0] sm:$0xff]  ;;  %v649_v38 = vld [vmem:[#allocation7 + $0x698] sm:$0xff] }
 0x292   :  { %v5339_v54 = vcombine.high %v648_v33, %v652_v36  ;;  %v5338_v1 = vcombine.low %v648_v33, %v652_v36  ;;  %v5340_v11 = vcombine.low %v649_v38, %v653_v55  ;;  %v677_v33 = vld [vmem:[#allocation7 + $0x778] sm:$0xff] }
 0x293   :  { %3952 = vmatpush1.bf16.msra.mxu0 %v5306_v51  ;;  %v5341_v51 = vcombine.high %v649_v38, %v653_v55 }
 0x294   :  { %4124 = vmatpush1.bf16.msra.mxu1 %v5308_v40  ;;  %3953 = vmatprep.subr.bf16.mxu0 %v5315_v52  ;;  %v656_v40 = vld [vmem:[#allocation7 + $0x6d0] sm:$0xff] }
 0x295   :  { %4125 = vmatprep.subr.bf16.mxu1 %v5317_v14  ;;  %v660_v52 = vld [vmem:[#allocation7 + $0x6f0] sm:$0xff]  ;;  %v657_v14 = vld [vmem:[#allocation7 + $0x6d8] sm:$0xff] }
 0x296   :  { %v5347_v2 = vcombine.high %v656_v40, %v660_v52  ;;  %v5346_v21 = vcombine.low %v656_v40, %v660_v52  ;;  %v5348_v28 = vcombine.low %v657_v14, %v661_v60  ;;  %v685_v40 = vld [vmem:[#allocation7 + $0x7b8] sm:$0xff] }
 0x297   :  { %3954 = vmatpush1.bf16.msra.mxu0 %v5314_v13  ;;  %v5349_v13 = vcombine.high %v657_v14, %v661_v60 }
 0x298   :  { %4126 = vmatpush1.bf16.msra.mxu1 %v5316_v16  ;;  %3955 = vmatprep.subr.bf16.mxu0 %v5323_v18  ;;  %v664_v16 = vld [vmem:[#allocation7 + $0x710] sm:$0xff] }
 0x299   :  { %4127 = vmatprep.subr.bf16.mxu1 %v5325_v17  ;;  %v668_v18 = vld [vmem:[#allocation7 + $0x730] sm:$0xff]  ;;  %v665_v17 = vld [vmem:[#allocation7 + $0x718] sm:$0xff] }
 0x29a   :  { %v5355_v25 = vcombine.high %v664_v16, %v668_v18  ;;  %v5354_v36 = vcombine.low %v664_v16, %v668_v18  ;;  %v5356_v38 = vcombine.low %v665_v17, %v669_v20  ;;  %v693_v16 = vld [vmem:[#allocation7 + $0x7f8] sm:$0xff] }
 0x29b   :  { %3956 = vmatpush1.bf16.msra.mxu0 %v5322_v19  ;;  %v5357_v19 = vcombine.high %v665_v17, %v669_v20 }
 0x29c   :  { %4128 = vmatpush1.bf16.msra.mxu1 %v5324_v30  ;;  %3957 = vmatprep.subr.bf16.mxu0 %v5331_v32  ;;  %v672_v30 = vld [vmem:[#allocation7 + $0x750] sm:$0xff] }
 0x29d   :  { %4129 = vmatprep.subr.bf16.mxu1 %v5333_v31  ;;  %v676_v32 = vld [vmem:[#allocation7 + $0x770] sm:$0xff]  ;;  %v673_v31 = vld [vmem:[#allocation7 + $0x758] sm:$0xff] }
 0x29e   :  { %v5363_v55 = vcombine.high %v672_v30, %v676_v32  ;;  %v5362_v52 = vcombine.low %v672_v30, %v676_v32  ;;  %v5364_v14 = vcombine.low %v673_v31, %v677_v33  ;;  %v701_v30 = vld [vmem:[#allocation7 + $0x838] sm:$0xff] }
 0x29f   :  { %3958 = vmatpush1.bf16.msra.mxu0 %v5330_v37  ;;  %v5365_v37 = vcombine.high %v673_v31, %v677_v33 }
 0x2a0   :  { %4130 = vmatpush1.bf16.msra.mxu1 %v5332_v39  ;;  %3959 = vmatprep.subr.bf16.mxu0 %v5339_v54  ;;  %v680_v39 = vld [vmem:[#allocation7 + $0x790] sm:$0xff] }
 0x2a1   :  { %4131 = vmatprep.subr.bf16.mxu1 %v5341_v51  ;;  %v684_v54 = vld [vmem:[#allocation7 + $0x7b0] sm:$0xff]  ;;  %v681_v51 = vld [vmem:[#allocation7 + $0x798] sm:$0xff] }
 0x2a2   :  { %v5371_v60 = vcombine.high %v680_v39, %v684_v54  ;;  %v5370_v18 = vcombine.low %v680_v39, %v684_v54  ;;  %v5372_v17 = vcombine.low %v681_v51, %v685_v40  ;;  %v705_v39 = vld [vmem:[#allocation7 + $0x858] sm:$0xff] }
 0x2a3   :  { %3960 = vmatpush1.bf16.msra.mxu0 %v5338_v1  ;;  %v5373_v1 = vcombine.high %v681_v51, %v685_v40  ;;  %v709_v54 = vld [vmem:[#allocation7 + $0x878] sm:$0xff] }
 0x2a4   :  { %4132 = vmatpush1.bf16.msra.mxu1 %v5340_v11  ;;  %3961 = vmatprep.subr.bf16.mxu0 %v5347_v2  ;;  %v688_v11 = vld [vmem:[#allocation7 + $0x7d0] sm:$0xff] }
 0x2a5   :  { %4133 = vmatprep.subr.bf16.mxu1 %v5349_v13  ;;  %v692_v2 = vld [vmem:[#allocation7 + $0x7f0] sm:$0xff]  ;;  %v689_v13 = vld [vmem:[#allocation7 + $0x7d8] sm:$0xff] }
 0x2a6   :  { %v5379_v20 = vcombine.high %v688_v11, %v692_v2  ;;  %v5378_v32 = vcombine.low %v688_v11, %v692_v2  ;;  %v5380_v31 = vcombine.low %v689_v13, %v693_v16  ;;  %v717_v11 = vld [vmem:[#allocation7 + $0x8b8] sm:$0xff] }
 0x2a7   :  { %3962 = vmatpush1.bf16.msra.mxu0 %v5346_v21  ;;  %v5381_v21 = vcombine.high %v689_v13, %v693_v16  ;;  %v5396_v13 = vcombine.low %v705_v39, %v709_v54 }
 0x2a8   :  { %4134 = vmatpush1.bf16.msra.mxu1 %v5348_v28  ;;  %3963 = vmatprep.subr.bf16.mxu0 %v5355_v25  ;;  %v696_v28 = vld [vmem:[#allocation7 + $0x810] sm:$0xff] }
 0x2a9   :  { %4135 = vmatprep.subr.bf16.mxu1 %v5357_v19  ;;  %v700_v25 = vld [vmem:[#allocation7 + $0x830] sm:$0xff]  ;;  %v697_v19 = vld [vmem:[#allocation7 + $0x818] sm:$0xff] }
 0x2aa   :  { %v5387_v33 = vcombine.high %v696_v28, %v700_v25  ;;  %v5388_v51 = vcombine.low %v697_v19, %v701_v30 }
 0x2ab   :  { %3964 = vmatpush1.bf16.msra.mxu0 %v5354_v36  ;;  %v5389_v36 = vcombine.high %v697_v19, %v701_v30 }
 0x2ac   :  { %4136 = vmatpush1.bf16.msra.mxu1 %v5356_v38  ;;  %3965 = vmatprep.subr.bf16.mxu0 %v5363_v55  ;;  %v704_v38 = vld [vmem:[#allocation7 + $0x850] sm:$0xff] }
 0x2ad   :  { %4137 = vmatprep.subr.bf16.mxu1 %v5365_v37  ;;  %v708_v55 = vld [vmem:[#allocation7 + $0x870] sm:$0xff]  ;;  %v5386_v37 = vcombine.low %v696_v28, %v700_v25  ;;  %v725_v28 = vld [vmem:[#allocation7 + $0x8f8] sm:$0xff] }
 0x2ae   :  { %v5395_v40 = vcombine.high %v704_v38, %v708_v55  ;;  %v5394_v2 = vcombine.low %v704_v38, %v708_v55 }
 0x2af   :  { %3966 = vmatpush1.bf16.msra.mxu0 %v5362_v52  ;;  %v712_v52 = vld [vmem:[#allocation7 + $0x890] sm:$0xff] }
 0x2b0   :  { %4138 = vmatpush1.bf16.msra.mxu1 %v5364_v14  ;;  %3967 = vmatprep.subr.bf16.mxu0 %v5371_v60  ;;  %v716_v14 = vld [vmem:[#allocation7 + $0x8b0] sm:$0xff]  ;;  %v5397_v60 = vcombine.high %v705_v39, %v709_v54 }
 0x2b1   :  { %4139 = vmatprep.subr.bf16.mxu1 %v5373_v1  ;;  %v713_v1 = vld [vmem:[#allocation7 + $0x898] sm:$0xff]  ;;  %v5403_v16 = vcombine.high %v712_v52, %v716_v14  ;;  %v5402_v25 = vcombine.low %v712_v52, %v716_v14  ;;  %v736_v39 = vld [vmem:[#allocation7 + $0x950] sm:$0xff] }
 0x2b2   :  { %v740_v54 = vld [vmem:[#allocation7 + $0x970] sm:$0xff] }
 0x2b3   :  { %3968 = vmatpush1.bf16.msra.mxu0 %v5370_v18  ;;  %v5405_v18 = vcombine.high %v713_v1, %v717_v11 }
 0x2b4   :  { %4140 = vmatpush1.bf16.msra.mxu1 %v5372_v17  ;;  %3969 = vmatprep.subr.bf16.mxu0 %v5379_v20  ;;  %v720_v17 = vld [vmem:[#allocation7 + $0x8d0] sm:$0xff] }
 0x2b5   :  { %4141 = vmatprep.subr.bf16.mxu1 %v5381_v21  ;;  %v724_v20 = vld [vmem:[#allocation7 + $0x8f0] sm:$0xff]  ;;  %v721_v21 = vld [vmem:[#allocation7 + $0x8d8] sm:$0xff] }
 0x2b6   :  { %v5411_v19 = vcombine.high %v720_v17, %v724_v20  ;;  %v5413_v30 = vcombine.high %v721_v21, %v725_v28  ;;  %v5412_v38 = vcombine.low %v721_v21, %v725_v28  ;;  %v752_v28 = vld [vmem:[#allocation7 + $0x9d0] sm:$0xff] }
 0x2b7   :  { %3970 = vmatpush1.bf16.msra.mxu0 %v5378_v32  ;;  %v728_v32 = vld [vmem:[#allocation7 + $0x910] sm:$0xff] }
 0x2b8   :  { %4142 = vmatpush1.bf16.msra.mxu1 %v5380_v31  ;;  %3982 = vmatprep.subr.bf16.mxu0 %v5387_v33  ;;  %v732_v31 = vld [vmem:[#allocation7 + $0x930] sm:$0xff]  ;;  %v729_v33 = vld [vmem:[#allocation7 + $0x918] sm:$0xff] }
 0x2b9   :  { %4154 = vmatprep.subr.bf16.mxu1 %v5389_v36  ;;  %v733_v36 = vld [vmem:[#allocation7 + $0x938] sm:$0xff]  ;;  %v5419_v55 = vcombine.high %v728_v32, %v732_v31  ;;  %v5418_v52 = vcombine.low %v728_v32, %v732_v31 }
 0x2ba   :  { %3972 = vmatmul.mubr.bf16.vlgmr.msra.gmra.mrb[4].mxu0 %v6475_v0  ;;  %v5420_v14 = vcombine.low %v729_v33, %v733_v36 }
 0x2bb   :  { %4144 = vmatmul.mubr.bf16.vlgmr.msra.gmra.mrb[20].mxu1 %v6475_v0  ;;  %3983 = vmatpush1.bf16.msra.mxu0 %v5386_v37  ;;  %v5404_v0 = vcombine.low %v713_v1, %v717_v11  ;;  %v5421_v37 = vcombine.high %v729_v33, %v733_v36  ;;  %v744_v11 = vld [vmem:[#allocation7 + $0x990] sm:$0xff] }
 0x2bc   :  { %4014 = vmatprep.mubr.bf16.mxu0 %v6481_v24  ;;  %4155 = vmatpush1.bf16.msra.mxu1 %v5388_v51  ;;  %v737_v51 = vld [vmem:[#allocation7 + $0x958] sm:$0xff]  ;;  %v760_v36 = vld [vmem:[#allocation7 + $0xa10] sm:$0xff] }
 0x2bd   :  { %4186 = vmatprep.mubr.bf16.mxu1 %v6481_v24  ;;  %3984 = vmatprep.subr.bf16.mxu0 %v5395_v40  ;;  %v5410_v24 = vcombine.low %v720_v17, %v724_v20  ;;  %v741_v40 = vld [vmem:[#allocation7 + $0x978] sm:$0xff] }
 0x2be   :  { %4156 = vmatprep.subr.bf16.mxu1 %v5397_v60  ;;  %v5427_v60 = vcombine.high %v736_v39, %v740_v54  ;;  %v5429_v1 = vcombine.high %v737_v51, %v741_v40  ;;  %v5428_v17 = vcombine.low %v737_v51, %v741_v40  ;;  %v768_v40 = vld [vmem:[#allocation7 + $0xa50] sm:$0xff] }
 0x2bf   :  { %3985 = vmatpush1.bf16.msra.mxu0 %v5394_v2  ;;  %v748_v2 = vld [vmem:[#allocation7 + $0x9b0] sm:$0xff] }
 0x2c0   :  { %4157 = vmatpush1.bf16.msra.mxu1 %v5396_v13  ;;  %3986 = vmatprep.subr.bf16.mxu0 %v5403_v16  ;;  %v745_v13 = vld [vmem:[#allocation7 + $0x998] sm:$0xff]  ;;  %v5435_v20 = vcombine.high %v744_v11, %v748_v2 }
 0x2c1   :  { %4158 = vmatprep.subr.bf16.mxu1 %v5405_v18  ;;  %v749_v16 = vld [vmem:[#allocation7 + $0x9b8] sm:$0xff]  ;;  %v5426_v18 = vcombine.low %v736_v39, %v740_v54 }
 0x2c2   :  { %v5437_v21 = vcombine.high %v745_v13, %v749_v16  ;;  %v5436_v32 = vcombine.low %v745_v13, %v749_v16  ;;  %v776_v16 = vld [vmem:[#allocation7 + $0xa90] sm:$0xff] }
 0x2c3   :  { %3987 = vmatpush1.bf16.msra.mxu0 %v5402_v25  ;;  %v756_v25 = vld [vmem:[#allocation7 + $0x9f0] sm:$0xff] }
 0x2c4   :  { %4159 = vmatpush1.bf16.msra.mxu1 %v5404_v0  ;;  %3988 = vmatprep.subr.bf16.mxu0 %v5411_v19  ;;  %v753_v0 = vld [vmem:[#allocation7 + $0x9d8] sm:$0xff]  ;;  %v5443_v31 = vcombine.high %v752_v28, %v756_v25 }
 0x2c5   :  { %4160 = vmatprep.subr.bf16.mxu1 %v5413_v30  ;;  %v757_v19 = vld [vmem:[#allocation7 + $0x9f8] sm:$0xff]  ;;  %v5434_v30 = vcombine.low %v744_v11, %v748_v2 }
 0x2c6   :  { %v5445_v33 = vcombine.high %v753_v0, %v757_v19  ;;  %v5444_v39 = vcombine.low %v753_v0, %v757_v19  ;;  %v784_v19 = vld [vmem:[#allocation7 + $0xad0] sm:$0xff] }
 0x2c7   :  { %3989 = vmatpush1.bf16.msra.mxu0 %v5410_v24  ;;  %v764_v24 = vld [vmem:[#allocation7 + $0xa30] sm:$0xff] }
 0x2c8   :  { %4161 = vmatpush1.bf16.msra.mxu1 %v5412_v38  ;;  %3990 = vmatprep.subr.bf16.mxu0 %v5419_v55  ;;  %v761_v38 = vld [vmem:[#allocation7 + $0xa18] sm:$0xff]  ;;  %v5451_v54 = vcombine.high %v760_v36, %v764_v24 }
 0x2c9   :  { %4162 = vmatprep.subr.bf16.mxu1 %v5421_v37  ;;  %v765_v55 = vld [vmem:[#allocation7 + $0xa38] sm:$0xff]  ;;  %v5442_v37 = vcombine.low %v752_v28, %v756_v25 }
 0x2ca   :  { %v5453_v51 = vcombine.high %v761_v38, %v765_v55  ;;  %v5452_v11 = vcombine.low %v761_v38, %v765_v55  ;;  %v792_v55 = vld [vmem:[#allocation7 + $0xb10] sm:$0xff] }
 0x2cb   :  { %3991 = vmatpush1.bf16.msra.mxu0 %v5418_v52  ;;  %v772_v52 = vld [vmem:[#allocation7 + $0xa70] sm:$0xff] }
 0x2cc   :  { %4163 = vmatpush1.bf16.msra.mxu1 %v5420_v14  ;;  %3992 = vmatprep.subr.bf16.mxu0 %v5427_v60  ;;  %v769_v14 = vld [vmem:[#allocation7 + $0xa58] sm:$0xff]  ;;  %v5459_v2 = vcombine.high %v768_v40, %v772_v52 }
 0x2cd   :  { %4164 = vmatprep.subr.bf16.mxu1 %v5429_v1  ;;  %v773_v60 = vld [vmem:[#allocation7 + $0xa78] sm:$0xff]  ;;  %v5450_v1 = vcombine.low %v760_v36, %v764_v24 }
 0x2ce   :  { %v5461_v13 = vcombine.high %v769_v14, %v773_v60  ;;  %v5460_v28 = vcombine.low %v769_v14, %v773_v60  ;;  %v800_v60 = vld [vmem:[#allocation7 + $0xb50] sm:$0xff] }
 0x2cf   :  { %3993 = vmatpush1.bf16.msra.mxu0 %v5426_v18  ;;  %v780_v18 = vld [vmem:[#allocation7 + $0xab0] sm:$0xff] }
 0x2d0   :  { %4165 = vmatpush1.bf16.msra.mxu1 %v5428_v17  ;;  %3994 = vmatprep.subr.bf16.mxu0 %v5435_v20  ;;  %v777_v17 = vld [vmem:[#allocation7 + $0xa98] sm:$0xff]  ;;  %v5467_v25 = vcombine.high %v776_v16, %v780_v18 }
 0x2d1   :  { %4166 = vmatprep.subr.bf16.mxu1 %v5437_v21  ;;  %v781_v20 = vld [vmem:[#allocation7 + $0xab8] sm:$0xff]  ;;  %v5458_v21 = vcombine.low %v768_v40, %v772_v52 }
 0x2d2   :  { %v5469_v0 = vcombine.high %v777_v17, %v781_v20  ;;  %v5468_v36 = vcombine.low %v777_v17, %v781_v20  ;;  %v808_v20 = vld [vmem:[#allocation7 + $0xb90] sm:$0xff] }
 0x2d3   :  { %3995 = vmatpush1.bf16.msra.mxu0 %v5434_v30  ;;  %v788_v30 = vld [vmem:[#allocation7 + $0xaf0] sm:$0xff] }
 0x2d4   :  { %4167 = vmatpush1.bf16.msra.mxu1 %v5436_v32  ;;  %3996 = vmatprep.subr.bf16.mxu0 %v5443_v31  ;;  %v785_v32 = vld [vmem:[#allocation7 + $0xad8] sm:$0xff]  ;;  %v5475_v24 = vcombine.high %v784_v19, %v788_v30 }
 0x2d5   :  { %4168 = vmatprep.subr.bf16.mxu1 %v5445_v33  ;;  %v789_v31 = vld [vmem:[#allocation7 + $0xaf8] sm:$0xff]  ;;  %v5466_v33 = vcombine.low %v776_v16, %v780_v18 }
 0x2d6   :  { %v5477_v38 = vcombine.high %v785_v32, %v789_v31  ;;  %v5476_v40 = vcombine.low %v785_v32, %v789_v31  ;;  %v816_v31 = vld [vmem:[#allocation7 + $0xbd0] sm:$0xff] }
 0x2d7   :  { %3997 = vmatpush1.bf16.msra.mxu0 %v5442_v37  ;;  %v796_v37 = vld [vmem:[#allocation7 + $0xb30] sm:$0xff] }
 0x2d8   :  { %4169 = vmatpush1.bf16.msra.mxu1 %v5444_v39  ;;  %3998 = vmatprep.subr.bf16.mxu0 %v5451_v54  ;;  %v793_v39 = vld [vmem:[#allocation7 + $0xb18] sm:$0xff]  ;;  %v5483_v52 = vcombine.high %v792_v55, %v796_v37 }
 0x2d9   :  { %4170 = vmatprep.subr.bf16.mxu1 %v5453_v51  ;;  %v797_v54 = vld [vmem:[#allocation7 + $0xb38] sm:$0xff]  ;;  %v5474_v51 = vcombine.low %v784_v19, %v788_v30 }
 0x2da   :  { %v5485_v14 = vcombine.high %v793_v39, %v797_v54  ;;  %v5484_v16 = vcombine.low %v793_v39, %v797_v54  ;;  %v824_v54 = vld [vmem:[#allocation7 + $0xc10] sm:$0xff] }
 0x2db   :  { %3999 = vmatpush1.bf16.msra.mxu0 %v5450_v1  ;;  %v804_v1 = vld [vmem:[#allocation7 + $0xb70] sm:$0xff] }
 0x2dc   :  { %4171 = vmatpush1.bf16.msra.mxu1 %v5452_v11  ;;  %4000 = vmatprep.subr.bf16.mxu0 %v5459_v2  ;;  %v801_v11 = vld [vmem:[#allocation7 + $0xb58] sm:$0xff]  ;;  %v5491_v18 = vcombine.high %v800_v60, %v804_v1 }
 0x2dd   :  { %4172 = vmatprep.subr.bf16.mxu1 %v5461_v13  ;;  %v805_v2 = vld [vmem:[#allocation7 + $0xb78] sm:$0xff]  ;;  %v5482_v13 = vcombine.low %v792_v55, %v796_v37 }
 0x2de   :  { %v5493_v17 = vcombine.high %v801_v11, %v805_v2  ;;  %v5492_v19 = vcombine.low %v801_v11, %v805_v2  ;;  %v832_v2 = vld [vmem:[#allocation7 + $0xc50] sm:$0xff] }
 0x2df   :  { %4001 = vmatpush1.bf16.msra.mxu0 %v5458_v21  ;;  %v812_v21 = vld [vmem:[#allocation7 + $0xbb0] sm:$0xff] }
 0x2e0   :  { %4173 = vmatpush1.bf16.msra.mxu1 %v5460_v28  ;;  %4002 = vmatprep.subr.bf16.mxu0 %v5467_v25  ;;  %v809_v28 = vld [vmem:[#allocation7 + $0xb98] sm:$0xff]  ;;  %v5499_v30 = vcombine.high %v808_v20, %v812_v21 }
 0x2e1   :  { %4174 = vmatprep.subr.bf16.mxu1 %v5469_v0  ;;  %v813_v25 = vld [vmem:[#allocation7 + $0xbb8] sm:$0xff]  ;;  %v5490_v0 = vcombine.low %v800_v60, %v804_v1 }
 0x2e2   :  { %v5501_v32 = vcombine.high %v809_v28, %v813_v25  ;;  %v5500_v55 = vcombine.low %v809_v28, %v813_v25  ;;  %v840_v28 = vld [vmem:[#allocation7 + $0xc90] sm:$0xff] }
 0x2e3   :  { %4003 = vmatpush1.bf16.msra.mxu0 %v5466_v33  ;;  %v820_v33 = vld [vmem:[#allocation7 + $0xbf0] sm:$0xff] }
 0x2e4   :  { %4175 = vmatpush1.bf16.msra.mxu1 %v5468_v36  ;;  %4004 = vmatprep.subr.bf16.mxu0 %v5475_v24  ;;  %v817_v36 = vld [vmem:[#allocation7 + $0xbd8] sm:$0xff]  ;;  %v5507_v37 = vcombine.high %v816_v31, %v820_v33  ;;  %v844_v25 = vld [vmem:[#allocation7 + $0xcb0] sm:$0xff] }
 0x2e5   :  { %4176 = vmatprep.subr.bf16.mxu1 %v5477_v38  ;;  %v821_v24 = vld [vmem:[#allocation7 + $0xbf8] sm:$0xff]  ;;  %v5498_v38 = vcombine.low %v808_v20, %v812_v21 }
 0x2e6   :  { %v5509_v39 = vcombine.high %v817_v36, %v821_v24  ;;  %v5508_v60 = vcombine.low %v817_v36, %v821_v24  ;;  %v848_v24 = vld [vmem:[#allocation7 + $0xcd0] sm:$0xff] }
 0x2e7   :  { %4005 = vmatpush1.bf16.msra.mxu0 %v5474_v51  ;;  %v828_v51 = vld [vmem:[#allocation7 + $0xc30] sm:$0xff] }
 0x2e8   :  { %4177 = vmatpush1.bf16.msra.mxu1 %v5476_v40  ;;  %4006 = vmatprep.subr.bf16.mxu0 %v5483_v52  ;;  %v825_v40 = vld [vmem:[#allocation7 + $0xc18] sm:$0xff]  ;;  %v5515_v1 = vcombine.high %v824_v54, %v828_v51 }
 0x2e9   :  { %4178 = vmatprep.subr.bf16.mxu1 %v5485_v14  ;;  %v829_v52 = vld [vmem:[#allocation7 + $0xc38] sm:$0xff]  ;;  %v5506_v14 = vcombine.low %v816_v31, %v820_v33  ;;  %v5531_v33 = vcombine.high %v840_v28, %v844_v25 }
 0x2ea   :  { %v5517_v11 = vcombine.high %v825_v40, %v829_v52  ;;  %v5516_v20 = vcombine.low %v825_v40, %v829_v52  ;;  %v856_v52 = vld [vmem:[#allocation7 + $0xd10] sm:$0xff] }
 0x2eb   :  { %4007 = vmatpush1.bf16.msra.mxu0 %v5482_v13  ;;  %v836_v13 = vld [vmem:[#allocation7 + $0xc70] sm:$0xff] }
 0x2ec   :  { %4179 = vmatpush1.bf16.msra.mxu1 %v5484_v16  ;;  %4008 = vmatprep.subr.bf16.mxu0 %v5491_v18  ;;  %v5514_v16 = vcombine.low %v824_v54, %v828_v51  ;;  %v833_v18 = vld [vmem:[#allocation7 + $0xc58] sm:$0xff]  ;;  %v5523_v21 = vcombine.high %v832_v2, %v836_v13  ;;  %v5530_v54 = vcombine.low %v840_v28, %v844_v25 }
 0x2ed   :  { %4180 = vmatprep.subr.bf16.mxu1 %v5493_v17  ;;  %v837_v17 = vld [vmem:[#allocation7 + $0xc78] sm:$0xff] }
 0x2ee   :  { %v5524_v31 = vcombine.low %v833_v18, %v837_v17  ;;  %v865_v28 = vld [vmem:[#allocation7 + $0xd58] sm:$0xff] }
 0x2ef   :  { %4009 = vmatpush1.bf16.msra.mxu0 %v5490_v0  ;;  %v5525_v0 = vcombine.high %v833_v18, %v837_v17  ;;  %v864_v18 = vld [vmem:[#allocation7 + $0xd50] sm:$0xff]  ;;  %v869_v25 = vld [vmem:[#allocation7 + $0xd78] sm:$0xff] }
 0x2f0   :  { %4181 = vmatpush1.bf16.msra.mxu1 %v5492_v19  ;;  %4010 = vmatprep.subr.bf16.mxu0 %v5499_v30  ;;  %v841_v19 = vld [vmem:[#allocation7 + $0xc98] sm:$0xff]  ;;  %v868_v17 = vld [vmem:[#allocation7 + $0xd70] sm:$0xff] }
 0x2f1   :  { %4182 = vmatprep.subr.bf16.mxu1 %v5501_v32  ;;  %v845_v30 = vld [vmem:[#allocation7 + $0xcb8] sm:$0xff]  ;;  %v5522_v32 = vcombine.low %v832_v2, %v836_v13 }
 0x2f2   :  { %v5533_v36 = vcombine.high %v841_v19, %v845_v30 }
 0x2f3   :  { %4011 = vmatpush1.bf16.msra.mxu0 %v5498_v38  ;;  %v852_v38 = vld [vmem:[#allocation7 + $0xcf0] sm:$0xff] }
 0x2f4   :  { %4183 = vmatpush1.bf16.msra.mxu1 %v5500_v55  ;;  %4012 = vmatprep.subr.bf16.mxu0 %v5507_v37  ;;  %v849_v55 = vld [vmem:[#allocation7 + $0xcd8] sm:$0xff]  ;;  %v5539_v51 = vcombine.high %v848_v24, %v852_v38 }
 0x2f5   :  { %4184 = vmatprep.subr.bf16.mxu1 %v5509_v39  ;;  %v853_v37 = vld [vmem:[#allocation7 + $0xcf8] sm:$0xff]  ;;  %v952_v39 = vlaneseq }
 0x2f6   :  { %v5541_v40 = vcombine.high %v849_v55, %v853_v37  ;;  %v5540_v2 = vcombine.low %v849_v55, %v853_v37  ;;  %v872_v55 = vld [vmem:[#allocation7 + $0xd90] sm:$0xff] }
 0x2f7   :  { %4013 = vmatpush1.bf16.msra.mxu0 %v5506_v14  ;;  %v860_v14 = vld [vmem:[#allocation7 + $0xd30] sm:$0xff] }
 0x2f8   :  { %4185 = vmatpush1.bf16.msra.mxu1 %v5508_v60  ;;  %4025 = vmatprep.subr.bf16.mxu0 %v5515_v1  ;;  %v857_v60 = vld [vmem:[#allocation7 + $0xd18] sm:$0xff]  ;;  %v6531_v1 = vshrl.u32 %v952_v39, 7  ;;  %v5547_v13 = vcombine.high %v856_v52, %v860_v14  ;;  %v876_v37 = vld [vmem:[#allocation7 + $0xdb0] sm:$0xff] }
 0x2f9   :  { %4197 = vmatprep.subr.bf16.mxu1 %v5517_v11  ;;  %v5538_v11 = vcombine.low %v848_v24, %v852_v38 }
 0x2fa   :  { %4015 = vmatmul.mubr.bf16.vlgmr.msra.gmra.mrb[4].mxu0 %v6495_v15 }
 0x2fb   :  { %4187 = vmatmul.mubr.bf16.vlgmr.msra.gmra.mrb[20].mxu1 %v6495_v15  ;;  %4026 = vmatpush1.bf16.msra.mxu0 %v5514_v16  ;;  %v5532_v15 = vcombine.low %v841_v19, %v845_v30  ;;  %v6535_v19 = vld [vmem:[#allocation8] sm:$0xff]  ;;  %v958_v30 = vsub.s32 1, %v6531_v1 }
 0x2fc   :  { %4057 = vmatprep.mubr.bf16.mxu0 %v6501_v27  ;;  %4198 = vmatpush1.bf16.msra.mxu1 %v5516_v20  ;;  %v954_v20 = vsub.s32 0, %v6531_v1 }
 0x2fd   :  { %4229 = vmatprep.mubr.bf16.mxu1 %v6501_v27  ;;  %4027 = vmatprep.subr.bf16.mxu0 %v5523_v21  ;;  %v861_v27 = vld [vmem:[#allocation7 + $0xd38] sm:$0xff]  ;;  %v962_v21 = vsub.s32 2, %v6531_v1  ;;  %v959_v39 = vrot.slane %v6535_v19, %v958_v30 }
 0x2fe   :  { %4199 = vmatprep.subr.bf16.mxu1 %v5525_v0  ;;  %v5549_v16 = vcombine.high %v857_v60, %v861_v27  ;;  %v5546_v0 = vcombine.low %v856_v52, %v860_v14  ;;  %v955_v24 = vrot.slane %v6535_v19, %v954_v20  ;;  %v6543_v52 = vld [vmem:[#allocation7 + $0xdd0] sm:$0xff]  ;;  %v5556_v14 = vcombine.low %v865_v28, %v869_v25 }
 0x2ff   :  { %4028 = vmatpush1.bf16.msra.mxu0 %v5522_v32  ;;  %v966_v32 = vsub.s32 3, %v6531_v1  ;;  %v963_v38 = vrot.slane %v6535_v19, %v962_v21  ;;  %v5563_v20 = vcombine.high %v872_v55, %v876_v37 }
 0x300   :  { %4200 = vmatpush1.bf16.msra.mxu1 %v5524_v31  ;;  %4029 = vmatprep.subr.bf16.mxu0 %v5531_v33  ;;  %v5548_v31 = vcombine.low %v857_v60, %v861_v27  ;;  %v5555_v33 = vcombine.high %v864_v18, %v868_v17  ;;  %v6545_v60 = vld [vmem:[#allocation7 + $0xdf0] sm:$0xff]  ;;  %v6547_v27 = vld [vmem:[#allocation7 + $0xdd8] sm:$0xff] }
 0x301   :  { %4201 = vmatprep.subr.bf16.mxu1 %v5533_v36  ;;  %v5557_v36 = vcombine.high %v865_v28, %v869_v25  ;;  %v5571_v7 = vcombine.high %v6543_v52, %v6545_v60 }
 0x303   :  { %4030 = vmatpush1.bf16.msra.mxu0 %v5530_v54  ;;  %v967_v54 = vrot.slane %v6535_v19, %v966_v32 }
 0x304   :  { %4202 = vmatpush1.bf16.msra.mxu1 %v5532_v15  ;;  %4031 = vmatprep.subr.bf16.mxu0 %v5539_v51  ;;  %v5554_v15 = vcombine.low %v864_v18, %v868_v17  ;;  %v873_v51 = vld [vmem:[#allocation7 + $0xd98] sm:$0xff] }
 0x305   :  { %4203 = vmatprep.subr.bf16.mxu1 %v5541_v40  ;;  %v877_v40 = vld [vmem:[#allocation7 + $0xdb8] sm:$0xff] }
 0x306   :  { %v5564_v30 = vcombine.low %v873_v51, %v877_v40  ;;  %v5565_v32 = vcombine.high %v873_v51, %v877_v40 }
 0x307   :  { %4032 = vmatpush1.bf16.msra.mxu0 %v5538_v11  ;;  %v6549_v11 = vld [vmem:[#allocation7 + $0xdf8] sm:$0xff] }
 0x308   :  { %4204 = vmatpush1.bf16.msra.mxu1 %v5540_v2  ;;  %4033 = vmatprep.subr.bf16.mxu0 %v5547_v13  ;;  %v5573_v10 = vcombine.high %v6547_v27, %v6549_v11  ;;  %v5572_v43 = vcombine.low %v6547_v27, %v6549_v11 }
 0x309   :  { %4205 = vmatprep.subr.bf16.mxu1 %v5549_v16  ;;  %v5562_v16 = vcombine.low %v872_v55, %v876_v37 }
 0x30b   :  { %4034 = vmatpush1.bf16.msra.mxu0 %v5546_v0 }
 0x30c   :  { %4206 = vmatpush1.bf16.msra.mxu1 %v5548_v31  ;;  %4035 = vmatprep.subr.bf16.mxu0 %v5555_v33 }
 0x30d   :  { %v3715_v2 = vpop.f32.mrb[0].mxu0  ;;  %v3887_v13 = vpop.f32.mrb[16].mxu1  ;;  %4207 = vmatprep.subr.bf16.mxu1 %v5557_v36  ;;  %v888_v36 = vld [vmem:[#allocation7 + $0xe10] sm:$0xff] }
 0x30e   :  { %v5829_v21 = vadd.f32 %v3715_v2, %v955_v24  ;;  %v5833_v18 = vadd.f32 %v3887_v13, %v963_v38  ;;  %v3717_v17 = vpop.f32.mrb[1].mxu0  ;;  %v3889_v0 = vpop.f32.mrb[17].mxu1 }
 0x30f   :  { %v5830_v31 = vadd.f32 %v3717_v17, %v959_v39  ;;  %v5834_v33 = vadd.f32 %v3889_v0, %v967_v54  ;;  %v3719_v28 = vpop.f32.mrb[2].mxu0  ;;  %v3891_v25 = vpop.f32.mrb[18].mxu1  ;;  %4036 = vmatpush1.bf16.msra.mxu0 %v5554_v15  ;;  %v892_v17 = vld [vmem:[#allocation7 + $0xe30] sm:$0xff]  ;;  %v889_v15 = vld [vmem:[#allocation7 + $0xe18] sm:$0xff] }
 0x310   :  { %v4240_v55 = vadd.f32 %v5829_v21, %v414_v53  ;;  %v4242_v37 = vadd.f32 %v5833_v18, %v416_v56  ;;  %v5831_v2 = vadd.f32 %v3719_v28, %v955_v24  ;;  %v5835_v51 = vadd.f32 %v3891_v25, %v963_v38  ;;  %4208 = vmatpush1.bf16.msra.mxu1 %v5556_v14  ;;  %v3721_v40 = vpop.f32.mrb[3].mxu0  ;;  %v3893_v13 = vpop.f32.mrb[19].mxu1  ;;  %v893_v0 = vld [vmem:[#allocation7 + $0xe38] sm:$0xff]  ;;  %v896_v14 = vld [vmem:[#allocation7 + $0xe50] sm:$0xff] }
 0x311   :  { %v4241_v35 = vadd.f32 %v5830_v31, %v415_v48  ;;  %v4243_v47 = vadd.f32 %v5834_v33, %v417_v3  ;;  %v5832_v6 = vadd.f32 %v3721_v40, %v959_v39  ;;  %v5836_v42 = vadd.f32 %v3893_v13, %v967_v54  ;;  %4037 = vmatprep.subr.bf16.mxu0 %v5563_v20  ;;  %v905_v20 = vld [vmem:[#allocation7 + $0xe98] sm:$0xff]  ;;  %v912_v33 = vld [vmem:[#allocation7 + $0xed0] sm:$0xff] }
 0x312   :  { %v4248_v53 = vadd.f32 %v5831_v2, %v422_v45  ;;  %v4250_v62 = vadd.f32 %v5835_v51, %v424_v58  ;;  %4209 = vmatprep.subr.bf16.mxu1 %v5565_v32  ;;  %v5570_v56 = vcombine.low %v6543_v52, %v6545_v60  ;;  %v5579_v3 = vcombine.high %v888_v36, %v892_v17  ;;  %v909_v21 = vld [vmem:[#allocation7 + $0xeb8] sm:$0xff]  ;;  %v916_v28 = vld [vmem:[#allocation7 + $0xef0] sm:$0xff] }
 0x313   :  { %v4249_v48 = vadd.f32 %v5832_v6, %v423_v49  ;;  %v4251_v63 = vadd.f32 %v5836_v42, %v425_v12  ;;  %4038 = vmatpush1.bf16.msra.mxu0 %v5562_v16  ;;  %v5581_v44 = vcombine.high %v889_v15, %v893_v0  ;;  %v4256_v45 = vmax.f32 %v4240_v55, 0.0  ;;  %v897_v12 = vld [vmem:[#allocation7 + $0xe58] sm:$0xff]  ;;  %v908_v16 = vld [vmem:[#allocation7 + $0xeb0] sm:$0xff] }
 0x314   :  { %v4258_v24 = vmax.f32 %v4242_v37, 0.0  ;;  %v4264_v4 = vmax.f32 %v4248_v53, 0.0  ;;  %v4266_v58 = vmax.f32 %v4250_v62, 0.0  ;;  %4210 = vmatpush1.bf16.msra.mxu1 %v5564_v30  ;;  %4039 = vmatprep.subr.bf16.mxu0 %v5571_v7  ;;  %v4257_v38 = vmax.f32 %v4241_v35, 0.0  ;;  %v901_v6 = vld [vmem:[#allocation7 + $0xe78] sm:$0xff]  ;;  %v904_v35 = vld [vmem:[#allocation7 + $0xe90] sm:$0xff] }
 0x315   :  { %v4259_v39 = vmax.f32 %v4243_v47, 0.0  ;;  %v4265_v54 = vmax.f32 %v4249_v48, 0.0  ;;  %v4267_v52 = vmax.f32 %v4251_v63, 0.0  ;;  %4211 = vmatprep.subr.bf16.mxu1 %v5573_v10  ;;  %v5578_v60 = vcombine.low %v888_v36, %v892_v17  ;;  %v913_v25 = vld [vmem:[#allocation7 + $0xed8] sm:$0xff]  ;;  %v920_v40 = vld [vmem:[#allocation7 + $0xf10] sm:$0xff] }
 0x316   :  { %v6575_v49 = vpack.c.bf16 %v4264_v4, %v4256_v45  ;;  %v6577_v8 = vpack.c.bf16 %v4266_v58, %v4258_v24  ;;  %v5580_v47 = vcombine.low %v889_v15, %v893_v0  ;;  %v5587_v7 = vcombine.high %v896_v14, %v900_v46  ;;  %v917_v36 = vld [vmem:[#allocation7 + $0xef8] sm:$0xff]  ;;  %v924_v13 = vld [vmem:[#allocation7 + $0xf30] sm:$0xff] }
 0x317   :  { %4040 = vmatpush1.bf16.msra.mxu0 %v5570_v56  ;;  %v6579_v27 = vpack.c.bf16 %v4265_v54, %v4257_v38  ;;  %v6581_v11 = vpack.c.bf16 %v4267_v52, %v4259_v39  ;;  %v5589_v10 = vcombine.high %v897_v12, %v901_v6  ;;  %v5586_v18 = vcombine.low %v896_v14, %v900_v46  ;;  %v921_v17 = vld [vmem:[#allocation7 + $0xf18] sm:$0xff]  ;;  %v928_v56 = vld [vmem:[#allocation7 + $0xf50] sm:$0xff] }
 0x318   :  { %4212 = vmatpush1.bf16.msra.mxu1 %v5572_v43  ;;  %4041 = vmatprep.subr.bf16.mxu0 %v5579_v3  ;;  %v5588_v30 = vcombine.low %v897_v12, %v901_v6  ;;  %v5595_v32 = vcombine.high %v904_v35, %v908_v16  ;;  %v5597_v31 = vcombine.high %v905_v20, %v909_v21  ;;  %v925_v15 = vld [vmem:[#allocation7 + $0xf38] sm:$0xff]  ;;  %v932_v43 = vld [vmem:[#allocation7 + $0xf70] sm:$0xff] }
 0x319   :  { %4213 = vmatprep.subr.bf16.mxu1 %v5581_v44  ;;  %v5594_v55 = vcombine.low %v904_v35, %v908_v16  ;;  %v5596_v37 = vcombine.low %v905_v20, %v909_v21  ;;  %v5603_v2 = vcombine.high %v912_v33, %v916_v28  ;;  %v5605_v51 = vcombine.high %v913_v25, %v917_v36  ;;  %v929_v48 = vld [vmem:[#allocation7 + $0xf58] sm:$0xff]  ;;  %v936_v4 = vld [vmem:[#allocation7 + $0xf90] sm:$0xff] }
 0x31a   :  { %v5602_v0 = vcombine.low %v912_v33, %v916_v28  ;;  %v5604_v42 = vcombine.low %v913_v25, %v917_v36  ;;  %v5611_v53 = vcombine.high %v920_v40, %v924_v13  ;;  %v5613_v62 = vcombine.high %v921_v17, %v925_v15  ;;  %v933_v63 = vld [vmem:[#allocation7 + $0xf78] sm:$0xff]  ;;  %v940_v58 = vld [vmem:[#allocation7 + $0xfb0] sm:$0xff] }
 0x31b   :  { %4042 = vmatpush1.bf16.msra.mxu0 %v5578_v60  ;;  %v5610_v3 = vcombine.low %v920_v40, %v924_v13  ;;  %v5612_v44 = vcombine.low %v921_v17, %v925_v15  ;;  %v5619_v45 = vcombine.high %v928_v56, %v932_v43  ;;  %v5621_v24 = vcombine.high %v929_v48, %v933_v63  ;;  %v937_v38 = vld [vmem:[#allocation7 + $0xf98] sm:$0xff]  ;;  %v944_v12 = vld [vmem:[#allocation7 + $0xfd0] sm:$0xff]  ;;  %v5932_v40 = vld [vmem:[#allocation10 + $0x58] sm:$0xff]  }
 0x31c   :  { %4214 = vmatpush1.bf16.msra.mxu1 %v5580_v47  ;;  %4043 = vmatprep.subr.bf16.mxu0 %v5587_v7  ;;  %v941_v39 = vld [vmem:[#allocation7 + $0xfb8] sm:$0xff]  ;;  %v5618_v54 = vcombine.low %v928_v56, %v932_v43  ;;  %v5620_v52 = vcombine.low %v929_v48, %v933_v63  ;;  %v5627_v14 = vcombine.high %v936_v4, %v940_v58  ;;  %v948_v6 = vld [vmem:[#allocation7 + $0xff0] sm:$0xff]  ;;  %v5934_v13 = vld [vmem:[#allocation10 + $0x18] sm:$0xff]  }
 0x31d   :  { %4215 = vmatprep.subr.bf16.mxu1 %v5589_v10  ;;  %v5629_v46 = vcombine.high %v937_v38, %v941_v39  ;;  %v945_v60 = vld [vmem:[#allocation7 + $0xfd8] sm:$0xff]  ;;  %v5626_v7 = vcombine.low %v936_v4, %v940_v58  ;;  %v5628_v10 = vcombine.low %v937_v38, %v941_v39  ;;  %v5635_v35 = vcombine.high %v944_v12, %v948_v6  ;;  %v5924_v33 = vld [vmem:[#allocation10 + $0x48] sm:$0xff]   ;;  %v5936_v17 = vld [vmem:[#allocation10 + $0x60] sm:$0xff]  }
 0x31e   :  { %v949_v47 = vld [vmem:[#allocation7 + $0xff8] sm:$0xff]  ;;  %v5634_v20 = vcombine.low %v944_v12, %v948_v6  ;;  %v5925_v28 = vld [vmem:[#allocation10 + $0xc8] sm:$0xff]   ;;  %v5937_v15 = vld [vmem:[#allocation10 + $0xe0] sm:$0xff]  }
 0x31f   :  { %4044 = vmatpush1.bf16.msra.mxu0 %v5586_v18  ;;  %v5637_v16 = vcombine.high %v945_v60, %v949_v47  ;;  %v5636_v21 = vcombine.low %v945_v60, %v949_v47  ;;  %v5920_v18 = vld [vmem:[#allocation10 + $0x40] sm:$0xff]   ;;  %v5926_v25 = vld [vmem:[#allocation10 + $0x8] sm:$0xff]   ;;  %v5944_v43 = vld [vmem:[#allocation10 + $0x70] sm:$0xff]  }
 0x320   :  { %4216 = vmatpush1.bf16.msra.mxu1 %v5588_v30  ;;  %4045 = vmatprep.subr.bf16.mxu0 %v5595_v32  ;;  %v5921_v30 = vld [vmem:[#allocation10 + $0xc0] sm:$0xff]   ;;  %v5927_v36 = vld [vmem:[#allocation10 + $0x88] sm:$0xff]   ;;  %v5945_v48 = vld [vmem:[#allocation10 + $0xf0] sm:$0xff]  }
 0x321   :  { %4217 = vmatprep.subr.bf16.mxu1 %v5597_v31  ;;  %v5922_v32 = vld [vmem:[#allocation10] sm:$0xff]   ;;  %v5943_v56 = vld [vmem:[#allocation10 + $0xa8] sm:$0xff]   ;;  %v5946_v63 = vld [vmem:[#allocation10 + $0x30] sm:$0xff]  }
 0x322   :  { %v5923_v31 = vld [vmem:[#allocation10 + $0x80] sm:$0xff]   ;;  %v5951_v4 = vld [vmem:[#allocation10 + $0xb8] sm:$0xff]   ;;  %v5959_v12 = vld [vmem:[#allocation10 + $0x188] sm:$0xff]  }
 0x323   :  { %4046 = vmatpush1.bf16.msra.mxu0 %v5594_v55  ;;  %v5928_v55 = vld [vmem:[#allocation10 + $0x50] sm:$0xff]   ;;  %v5952_v58 = vld [vmem:[#allocation10 + $0x140] sm:$0xff]  }
 0x324   :  { %4218 = vmatpush1.bf16.msra.mxu1 %v5596_v37  ;;  %4047 = vmatprep.subr.bf16.mxu0 %v5603_v2  ;;  %v5929_v37 = vld [vmem:[#allocation10 + $0xd0] sm:$0xff]   ;;  %v5953_v38 = vld [vmem:[#allocation10 + $0x1c0] sm:$0xff]  }
 0x325   :  { %4219 = vmatprep.subr.bf16.mxu1 %v5605_v51  ;;  %v5930_v2 = vld [vmem:[#allocation10 + $0x10] sm:$0xff]   ;;  %v5954_v39 = vld [vmem:[#allocation10 + $0x100] sm:$0xff]  }
 0x326   :  { %v5931_v51 = vld [vmem:[#allocation10 + $0x90] sm:$0xff]  }
 0x327   :  { %4048 = vmatpush1.bf16.msra.mxu0 %v5602_v0  ;;  %v5939_v0 = vld [vmem:[#allocation10 + $0xa0] sm:$0xff]   ;;  %v5960_v6 = vld [vmem:[#allocation10 + $0x150] sm:$0xff]  }
 0x328   :  { %4220 = vmatpush1.bf16.msra.mxu1 %v5604_v42  ;;  %4049 = vmatprep.subr.bf16.mxu0 %v5611_v53  ;;  %v5940_v42 = vld [vmem:[#allocation10 + $0x68] sm:$0xff]   ;;  %v5961_v60 = vld [vmem:[#allocation10 + $0x1d0] sm:$0xff]  }
 0x329   :  { %4221 = vmatprep.subr.bf16.mxu1 %v5613_v62  ;;  %v5941_v53 = vld [vmem:[#allocation10 + $0xe8] sm:$0xff]   ;;  %v5962_v47 = vld [vmem:[#allocation10 + $0x110] sm:$0xff]  }
 0x32a   :  { %v5942_v62 = vld [vmem:[#allocation10 + $0x28] sm:$0xff]  }
 0x32b   :  { %4050 = vmatpush1.bf16.msra.mxu0 %v5610_v3  ;;  %v5947_v3 = vld [vmem:[#allocation10 + $0xb0] sm:$0xff]  }
 0x32c   :  { %4222 = vmatpush1.bf16.msra.mxu1 %v5612_v44  ;;  %4051 = vmatprep.subr.bf16.mxu0 %v5619_v45  ;;  %v5948_v44 = vld [vmem:[#allocation10 + $0x78] sm:$0xff]  }
 0x32d   :  { %4223 = vmatprep.subr.bf16.mxu1 %v5621_v24  ;;  %v5949_v45 = vld [vmem:[#allocation10 + $0xf8] sm:$0xff]  }
 0x32e   :  { %v5950_v24 = vld [vmem:[#allocation10 + $0x38] sm:$0xff]  }
 0x32f   :  { %4052 = vmatpush1.bf16.msra.mxu0 %v5618_v54  ;;  %v5955_v54 = vld [vmem:[#allocation10 + $0x180] sm:$0xff]  }
 0x330   :  { %4224 = vmatpush1.bf16.msra.mxu1 %v5620_v52  ;;  %4053 = vmatprep.subr.bf16.mxu0 %v5627_v14  ;;  %v5956_v52 = vld [vmem:[#allocation10 + $0x148] sm:$0xff]  }
 0x331   :  { %4225 = vmatprep.subr.bf16.mxu1 %v5629_v46  ;;  %v5957_v14 = vld [vmem:[#allocation10 + $0x1c8] sm:$0xff]  }
 0x332   :  { %v5958_v46 = vld [vmem:[#allocation10 + $0x108] sm:$0xff]  }
 0x333   :  { %4054 = vmatpush1.bf16.msra.mxu0 %v5626_v7  ;;  %v5963_v7 = vld [vmem:[#allocation10 + $0x190] sm:$0xff]  }
 0x334   :  { %4226 = vmatpush1.bf16.msra.mxu1 %v5628_v10  ;;  %4055 = vmatprep.subr.bf16.mxu0 %v5635_v35  ;;  %v5964_v10 = vld [vmem:[#allocation10 + $0x158] sm:$0xff]  }
 0x335   :  { %4227 = vmatprep.subr.bf16.mxu1 %v5637_v16  ;;  %v5965_v35 = vld [vmem:[#allocation10 + $0x1d8] sm:$0xff]   ;;  %v5968_v16 = vld [vmem:[#allocation10 + $0x160] sm:$0xff]  }
 0x337   :  { %4056 = vmatpush1.bf16.msra.mxu0 %v5634_v20  ;;  %v5969_v20 = vld [vmem:[#allocation10 + $0x1e0] sm:$0xff]  }
 0x338   :  { %4228 = vmatpush1.bf16.msra.mxu1 %v5636_v21  ;;  %5712 = vmatprep.subr.bf16.mxu0 %v5920_v18  ;;  %v5970_v21 = vld [vmem:[#allocation10 + $0x120] sm:$0xff]  }
 0x339   :  { %5734 = vmatprep.subr.bf16.mxu1 %v5921_v30  ;;  %v5971_v18 = vld [vmem:[#allocation10 + $0x1a0] sm:$0xff]   ;;  %v5972_v30 = vld [vmem:[#allocation10 + $0x168] sm:$0xff]  }
 0x33a   :  { %4058 = vmatmul.mubr.bf16.vlgmr.msra.gmra.mrb[4].mxu0 %v6513_v59 }
 0x33b   :  { %4230 = vmatmul.mubr.bf16.vlgmr.msra.gmra.mrb[20].mxu1 %v6513_v59  ;;  %5713 = vmatpush3.bf16.msra.mxu0 %v5922_v32  ;;  %v5933_v59 = vld [vmem:[#allocation10 + $0xd8] sm:$0xff]   ;;  %v5973_v32 = vld [vmem:[#allocation10 + $0x1e8] sm:$0xff]  }
 0x33c   :  { %4831 = vmatprep.mubr.bf16.mxu0 %v6579_v27  ;;  %5735 = vmatpush3.bf16.msra.mxu1 %v5923_v31  ;;  %v5935_v27 = vld [vmem:[#allocation10 + $0x98] sm:$0xff]   ;;  %v5974_v31 = vld [vmem:[#allocation10 + $0x128] sm:$0xff]  }
 0x33d   :  { %4872 = vmatprep.mubr.bf16.mxu1 %v6581_v11  ;;  %5714 = vmatprep.subr.bf16.mxu0 %v5924_v33  ;;  %v5938_v11 = vld [vmem:[#allocation10 + $0x20] sm:$0xff]   ;;  %v5975_v33 = vld [vmem:[#allocation10 + $0x1a8] sm:$0xff]  }
 0x33e   :  { %5736 = vmatprep.subr.bf16.mxu1 %v5925_v28  ;;  %v5976_v28 = vld [vmem:[#allocation10 + $0x170] sm:$0xff]  }
 0x33f   :  { %5715 = vmatpush3.bf16.msra.mxu0 %v5926_v25  ;;  %v5977_v25 = vld [vmem:[#allocation10 + $0x1f0] sm:$0xff]  }
 0x340   :  { %5737 = vmatpush3.bf16.msra.mxu1 %v5927_v36  ;;  %5716 = vmatprep.subr.bf16.mxu0 %v5928_v55  ;;  %v5978_v36 = vld [vmem:[#allocation10 + $0x130] sm:$0xff]  }
 0x341   :  { %5738 = vmatprep.subr.bf16.mxu1 %v5929_v37  ;;  %v5979_v55 = vld [vmem:[#allocation10 + $0x1b0] sm:$0xff]   ;;  %v5980_v37 = vld [vmem:[#allocation10 + $0x178] sm:$0xff]  }
 0x343   :  { %5717 = vmatpush3.bf16.msra.mxu0 %v5930_v2  ;;  %v5981_v2 = vld [vmem:[#allocation10 + $0x1f8] sm:$0xff]  }
 0x344   :  { %5739 = vmatpush3.bf16.msra.mxu1 %v5931_v51  ;;  %5718 = vmatprep.subr.bf16.mxu0 %v5932_v40  ;;  %v5982_v51 = vld [vmem:[#allocation10 + $0x138] sm:$0xff]  }
 0x345   :  { %5740 = vmatprep.subr.bf16.mxu1 %v5933_v59  ;;  %v5983_v40 = vld [vmem:[#allocation10 + $0x1b8] sm:$0xff]   ;;  %v6215_v59 = vmov 0.0  }
 0x347   :  { %5719 = vmatpush3.bf16.msra.mxu0 %v5934_v13  ;;  %v970_v13 = vsub.s32 4, %v6531_v1 }
 0x348   :  { %5741 = vmatpush3.bf16.msra.mxu1 %v5935_v27  ;;  %5720 = vmatprep.subr.bf16.mxu0 %v5936_v17  ;;  %v978_v27 = vsub.s32 6, %v6531_v1  ;;  %v974_v17 = vsub.s32 5, %v6531_v1 }
 0x349   :  { %5742 = vmatprep.subr.bf16.mxu1 %v5937_v15  ;;  %v982_v15 = vsub.s32 7, %v6531_v1 }
 0x34b   :  { %5721 = vmatpush3.bf16.msra.mxu0 %v5938_v11  ;;  %v971_v11 = vrot.slane %v6535_v19, %v970_v13 }
 0x34c   :  { %5743 = vmatpush3.bf16.msra.mxu1 %v5939_v0  ;;  %5722 = vmatprep.subr.bf16.mxu0 %v5940_v42  ;;  %v979_v0 = vrot.slane %v6535_v19, %v978_v27  ;;  %v975_v42 = vrot.slane %v6535_v19, %v974_v17 }
 0x34d   :  { %5744 = vmatprep.subr.bf16.mxu1 %v5941_v53  ;;  %v983_v53 = vrot.slane %v6535_v19, %v982_v15 }
 0x34f   :  { %5723 = vmatpush3.bf16.msra.mxu0 %v5942_v62 }
 0x350   :  { %5745 = vmatpush3.bf16.msra.mxu1 %v5943_v56  ;;  %5724 = vmatprep.subr.bf16.mxu0 %v5944_v43 }
 0x351   :  { %5746 = vmatprep.subr.bf16.mxu1 %v5945_v48 }
 0x353   :  { %5725 = vmatpush3.bf16.msra.mxu0 %v5946_v63 }
 0x354   :  { %5747 = vmatpush3.bf16.msra.mxu1 %v5947_v3  ;;  %5726 = vmatprep.subr.bf16.mxu0 %v5948_v44 }
 0x355   :  { %5748 = vmatprep.subr.bf16.mxu1 %v5949_v45 }
 0x357   :  { %5727 = vmatpush3.bf16.msra.mxu0 %v5950_v24 }
 0x358   :  { %5749 = vmatpush3.bf16.msra.mxu1 %v5951_v4  ;;  %5756 = vmatprep.subr.bf16.mxu0 %v5952_v58 }
 0x359   :  { %5778 = vmatprep.subr.bf16.mxu1 %v5953_v38 }
 0x35a   :  { %4832 = vmatmul.mubr.bf16.vlgmr.msra.gmra.mrb[8].mxu0 %v6575_v49  ;;  %v5966_v49 = vld [vmem:[#allocation10 + $0x118] sm:$0xff]  }
 0x35b   :  { %4873 = vmatmul.mubr.bf16.vlgmr.msra.gmra.mrb[24].mxu1 %v6577_v8  ;;  %5757 = vmatpush3.bf16.msra.mxu0 %v5954_v39  ;;  %v5967_v8 = vld [vmem:[#allocation10 + $0x198] sm:$0xff]  }
 0x35c   :  { %5779 = vmatpush3.bf16.msra.mxu1 %v5955_v54  ;;  %5758 = vmatprep.subr.bf16.mxu0 %v5956_v52 }
 0x35d   :  { %5780 = vmatprep.subr.bf16.mxu1 %v5957_v14 }
 0x35f   :  { %5759 = vmatpush3.bf16.msra.mxu0 %v5958_v46  ;;  %v6648_v46 = vmax.f32 %v6461_v57, 0.0 }
 0x360   :  { %5781 = vmatpush3.bf16.msra.mxu1 %v5959_v12  ;;  %5760 = vmatprep.subr.bf16.mxu0 %v5960_v6  ;;  %v6649_v6 = vmax.f32 %v6455_v26, 0.0 }
 0x361   :  { %5782 = vmatprep.subr.bf16.mxu1 %v5961_v60  ;;  %v6650_v60 = vmax.f32 %v6463_v61, 0.0 }
 0x363   :  { %5761 = vmatpush3.bf16.msra.mxu0 %v5962_v47 }
 0x364   :  { %5783 = vmatpush3.bf16.msra.mxu1 %v5963_v7  ;;  %5762 = vmatprep.subr.bf16.mxu0 %v5964_v10  ;;  %v6651_v7 = vmax.f32 %v6457_v29, 0.0  ;;  %v5985_v29 = vld [vmem:[#allocation13 + $0x8] sm:$0xff]  }
 0x365   :  { %5784 = vmatprep.subr.bf16.mxu1 %v5965_v35 }
 0x367   :  { %5763 = vmatpush3.bf16.msra.mxu0 %v5966_v49 }
 0x368   :  { %5785 = vmatpush3.bf16.msra.mxu1 %v5967_v8  ;;  %5764 = vmatprep.subr.bf16.mxu0 %v5968_v16 }
 0x369   :  { %5786 = vmatprep.subr.bf16.mxu1 %v5969_v20 }
 0x36b   :  { %5765 = vmatpush3.bf16.msra.mxu0 %v5970_v21 }
 0x36c   :  { %5787 = vmatpush3.bf16.msra.mxu1 %v5971_v18  ;;  %5766 = vmatprep.subr.bf16.mxu0 %v5972_v30  ;;  %v5984_v30 = vld [vmem:[#allocation13] sm:$0xff]  }
 0x36d   :  { %5788 = vmatprep.subr.bf16.mxu1 %v5973_v32  ;;  %v5987_v32 = vld [vmem:[#allocation13 + $0x18] sm:$0xff]  }
 0x36f   :  { %5767 = vmatpush3.bf16.msra.mxu0 %v5974_v31  ;;  %v5988_v31 = vld [vmem:[#allocation13 + $0x20] sm:$0xff]  }
 0x370   :  { %5789 = vmatpush3.bf16.msra.mxu1 %v5975_v33  ;;  %5768 = vmatprep.subr.bf16.mxu0 %v5976_v28 }
 0x371   :  { %5790 = vmatprep.subr.bf16.mxu1 %v5977_v25  ;;  %v5638_v25 = vld [vmem:[#allocation11] ss:$0 sm:$0xff] }
 0x373   :  { %5769 = vmatpush3.bf16.msra.mxu0 %v5978_v36 }
 0x374   :  { %5791 = vmatpush3.bf16.msra.mxu1 %v5979_v55  ;;  %5770 = vmatprep.subr.bf16.mxu0 %v5980_v37 }
 0x375   :  { %5792 = vmatprep.subr.bf16.mxu1 %v5981_v2 }
 0x377   :  { %5771 = vmatpush3.bf16.msra.mxu0 %v5982_v51 }
 0x378   :  { %5793 = vmatpush3.bf16.msra.mxu1 %v5983_v40  ;;  %5809 = vmatprep.subr.bf16.mxu0 %v6215_v59 }
 0x40d   :  { %v4059_v62 = vpop.f32.mrb[4].mxu0 }
 0x40e   :  { %v5837_v56 = vadd.f32 %v4059_v62, %v971_v11  ;;  %v4231_v43 = vpop.f32.mrb[20].mxu1  ;;  %v4061_v48 = vpop.f32.mrb[5].mxu0  ;;  %v5989_v62 = vld [vmem:[#allocation13 + $0x28] sm:$0xff]  }
 0x40f   :  { %v5841_v63 = vadd.f32 %v4231_v43, %v979_v0  ;;  %v5838_v3 = vadd.f32 %v4061_v48, %v975_v42  ;;  %v4233_v44 = vpop.f32.mrb[21].mxu1  ;;  %v4063_v45 = vpop.f32.mrb[6].mxu0  ;;  %v5991_v43 = vld [vmem:[#allocation13 + $0x38] sm:$0xff]  }
 0x410   :  { %v4244_v24 = vadd.f32 %v5837_v56, %v418_v41  ;;  %v5842_v1 = vadd.f32 %v4233_v44, %v983_v53  ;;  %v5839_v4 = vadd.f32 %v4063_v45, %v971_v11  ;;  %v4235_v58 = vpop.f32.mrb[22].mxu1  ;;  %v4065_v38 = vpop.f32.mrb[7].mxu0  ;;  %v5990_v56 = vld [vmem:[#allocation13 + $0x30] sm:$0xff]  }
 0x411   :  { %v4246_v39 = vadd.f32 %v5841_v63, %v420_v34  ;;  %v4245_v19 = vadd.f32 %v5838_v3, %v419_v9  ;;  %v5843_v54 = vadd.f32 %v4235_v58, %v979_v0  ;;  %v5840_v52 = vadd.f32 %v4065_v38, %v975_v42  ;;  %v4237_v14 = vpop.f32.mrb[23].mxu1 }
 0x412   :  { %v4247_v12 = vadd.f32 %v5842_v1, %v6648_v46  ;;  %v4252_v22 = vadd.f32 %v5839_v4, %v6649_v6  ;;  %v5844_v41 = vadd.f32 %v4237_v14, %v983_v53  ;;  %v4260_v34 = vmax.f32 %v4244_v24, 0.0 }
 0x413   :  { %v4254_v47 = vadd.f32 %v5843_v54, %v6650_v60  ;;  %v4253_v50 = vadd.f32 %v5840_v52, %v6651_v7  ;;  %v4262_v35 = vmax.f32 %v4246_v39, 0.0  ;;  %v4261_v49 = vmax.f32 %v4245_v19, 0.0 }
 0x414   :  { %v4268_v10 = vmax.f32 %v4252_v22, 0.0  ;;  %v4255_v9 = vadd.f32 %v5844_v41, %v6652_v23  ;;  %v4263_v16 = vmax.f32 %v4247_v12, 0.0 }
 0x415   :  { %v4270_v8 = vmax.f32 %v4254_v47, 0.0  ;;  %v4269_v57 = vmax.f32 %v4253_v50, 0.0 }
 0x416   :  { %v4276_v20 = vpack.c.bf16 %v4268_v10, %v4260_v34  ;;  %v4271_v26 = vmax.f32 %v4255_v9, 0.0 }
 0x417   :  { %v4278_v21 = vpack.c.bf16 %v4270_v8, %v4262_v35  ;;  %v4277_v18 = vpack.c.bf16 %v4269_v57, %v4261_v49 }
 0x418   :  { %v4279_v61 = vpack.c.bf16 %v4271_v26, %v4263_v16 }
 0x419   :  { %4913 = vmatprep.mubr.bf16.mxu0 %v4277_v18 }
 0x41a   :  { %4954 = vmatprep.mubr.bf16.mxu1 %v4279_v61  ;;  %4914 = vmatmul.mubr.bf16.vlgmr.msra.gmra.mrb[12].mxu0 %v4276_v20 }
 0x41b   :  { %4955 = vmatmul.mubr.bf16.vlgmr.msra.gmra.mrb[28].mxu1 %v4278_v21  ;;  %5810 = vmatpush3.bf16.msra.mxu0 %v5984_v30 }
 0x41c   :  { %5811 = vmatprep.subr.bf16.mxu0 %v6215_v59  ;;  %5825 = vmatprep.mubr.msk.bf16.mxu0 %vm6216_vm2, %v6215_v59 }
 0x41f   :  { %5812 = vmatpush3.bf16.msra.mxu0 %v5985_v29 }
 0x420   :  { %5813 = vmatprep.subr.bf16.mxu0 %v6215_v59 }
 0x423   :  { %5814 = vmatpush3.bf16.msra.mxu0 %v5986_v5 }
 0x424   :  { %5815 = vmatprep.subr.bf16.mxu0 %v6215_v59 }
 0x427   :  { %5816 = vmatpush3.bf16.msra.mxu0 %v5987_v32 }
 0x428   :  { %5817 = vmatprep.subr.bf16.mxu0 %v6215_v59 }
 0x42b   :  { %5818 = vmatpush3.bf16.msra.mxu0 %v5988_v31 }
 0x42c   :  { %5819 = vmatprep.subr.bf16.mxu0 %v6215_v59 }
 0x42d   :  { %v5728_v33 = vpop.f32.mrb[8].mxu0 }
 0x42e   :  { %v5750_v28 = vpop.f32.mrb[24].mxu1  ;;  %v5729_v36 = vpop.f32.mrb[9].mxu0 }
 0x42f   :  { %v5730_v55 = vadd.f32 %v5729_v36, %v5728_v33  ;;  %v5751_v37 = vpop.f32.mrb[25].mxu1  ;;  %v5731_v2 = vpop.f32.mrb[10].mxu0  ;;  %5820 = vmatpush3.bf16.msra.mxu0 %v5989_v62 }
 0x430   :  { %v5752_v51 = vadd.f32 %v5751_v37, %v5750_v28  ;;  %v5753_v40 = vpop.f32.mrb[26].mxu1  ;;  %v5732_v13 = vpop.f32.mrb[11].mxu0  ;;  %5821 = vmatprep.subr.bf16.mxu0 %v6215_v59 }
 0x431   :  { %v4834_v27 = vadd.f32 %v5730_v55, %v5638_v25  ;;  %v5733_v17 = vadd.f32 %v5732_v13, %v5731_v2  ;;  %v5754_v15 = vpop.f32.mrb[27].mxu1 }
 0x432   :  { %v5755_v11 = vadd.f32 %v5754_v15, %v5753_v40 }
 0x433   :  { %v4875_v0 = vadd.f32 %v5752_v51, %v4834_v27  ;;  %v4837_v42 = vadd.f32 %v5733_v17, %v5638_v25  ;;  %5822 = vmatpush3.bf16.msra.mxu0 %v5990_v56 }
 0x434   :  { %5823 = vmatprep.subr.bf16.mxu0 %v6215_v59  ;;  %v5703_v59 = vld [vmem:[#allocation14] ss:$0 sm:$0xff] }
 0x435   :  { %v4878_v53 = vadd.f32 %v5755_v11, %v4837_v42 }
 0x437   :  { %5824 = vmatpush3.bf16.msra.mxu0 %v5991_v43 }
 0x4ed   :  { %v5772_v48 = vpop.f32.mrb[12].mxu0 }
 0x4ee   :  { %v5794_v63 = vpop.f32.mrb[28].mxu1  ;;  %v5773_v3 = vpop.f32.mrb[13].mxu0 }
 0x4ef   :  { %v5774_v44 = vadd.f32 %v5773_v3, %v5772_v48  ;;  %v5795_v45 = vpop.f32.mrb[29].mxu1  ;;  %v5775_v24 = vpop.f32.mrb[14].mxu0 }
 0x4f0   :  { %v5796_v1 = vadd.f32 %v5795_v45, %v5794_v63  ;;  %v5797_v4 = vpop.f32.mrb[30].mxu1  ;;  %v5776_v58 = vpop.f32.mrb[15].mxu0 }
 0x4f1   :  { %v4916_v38 = vadd.f32 %v5774_v44, %v4875_v0  ;;  %v5777_v39 = vadd.f32 %v5776_v58, %v5775_v24  ;;  %v5798_v19 = vpop.f32.mrb[31].mxu1 }
 0x4f2   :  { %v5799_v54 = vadd.f32 %v5798_v19, %v5797_v4 }
 0x4f3   :  { %v4957_v52 = vadd.f32 %v5796_v1, %v4916_v38  ;;  %v4919_v14 = vadd.f32 %v5777_v39, %v4878_v53 }
 0x4f5   :  { %v4960_v46 = vadd.f32 %v5799_v54, %v4919_v14  ;;  %v4963_v12 = vmax.f32 %v4957_v52, 0.0 }
 0x4f7   :  { %v4964_v6 = vmax.f32 %v4960_v46, 0.0 }
 0x4f9   :  { %v4965_v22 = vpack.c.bf16 %v4964_v6, %v4963_v12 }
 0x4fb   :  { %5826 = vmatmul.mubr.bf16.vlgmr.msra.gmra.mrb[16].mxu0 %v4965_v22 }
 0x5ce   :  { %v5071_v41 = vpop.f32.mrb[16].mxu0 }
 0x5cf   :  { %v5072_v60 = vadd.f32 %v5703_v59, %v5071_v41  ;;  %v5827_v47 = vpop.f32.mrb[17].mxu0 }
 0x5d0   :  { %v5074_v7 = vpop.f32.mrb[18].mxu0 }
 0x5d1   :  { %5078 = vst [vmem:[#allocation16] sm:$0xff] %v5072_v60  ;;  %v5075_v50 = vadd.f32 %v5703_v59, %v5074_v7  ;;  %v5828_v34 = vpop.f32.mrb[19].mxu0 }
 0x5d3   :  { %5079 = vst [vmem:[#allocation16 + $0x8] sm:$0xff] %v5075_v50 }
 0x5d4   :  { %6179 = shalt.err (!%p6176_p12)
}
 0x5d5   :  { %s6180_s16 = scalar_lea.hbm %s6642_s8, 256 }
 0x5d6   :  { %p6181_p13 = scmp.ne.s32.totalorder %s6642_s8, %s6180_s16  ;;  %p6184_p0 = scmp.lt.u32.totalorder %s6180_s16, %s6642_s8 }
 0x5d8   :  { %p6186_p1 = pnand %p6184_p0, %p6181_p13 }
 0x5da   :  { %6189 = shalt.err (!%p6186_p1)
}
 0x5db   :  { %s6218_s19 = smov 128   ;;  %s6219_s21 = smov 8  }
 0x5dc   :  { %5091 = dma.vmem_to_hbm [thread:$0]  %s5086_s22, 256, %s6642_s8, [#allocation4], %s6218_s19, %s6218_s19, %s6219_s21  }
 0x5dd   :  { %6200 = dma.done.wait [#allocation4], 256  }
 0x5de   :  { %6201 = vsyncadd [#allocation4], 4294967040 }
 0x5df   :  { %5095 = vsyncpa [#allocation3], 1 }
 0x5e0   :  { %5096 = vsyncpa [#allocation6], 1 }
 0x5e1   :  { %5097 = vsyncpa [#allocation9], 1 }
 0x5e2   :  { %5098 = vsyncpa [#allocation12], 1 }
 0x5e3   :  { %5099 = vsyncpa [#allocation15], 1 }
 0x5e4   :  { %5100 = vsyncpa [#allocation4], 1 }

</bundles_post_ra>
